<compile_context>
chip_gen: v7x
topology: tpu7x:2x2x1
jax: 0.10.0
libtpu: 0.0.40
codegen_flags: <defaults>
</compile_context>

<pallas_src>
import functools

import jax
import jax.numpy as jnp
from jax.experimental import pallas as pl
from jax.experimental.pallas import tpu as pltpu


def _full_conv_kernel(p, q, h, wd, ho, wo, wflip_ref, x_ref, out_ref, xpad_ref):
    # wflip_ref: (P*Q,)     pre-flipped weight, flattened, in SMEM
    # x_ref:     (B, H, W)  unpadded images for this grid step
    # out_ref:   (B, Ho, Wo) full-convolution outputs
    # xpad_ref:  (B, Hp, Wp) VMEM scratch holding the zero-padded images

    # Build the zero-padded slab in VMEM (no padded copy in HBM).  Re-zero
    # every step: it is KB-scale, and with grid <= num_TensorCores each core
    # executes at most one step anyway, so this is effectively once per core
    # and stays correct under megacore sharding of the parallel axis.
    xpad_ref[...] = jnp.zeros_like(xpad_ref)
    xpad_ref[:, p - 1:p - 1 + h, q - 1:q - 1 + wd] = x_ref[...]

    # Hoist the 25 scalar tap reads + scalar->vector broadcasts out of the
    # MAC chain (weight already flipped + flattened in the wrapper).
    taps = [wflip_ref[k] for k in range(p * q)]

    acc = jnp.zeros(out_ref.shape, jnp.float32)   # (B, Ho, Wo)
    # Full conv == cross-correlation of the padded input with the flipped
    # kernel; static 5x5 unroll of shifted-window multiply-accumulates (VPU).
    # Each window is a REF slice: sublane offset u is absorbed by the load
    # address, so per tap only the lane offset v needs shift handling.
    for u in range(p):
        for v in range(q):
            acc = acc + taps[u * q + v] * xpad_ref[:, u:u + ho, v:v + wo]
    out_ref[...] = acc.astype(out_ref.dtype)


def _tensorcores_per_chip():
    # v5e / v6e have a single TensorCore per chip; v7x has two.
    try:
        kind = jax.devices()[0].device_kind.lower()
    except Exception:
        return 1
    return 2 if "v7" in kind else 1


def custom_conv2d(x, w, block_b=None):
    """x: (N, C, H, W) float32, w: (P, Q) float32 -> (N, C, H+P-1, W+Q-1)."""
    n, c, h, wd = x.shape
    p, q = w.shape
    ho, wo = h + p - 1, wd + q - 1              # full-conv output spatial size
    hp, wp = h + 2 * (p - 1), wd + 2 * (q - 1)  # padded slab size (in VMEM)

    nimg = n * c
    if block_b is None:
        # One grid step per TensorCore: grid=1 on single-TC v5e/v6e (amortizes
        # the fixed per-step + DMA overhead), grid=2 "parallel" on dual-TC v7x.
        block_b = pl.cdiv(nimg, _tensorcores_per_chip())
    block_b = max(1, min(block_b, nimg))

    grid = pl.cdiv(nimg, block_b)
    nimg_pad = grid * block_b

    x_flat = x.reshape(nimg, h, wd)
    if nimg_pad != nimg:
        # TODO(synk): this tail pad is an extra HBM copy of x; prefer a
        # block_b that divides N*C (true for the defaults above).
        x_flat = jnp.concatenate(
            [x_flat, jnp.zeros((nimg_pad - nimg, h, wd), x.dtype)], axis=0)

    # Pre-flip once in the wrapper; flatten to 1-D for compact SMEM padding
    # (a (25,) SMEM ref pads to 128 B vs ~4 KiB for a 2-D (5,5) block).
    w_flip = w[::-1, ::-1].reshape(p * q)

    kernel = functools.partial(_full_conv_kernel, p, q, h, wd, ho, wo)

    out = pl.pallas_call(
        kernel,
        out_shape=jax.ShapeDtypeStruct((nimg_pad, ho, wo), x.dtype),
        grid_spec=pltpu.PrefetchScalarGridSpec(
            num_scalar_prefetch=0,
            grid=(grid,),
            in_specs=[
                # small flattened weight: whole array in SMEM (scalar reads)
                pl.BlockSpec(memory_space=pltpu.MemorySpace.SMEM),
                # block_b unpadded images per grid step
                pl.BlockSpec((block_b, h, wd), lambda i: (i, 0, 0)),
            ],
            out_specs=pl.BlockSpec((block_b, ho, wo), lambda i: (i, 0, 0)),
            scratch_shapes=[pltpu.VMEM((block_b, hp, wp), jnp.float32)],
        ),
        compiler_params=pltpu.CompilerParams(
            dimension_semantics=("parallel",)),
    )(w_flip, x_flat)

    return out[:nimg].reshape(n, c, ho, wo)


if __name__ == "__main__":
    key = jax.random.PRNGKey(0)
    kx, kw = jax.random.split(key)

    # Small shapes consistent with the module: NCHW input, shared 5x5 weight.
    x = jax.random.normal(kx, (2, 4, 16, 16), dtype=jnp.float32)
    # Deterministic parameter init mirroring torch.randn(5, 5) / 2
    w = jax.random.normal(kw, (5, 5), dtype=jnp.float32) / 2.0

    out = custom_conv2d(x, w)
    jax.block_until_ready(out)

    assert out.shape == (2, 4, 20, 20), out.shape

    # Independent reference: full 2D convolution per (n, c) image.
    import jax.scipy.signal as jss
    ref = jnp.stack([
        jnp.stack([jss.convolve2d(x[n, c], w, mode="full")
                   for c in range(x.shape[1])])
        for n in range(x.shape[0])
    ])
    assert jnp.allclose(out, ref, atol=1e-4, rtol=1e-4), "mismatch vs reference"

    print("KERNEL_OK")
</pallas_src>

<mosaic_0001>
module attributes {stable_mosaic.version = 11 : i64} {
  func.func @_full_conv_kernel(%arg0: i32, %arg1: memref<25xf32, #tpu.memory_space<smem>>, %arg2: memref<8x16x16xf32, #tpu.memory_space<vmem>>, %arg3: memref<8x20x20xf32, #tpu.memory_space<vmem>>, %arg4: memref<8x24x24xf32, #tpu.memory_space<vmem>>) attributes {dimension_semantics = [#tpu.dimension_semantics<parallel>], iteration_bounds = array<i64: 1>, scalar_prefetch = 0 : i64, scratch_operands = 1 : i64, tpu.core_type = #tpu.core_type<tc>, window_params = [{transform_indices = @transform_0, window_bounds = array<i64: 25>}, {transform_indices = @transform_1, window_bounds = array<i64: 8, 16, 16>}, {transform_indices = @transform_2, window_bounds = array<i64: 8, 20, 20>}]} {
    %cst = arith.constant 0.000000e+00 : f32
    %0 = vector.broadcast %cst : f32 to vector<8x24x24xf32>
    %c0 = arith.constant 0 : index
    %c0_0 = arith.constant 0 : index
    %c0_1 = arith.constant 0 : index
    %1 = vector.load %arg4[%c0, %c0_0, %c0_1] : memref<8x24x24xf32, #tpu.memory_space<vmem>>, vector<8x24x24xf32>
    tpu.vector_store %arg4[%c0, %c0_0, %c0_1], %0 {strides = array<i32>} : memref<8x24x24xf32, #tpu.memory_space<vmem>>, vector<8x24x24xf32>,
    %c0_2 = arith.constant 0 : index
    %c0_3 = arith.constant 0 : index
    %c0_4 = arith.constant 0 : index
    %2 = vector.load %arg2[%c0_2, %c0_3, %c0_4] : memref<8x16x16xf32, #tpu.memory_space<vmem>>, vector<8x16x16xf32>
    %c0_5 = arith.constant 0 : index
    %c4 = arith.constant 4 : index
    %c4_6 = arith.constant 4 : index
    %3 = vector.load %arg4[%c0_5, %c4, %c4_6] : memref<8x24x24xf32, #tpu.memory_space<vmem>>, vector<8x16x16xf32>
    tpu.vector_store %arg4[%c0_5, %c4, %c4_6], %2 {strides = array<i32>} : memref<8x24x24xf32, #tpu.memory_space<vmem>>, vector<8x16x16xf32>,
    %c0_7 = arith.constant 0 : index
    %4 = memref.load %arg1[%c0_7] : memref<25xf32, #tpu.memory_space<smem>>
    %c1 = arith.constant 1 : index
    %5 = memref.load %arg1[%c1] : memref<25xf32, #tpu.memory_space<smem>>
    %c2 = arith.constant 2 : index
    %6 = memref.load %arg1[%c2] : memref<25xf32, #tpu.memory_space<smem>>
    %c3 = arith.constant 3 : index
    %7 = memref.load %arg1[%c3] : memref<25xf32, #tpu.memory_space<smem>>
    %c4_8 = arith.constant 4 : index
    %8 = memref.load %arg1[%c4_8] : memref<25xf32, #tpu.memory_space<smem>>
    %c5 = arith.constant 5 : index
    %9 = memref.load %arg1[%c5] : memref<25xf32, #tpu.memory_space<smem>>
    %c6 = arith.constant 6 : index
    %10 = memref.load %arg1[%c6] : memref<25xf32, #tpu.memory_space<smem>>
    %c7 = arith.constant 7 : index
    %11 = memref.load %arg1[%c7] : memref<25xf32, #tpu.memory_space<smem>>
    %c8 = arith.constant 8 : index
    %12 = memref.load %arg1[%c8] : memref<25xf32, #tpu.memory_space<smem>>
    %c9 = arith.constant 9 : index
    %13 = memref.load %arg1[%c9] : memref<25xf32, #tpu.memory_space<smem>>
    %c10 = arith.constant 10 : index
    %14 = memref.load %arg1[%c10] : memref<25xf32, #tpu.memory_space<smem>>
    %c11 = arith.constant 11 : index
    %15 = memref.load %arg1[%c11] : memref<25xf32, #tpu.memory_space<smem>>
    %c12 = arith.constant 12 : index
    %16 = memref.load %arg1[%c12] : memref<25xf32, #tpu.memory_space<smem>>
    %c13 = arith.constant 13 : index
    %17 = memref.load %arg1[%c13] : memref<25xf32, #tpu.memory_space<smem>>
    %c14 = arith.constant 14 : index
    %18 = memref.load %arg1[%c14] : memref<25xf32, #tpu.memory_space<smem>>
    %c15 = arith.constant 15 : index
    %19 = memref.load %arg1[%c15] : memref<25xf32, #tpu.memory_space<smem>>
    %c16 = arith.constant 16 : index
    %20 = memref.load %arg1[%c16] : memref<25xf32, #tpu.memory_space<smem>>
    %c17 = arith.constant 17 : index
    %21 = memref.load %arg1[%c17] : memref<25xf32, #tpu.memory_space<smem>>
    %c18 = arith.constant 18 : index
    %22 = memref.load %arg1[%c18] : memref<25xf32, #tpu.memory_space<smem>>
    %c19 = arith.constant 19 : index
    %23 = memref.load %arg1[%c19] : memref<25xf32, #tpu.memory_space<smem>>
    %c20 = arith.constant 20 : index
    %24 = memref.load %arg1[%c20] : memref<25xf32, #tpu.memory_space<smem>>
    %c21 = arith.constant 21 : index
    %25 = memref.load %arg1[%c21] : memref<25xf32, #tpu.memory_space<smem>>
    %c22 = arith.constant 22 : index
    %26 = memref.load %arg1[%c22] : memref<25xf32, #tpu.memory_space<smem>>
    %c23 = arith.constant 23 : index
    %27 = memref.load %arg1[%c23] : memref<25xf32, #tpu.memory_space<smem>>
    %c24 = arith.constant 24 : index
    %28 = memref.load %arg1[%c24] : memref<25xf32, #tpu.memory_space<smem>>
    %cst_9 = arith.constant 0.000000e+00 : f32
    %29 = vector.broadcast %cst_9 : f32 to vector<8x20x20xf32>
    %c0_10 = arith.constant 0 : index
    %c0_11 = arith.constant 0 : index
    %c0_12 = arith.constant 0 : index
    %30 = vector.load %arg4[%c0_10, %c0_11, %c0_12] : memref<8x24x24xf32, #tpu.memory_space<vmem>>, vector<8x20x20xf32>
    %31 = vector.broadcast %4 : f32 to vector<8x20x20xf32>
    %32 = arith.mulf %31, %30 : vector<8x20x20xf32>
    %33 = arith.addf %29, %32 : vector<8x20x20xf32>
    %c0_13 = arith.constant 0 : index
    %c0_14 = arith.constant 0 : index
    %c1_15 = arith.constant 1 : index
    %34 = vector.load %arg4[%c0_13, %c0_14, %c1_15] : memref<8x24x24xf32, #tpu.memory_space<vmem>>, vector<8x20x20xf32>
    %35 = vector.broadcast %5 : f32 to vector<8x20x20xf32>
    %36 = arith.mulf %35, %34 : vector<8x20x20xf32>
    %37 = arith.addf %33, %36 : vector<8x20x20xf32>
    %c0_16 = arith.constant 0 : index
    %c0_17 = arith.constant 0 : index
    %c2_18 = arith.constant 2 : index
    %38 = vector.load %arg4[%c0_16, %c0_17, %c2_18] : memref<8x24x24xf32, #tpu.memory_space<vmem>>, vector<8x20x20xf32>
    %39 = vector.broadcast %6 : f32 to vector<8x20x20xf32>
    %40 = arith.mulf %39, %38 : vector<8x20x20xf32>
    %41 = arith.addf %37, %40 : vector<8x20x20xf32>
    %c0_19 = arith.constant 0 : index
    %c0_20 = arith.constant 0 : index
    %c3_21 = arith.constant 3 : index
    %42 = vector.load %arg4[%c0_19, %c0_20, %c3_21] : memref<8x24x24xf32, #tpu.memory_space<vmem>>, vector<8x20x20xf32>
    %43 = vector.broadcast %7 : f32 to vector<8x20x20xf32>
    %44 = arith.mulf %43, %42 : vector<8x20x20xf32>
    %45 = arith.addf %41, %44 : vector<8x20x20xf32>
    %c0_22 = arith.constant 0 : index
    %c0_23 = arith.constant 0 : index
    %c4_24 = arith.constant 4 : index
    %46 = vector.load %arg4[%c0_22, %c0_23, %c4_24] : memref<8x24x24xf32, #tpu.memory_space<vmem>>, vector<8x20x20xf32>
    %47 = vector.broadcast %8 : f32 to vector<8x20x20xf32>
    %48 = arith.mulf %47, %46 : vector<8x20x20xf32>
    %49 = arith.addf %45, %48 : vector<8x20x20xf32>
    %c0_25 = arith.constant 0 : index
    %c1_26 = arith.constant 1 : index
    %c0_27 = arith.constant 0 : index
    %50 = vector.load %arg4[%c0_25, %c1_26, %c0_27] : memref<8x24x24xf32, #tpu.memory_space<vmem>>, vector<8x20x20xf32>
    %51 = vector.broadcast %9 : f32 to vector<8x20x20xf32>
    %52 = arith.mulf %51, %50 : vector<8x20x20xf32>
    %53 = arith.addf %49, %52 : vector<8x20x20xf32>
    %c0_28 = arith.constant 0 : index
    %c1_29 = arith.constant 1 : index
    %c1_30 = arith.constant 1 : index
    %54 = vector.load %arg4[%c0_28, %c1_29, %c1_30] : memref<8x24x24xf32, #tpu.memory_space<vmem>>, vector<8x20x20xf32>
    %55 = vector.broadcast %10 : f32 to vector<8x20x20xf32>
    %56 = arith.mulf %55, %54 : vector<8x20x20xf32>
    %57 = arith.addf %53, %56 : vector<8x20x20xf32>
    %c0_31 = arith.constant 0 : index
    %c1_32 = arith.constant 1 : index
    %c2_33 = arith.constant 2 : index
    %58 = vector.load %arg4[%c0_31, %c1_32, %c2_33] : memref<8x24x24xf32, #tpu.memory_space<vmem>>, vector<8x20x20xf32>
    %59 = vector.broadcast %11 : f32 to vector<8x20x20xf32>
    %60 = arith.mulf %59, %58 : vector<8x20x20xf32>
    %61 = arith.addf %57, %60 : vector<8x20x20xf32>
    %c0_34 = arith.constant 0 : index
    %c1_35 = arith.constant 1 : index
    %c3_36 = arith.constant 3 : index
    %62 = vector.load %arg4[%c0_34, %c1_35, %c3_36] : memref<8x24x24xf32, #tpu.memory_space<vmem>>, vector<8x20x20xf32>
    %63 = vector.broadcast %12 : f32 to vector<8x20x20xf32>
    %64 = arith.mulf %63, %62 : vector<8x20x20xf32>
    %65 = arith.addf %61, %64 : vector<8x20x20xf32>
    %c0_37 = arith.constant 0 : index
    %c1_38 = arith.constant 1 : index
    %c4_39 = arith.constant 4 : index
    %66 = vector.load %arg4[%c0_37, %c1_38, %c4_39] : memref<8x24x24xf32, #tpu.memory_space<vmem>>, vector<8x20x20xf32>
    %67 = vector.broadcast %13 : f32 to vector<8x20x20xf32>
    %68 = arith.mulf %67, %66 : vector<8x20x20xf32>
    %69 = arith.addf %65, %68 : vector<8x20x20xf32>
    %c0_40 = arith.constant 0 : index
    %c2_41 = arith.constant 2 : index
    %c0_42 = arith.constant 0 : index
    %70 = vector.load %arg4[%c0_40, %c2_41, %c0_42] : memref<8x24x24xf32, #tpu.memory_space<vmem>>, vector<8x20x20xf32>
    %71 = vector.broadcast %14 : f32 to vector<8x20x20xf32>
    %72 = arith.mulf %71, %70 : vector<8x20x20xf32>
    %73 = arith.addf %69, %72 : vector<8x20x20xf32>
    %c0_43 = arith.constant 0 : index
    %c2_44 = arith.constant 2 : index
    %c1_45 = arith.constant 1 : index
    %74 = vector.load %arg4[%c0_43, %c2_44, %c1_45] : memref<8x24x24xf32, #tpu.memory_space<vmem>>, vector<8x20x20xf32>
    %75 = vector.broadcast %15 : f32 to vector<8x20x20xf32>
    %76 = arith.mulf %75, %74 : vector<8x20x20xf32>
    %77 = arith.addf %73, %76 : vector<8x20x20xf32>
    %c0_46 = arith.constant 0 : index
    %c2_47 = arith.constant 2 : index
    %c2_48 = arith.constant 2 : index
    %78 = vector.load %arg4[%c0_46, %c2_47, %c2_48] : memref<8x24x24xf32, #tpu.memory_space<vmem>>, vector<8x20x20xf32>
    %79 = vector.broadcast %16 : f32 to vector<8x20x20xf32>
    %80 = arith.mulf %79, %78 : vector<8x20x20xf32>
    %81 = arith.addf %77, %80 : vector<8x20x20xf32>
    %c0_49 = arith.constant 0 : index
    %c2_50 = arith.constant 2 : index
    %c3_51 = arith.constant 3 : index
    %82 = vector.load %arg4[%c0_49, %c2_50, %c3_51] : memref<8x24x24xf32, #tpu.memory_space<vmem>>, vector<8x20x20xf32>
    %83 = vector.broadcast %17 : f32 to vector<8x20x20xf32>
    %84 = arith.mulf %83, %82 : vector<8x20x20xf32>
    %85 = arith.addf %81, %84 : vector<8x20x20xf32>
    %c0_52 = arith.constant 0 : index
    %c2_53 = arith.constant 2 : index
    %c4_54 = arith.constant 4 : index
    %86 = vector.load %arg4[%c0_52, %c2_53, %c4_54] : memref<8x24x24xf32, #tpu.memory_space<vmem>>, vector<8x20x20xf32>
    %87 = vector.broadcast %18 : f32 to vector<8x20x20xf32>
    %88 = arith.mulf %87, %86 : vector<8x20x20xf32>
    %89 = arith.addf %85, %88 : vector<8x20x20xf32>
    %c0_55 = arith.constant 0 : index
    %c3_56 = arith.constant 3 : index
    %c0_57 = arith.constant 0 : index
    %90 = vector.load %arg4[%c0_55, %c3_56, %c0_57] : memref<8x24x24xf32, #tpu.memory_space<vmem>>, vector<8x20x20xf32>
    %91 = vector.broadcast %19 : f32 to vector<8x20x20xf32>
    %92 = arith.mulf %91, %90 : vector<8x20x20xf32>
    %93 = arith.addf %89, %92 : vector<8x20x20xf32>
    %c0_58 = arith.constant 0 : index
    %c3_59 = arith.constant 3 : index
    %c1_60 = arith.constant 1 : index
    %94 = vector.load %arg4[%c0_58, %c3_59, %c1_60] : memref<8x24x24xf32, #tpu.memory_space<vmem>>, vector<8x20x20xf32>
    %95 = vector.broadcast %20 : f32 to vector<8x20x20xf32>
    %96 = arith.mulf %95, %94 : vector<8x20x20xf32>
    %97 = arith.addf %93, %96 : vector<8x20x20xf32>
    %c0_61 = arith.constant 0 : index
    %c3_62 = arith.constant 3 : index
    %c2_63 = arith.constant 2 : index
    %98 = vector.load %arg4[%c0_61, %c3_62, %c2_63] : memref<8x24x24xf32, #tpu.memory_space<vmem>>, vector<8x20x20xf32>
    %99 = vector.broadcast %21 : f32 to vector<8x20x20xf32>
    %100 = arith.mulf %99, %98 : vector<8x20x20xf32>
    %101 = arith.addf %97, %100 : vector<8x20x20xf32>
    %c0_64 = arith.constant 0 : index
    %c3_65 = arith.constant 3 : index
    %c3_66 = arith.constant 3 : index
    %102 = vector.load %arg4[%c0_64, %c3_65, %c3_66] : memref<8x24x24xf32, #tpu.memory_space<vmem>>, vector<8x20x20xf32>
    %103 = vector.broadcast %22 : f32 to vector<8x20x20xf32>
    %104 = arith.mulf %103, %102 : vector<8x20x20xf32>
    %105 = arith.addf %101, %104 : vector<8x20x20xf32>
    %c0_67 = arith.constant 0 : index
    %c3_68 = arith.constant 3 : index
    %c4_69 = arith.constant 4 : index
    %106 = vector.load %arg4[%c0_67, %c3_68, %c4_69] : memref<8x24x24xf32, #tpu.memory_space<vmem>>, vector<8x20x20xf32>
    %107 = vector.broadcast %23 : f32 to vector<8x20x20xf32>
    %108 = arith.mulf %107, %106 : vector<8x20x20xf32>
    %109 = arith.addf %105, %108 : vector<8x20x20xf32>
    %c0_70 = arith.constant 0 : index
    %c4_71 = arith.constant 4 : index
    %c0_72 = arith.constant 0 : index
    %110 = vector.load %arg4[%c0_70, %c4_71, %c0_72] : memref<8x24x24xf32, #tpu.memory_space<vmem>>, vector<8x20x20xf32>
    %111 = vector.broadcast %24 : f32 to vector<8x20x20xf32>
    %112 = arith.mulf %111, %110 : vector<8x20x20xf32>
    %113 = arith.addf %109, %112 : vector<8x20x20xf32>
    %c0_73 = arith.constant 0 : index
    %c4_74 = arith.constant 4 : index
    %c1_75 = arith.constant 1 : index
    %114 = vector.load %arg4[%c0_73, %c4_74, %c1_75] : memref<8x24x24xf32, #tpu.memory_space<vmem>>, vector<8x20x20xf32>
    %115 = vector.broadcast %25 : f32 to vector<8x20x20xf32>
    %116 = arith.mulf %115, %114 : vector<8x20x20xf32>
    %117 = arith.addf %113, %116 : vector<8x20x20xf32>
    %c0_76 = arith.constant 0 : index
    %c4_77 = arith.constant 4 : index
    %c2_78 = arith.constant 2 : index
    %118 = vector.load %arg4[%c0_76, %c4_77, %c2_78] : memref<8x24x24xf32, #tpu.memory_space<vmem>>, vector<8x20x20xf32>
    %119 = vector.broadcast %26 : f32 to vector<8x20x20xf32>
    %120 = arith.mulf %119, %118 : vector<8x20x20xf32>
    %121 = arith.addf %117, %120 : vector<8x20x20xf32>
    %c0_79 = arith.constant 0 : index
    %c4_80 = arith.constant 4 : index
    %c3_81 = arith.constant 3 : index
    %122 = vector.load %arg4[%c0_79, %c4_80, %c3_81] : memref<8x24x24xf32, #tpu.memory_space<vmem>>, vector<8x20x20xf32>
    %123 = vector.broadcast %27 : f32 to vector<8x20x20xf32>
    %124 = arith.mulf %123, %122 : vector<8x20x20xf32>
    %125 = arith.addf %121, %124 : vector<8x20x20xf32>
    %c0_82 = arith.constant 0 : index
    %c4_83 = arith.constant 4 : index
    %c4_84 = arith.constant 4 : index
    %126 = vector.load %arg4[%c0_82, %c4_83, %c4_84] : memref<8x24x24xf32, #tpu.memory_space<vmem>>, vector<8x20x20xf32>
    %127 = vector.broadcast %28 : f32 to vector<8x20x20xf32>
    %128 = arith.mulf %127, %126 : vector<8x20x20xf32>
    %129 = arith.addf %125, %128 : vector<8x20x20xf32>
    %c0_85 = arith.constant 0 : index
    %c0_86 = arith.constant 0 : index
    %c0_87 = arith.constant 0 : index
    %130 = vector.load %arg3[%c0_85, %c0_86, %c0_87] : memref<8x20x20xf32, #tpu.memory_space<vmem>>, vector<8x20x20xf32>
    tpu.vector_store %arg3[%c0_85, %c0_86, %c0_87], %129 {strides = array<i32>} : memref<8x20x20xf32, #tpu.memory_space<vmem>>, vector<8x20x20xf32>,
    return
  }
  func.func @transform_0(%arg0: i32) -> i32 {
    %c0_i32 = arith.constant 0 : i32
    %c0_i32_0 = arith.constant 0 : i32
    return %c0_i32 : i32
  }
  func.func @transform_1(%arg0: i32) -> (i32, i32, i32) {
    %c0_i32 = arith.constant 0 : i32
    %c0_i32_0 = arith.constant 0 : i32
    %c0_i32_1 = arith.constant 0 : i32
    return %arg0, %c0_i32, %c0_i32_0 : i32, i32, i32
  }
  func.func @transform_2(%arg0: i32) -> (i32, i32, i32) {
    %c0_i32 = arith.constant 0 : i32
    %c0_i32_0 = arith.constant 0 : i32
    %c0_i32_1 = arith.constant 0 : i32
    return %arg0, %c0_i32, %c0_i32_0 : i32, i32, i32
  }
}

</mosaic_0001>

<bundles_post_ra>
// kernel: tpu_custom_call.1
= control target key start
LH: loop header
LB: loop body
LE: loop exit
PB: predicated region body
PF: predicated region fallthrough
CT: control target
= control target key end

     0   :  { %7 = vsyncpa [#allocation5], 0  ;;  %s7051_s0 = inlined_call_operand.hbm [shape: f32[25], index: 0, kind: input, shape index: {}]   ;;  %s7052_s1 = inlined_call_operand.hbm [shape: f32[8,16,16], index: 1, kind: input, shape index: {}]   ;;  %s7053_s2 = inlined_call_operand.vmem [shape: f32[8,20,20], index: 2, kind: output, shape index: {}]  }
   0x1   :  { %8 = vsyncpa [#allocation4], 0  ;;  %s3517_s11 = scalar_lea.hbm %s7051_s0, 16 }
   0x2   :  { %p3518_p0 = scmp.ne.s32.totalorder %s7051_s0, %s3517_s11  ;;  %p3521_p1 = scmp.lt.u32.totalorder %s3517_s11, %s7051_s0 }
   0x4   :  { %p3523_p2 = pnand %p3521_p1, %p3518_p0 }
   0x6   :  { %3526 = shalt.err (!%p3523_p2)
}
   0x7   :  { %s3553_s16 = smov [#allocation3]   ;;  %s3554_s19 = smov [#allocation6]  }
   0x8   :  { %16 = dma.hbm_to_smem %s7051_s0, 16, %s3553_s16, [#allocation5]  }
   0x9   :  { %s22_s20 = sshll.u32 %s3554_s19, 4  ;;  %s3527_s23 = scalar_lea.hbm %s7052_s1, 2048  ;;  %s23_s20 = int_to_ptr.vmem [resolvable:$true] %s22_s20 }
   0xa   :  { %p3528_p3 = scmp.ne.s32.totalorder %s7052_s1, %s3527_s23  ;;  %p3531_p4 = scmp.lt.u32.totalorder %s3527_s23, %s7052_s1 }
   0xc   :  { %p3533_p5 = pnand %p3531_p4, %p3528_p3 }
   0xe   :  { %3536 = shalt.err (!%p3533_p5)
}
   0xf   :  { %s3537_s28 = scalar_lea.vmem %s23_s20, 2048  ;;  %p3542_p7 = scmp.lt.s32.totalorder %s23_s20, %s23_s20 }
  0x10   :  { %p3538_p6 = scmp.ne.s32.totalorder %s23_s20, %s3537_s28  ;;  %p3543_p8 = scmp.lt.s32.totalorder %s3537_s28, %s3537_s28 }
  0x12   :  { %p3544_p9 = por %p3543_p8, %p3542_p7 }
  0x14   :  { %p3545_p10 = pnand %p3544_p9, %p3538_p6 }
  0x16   :  { %3548 = shalt.err (!%p3545_p10)
}
  0x17   :  { %s3555_s0 = smov 128   ;;  %s3556_s29 = smov 8  }
  0x18   :  { %28 = dma.hbm_to_vmem [thread:$0]  %s7052_s1, 2048, %s23_s20, [#allocation4], %s3555_s0, %s3555_s0, %s3556_s29  }
  0x19   :  { %3549 = dma.done.wait [#allocation5], 16  }
  0x1a   :  { %3550 = vsyncadd [#allocation5], 4294967280 }
  0x1b   :  { %3551 = dma.done.wait [#allocation4], 2048  }
  0x1c   :  { %3552 = vsyncadd [#allocation4], 4294965248 }
  0x1d   :  { %35 = sfence }
  0x1e   :  { %v61_v0 = vld [vmem:[#allocation6] sm:$0xff]  ;;  %v63_v1 = vld [vmem:[#allocation6 + $0x10] sm:$0xff]  ;;  %vm36_vm0 = vcmask 195584   ;;  %s3557_s4 = smov 4   ;;  %v62_v2 = vld [vmem:[#allocation6 + $0x8] sm:$0xff]  ;;  %v3558_v4 = vmov 0.0  }
  0x1f   :  { %93 = vrot.lane.b32.xlu0 %v61_v0, %s3557_s4  ;;  %97 = vrot.lane.b32.xlu1 %v63_v1, %s3557_s4  ;;  %v64_v3 = vld [vmem:[#allocation6 + $0x18] sm:$0xff]  ;;  %37 = vst.msk [vmem:[#allocation2] sm:$0xff] %vm36_vm0, %v3558_v4  ;;  %38 = vst.msk [vmem:[#allocation2 + $0x8] sm:$0xff] %vm36_vm0, %v3558_v4  ;;  %v65_v5 = vld [vmem:[#allocation6 + $0x20] sm:$0xff]  ;;  %vm141_vm1 = vcmask 162848   ;;  %s3480_s1 = sld [smem:[#allocation3 + $0x1]] }
  0x20   :  { %39 = vst.msk [vmem:[#allocation2 + $0x10] sm:$0xff] %vm36_vm0, %v3558_v4  ;;  %40 = vst.msk [vmem:[#allocation2 + $0x18] sm:$0xff] %vm36_vm0, %v3558_v4  ;;  %v66_v6 = vld [vmem:[#allocation6 + $0x28] sm:$0xff]  ;;  %v68_v7 = vld [vmem:[#allocation6 + $0x38] sm:$0xff]  ;;  %s3559_s5 = smov 127   ;;  %s3481_s6 = sld [smem:[#allocation3 + $0x2]] }
  0x21   :  { %41 = vst.msk [vmem:[#allocation2 + $0x20] sm:$0xff] %vm36_vm0, %v3558_v4  ;;  %42 = vst.msk [vmem:[#allocation2 + $0x28] sm:$0xff] %vm36_vm0, %v3558_v4  ;;  %v67_v8 = vld [vmem:[#allocation6 + $0x30] sm:$0xff]  ;;  %v69_v9 = vld [vmem:[#allocation6 + $0x40] sm:$0xff]  ;;  %s3560_s7 = smov 126   ;;  %s3482_s8 = sld [smem:[#allocation3 + $0x3]] }
  0x22   :  { %43 = vst.msk [vmem:[#allocation2 + $0x30] sm:$0xff] %vm36_vm0, %v3558_v4  ;;  %44 = vst.msk [vmem:[#allocation2 + $0x38] sm:$0xff] %vm36_vm0, %v3558_v4  ;;  %v70_v10 = vld [vmem:[#allocation6 + $0x48] sm:$0xff]  ;;  %v72_v11 = vld [vmem:[#allocation6 + $0x58] sm:$0xff]  ;;  %s3561_s9 = smov 125   ;;  %s3483_s10 = sld [smem:[#allocation3 + $0x4]] }
  0x23   :  { %45 = vst.msk [vmem:[#allocation2 + $0x40] sm:$0xff] %vm36_vm0, %v3558_v4  ;;  %46 = vst.msk [vmem:[#allocation2 + $0x48] sm:$0xff] %vm36_vm0, %v3558_v4  ;;  %95 = vrot.lane.b32.xlu0 %v62_v2, %s3557_s4  ;;  %99 = vrot.lane.b32.xlu1 %v64_v3, %s3557_s4  ;;  %v71_v12 = vld [vmem:[#allocation6 + $0x50] sm:$0xff]  ;;  %v73_v13 = vld [vmem:[#allocation6 + $0x60] sm:$0xff]  ;;  %s3562_s11 = smov 124   ;;  %s3485_s12 = sld [smem:[#allocation3 + $0x6]] }
  0x24   :  { %47 = vst.msk [vmem:[#allocation2 + $0x50] sm:$0xff] %vm36_vm0, %v3558_v4  ;;  %48 = vst.msk [vmem:[#allocation2 + $0x58] sm:$0xff] %vm36_vm0, %v3558_v4  ;;  %v74_v14 = vld [vmem:[#allocation6 + $0x68] sm:$0xff]  ;;  %v76_v15 = vld [vmem:[#allocation6 + $0x78] sm:$0xff]  ;;  %s3486_s13 = sld [smem:[#allocation3 + $0x7]]  ;;  %s158_s14 = sld [smem:[#allocation3]] }
  0x25   :  { %49 = vst.msk [vmem:[#allocation2 + $0x60] sm:$0xff] %vm36_vm0, %v3558_v4  ;;  %50 = vst.msk [vmem:[#allocation2 + $0x68] sm:$0xff] %vm36_vm0, %v3558_v4  ;;  %v75_v16 = vld [vmem:[#allocation6 + $0x70] sm:$0xff]  ;;  %v3646_v21 = vstv %s3480_s1  ;;  %s3487_s15 = sld [smem:[#allocation3 + $0x8]]  ;;  %s3484_s16 = sld [smem:[#allocation3 + $0x5]]  ;;  %vm3448_vm2 = vcmask 162816  }
  0x26   :  { %51 = vst.msk [vmem:[#allocation2 + $0x70] sm:$0xff] %vm36_vm0, %v3558_v4  ;;  %52 = vst.msk [vmem:[#allocation2 + $0x78] sm:$0xff] %vm36_vm0, %v3558_v4  ;;  %s3488_s17 = sld [smem:[#allocation3 + $0x9]]  ;;  %s3490_s18 = sld [smem:[#allocation3 + $0xb]]  ;;  %vm3451_vm3 = vcmask 158720  }
  0x27   :  { %53 = vst.msk [vmem:[#allocation2 + $0x80] sm:$0xff] %vm36_vm0, %v3558_v4  ;;  %54 = vst.msk [vmem:[#allocation2 + $0x88] sm:$0xff] %vm36_vm0, %v3558_v4  ;;  %101 = vrot.lane.b32.xlu0 %v65_v5, %s3557_s4  ;;  %103 = vrot.lane.b32.xlu1 %v66_v6, %s3557_s4  ;;  %s3491_s19 = sld [smem:[#allocation3 + $0xc]]  ;;  %s3489_s20 = sld [smem:[#allocation3 + $0xa]] }
  0x28   :  { %55 = vst.msk [vmem:[#allocation2 + $0x90] sm:$0xff] %vm36_vm0, %v3558_v4  ;;  %56 = vst.msk [vmem:[#allocation2 + $0x98] sm:$0xff] %vm36_vm0, %v3558_v4  ;;  %s5085_s21 = sld [smem:[#allocation3 + $0xd]]  ;;  %s3493_s22 = sld [smem:[#allocation3 + $0xe]] }
  0x29   :  { %57 = vst.msk [vmem:[#allocation2 + $0xa0] sm:$0xff] %vm36_vm0, %v3558_v4  ;;  %58 = vst.msk [vmem:[#allocation2 + $0xa8] sm:$0xff] %vm36_vm0, %v3558_v4  ;;  %s3495_s23 = sld [smem:[#allocation3 + $0x10]]  ;;  %s3496_s24 = sld [smem:[#allocation3 + $0x11]] }
  0x2a   :  { %59 = vst.msk [vmem:[#allocation2 + $0xb0] sm:$0xff] %vm36_vm0, %v3558_v4  ;;  %60 = vst.msk [vmem:[#allocation2 + $0xb8] sm:$0xff] %vm36_vm0, %v3558_v4  ;;  %s3494_s25 = sld [smem:[#allocation3 + $0xf]]  ;;  %s5770_s26 = sld [smem:[#allocation3 + $0x12]] }
  0x2b   :  { %107 = vrot.lane.b32.xlu1 %v68_v7, %s3557_s4  ;;  %105 = vrot.lane.b32.xlu0 %v67_v8, %s3557_s4  ;;  %s3498_s27 = sld [smem:[#allocation3 + $0x13]]  ;;  %s3500_s28 = sld [smem:[#allocation3 + $0x15]] }
  0x2c   :  { %s3501_s0 = sld [smem:[#allocation3 + $0x16]]  ;;  %s3499_s29 = sld [smem:[#allocation3 + $0x14]] }
  0x2d   :  { %s3502_s30 = sld [smem:[#allocation3 + $0x17]]  ;;  %s3503_s3 = sld [smem:[#allocation3 + $0x18]] }
  0x2f   :  { %109 = vrot.lane.b32.xlu0 %v69_v9, %s3557_s4  ;;  %111 = vrot.lane.b32.xlu1 %v70_v10, %s3557_s4 }
  0x33   :  { %115 = vrot.lane.b32.xlu1 %v72_v11, %s3557_s4  ;;  %113 = vrot.lane.b32.xlu0 %v71_v12, %s3557_s4 }
  0x37   :  { %117 = vrot.lane.b32.xlu0 %v73_v13, %s3557_s4  ;;  %119 = vrot.lane.b32.xlu1 %v74_v14, %s3557_s4 }
  0x3b   :  { %123 = vrot.lane.b32.xlu1 %v76_v15, %s3557_s4  ;;  %121 = vrot.lane.b32.xlu0 %v75_v16, %s3557_s4 }
  0x91   :  { %v94_v17 = vpop.permute.xlu0 %93  ;;  %v98_v18 = vpop.permute.xlu1 %97 }
  0x92   :  { %142 = vst.msk [vmem:[#allocation2 + $0x4] sm:$0xff] %vm141_vm1, %v94_v17  ;;  %144 = vst.msk [vmem:[#allocation2 + $0x1c] sm:$0xff] %vm141_vm1, %v98_v18  ;;  %v401_v17 = vstv %s3481_s6 }
  0x95   :  { %v96_v19 = vpop.permute.xlu0 %95  ;;  %v100_v20 = vpop.permute.xlu1 %99 }
  0x96   :  { %143 = vst.msk [vmem:[#allocation2 + $0xc] sm:$0xff] %vm141_vm1, %v96_v19  ;;  %145 = vst.msk [vmem:[#allocation2 + $0x24] sm:$0xff] %vm141_vm1, %v100_v20 }
  0x99   :  { %v3648_v22 = vld [vmem:[#allocation2] sm:$0xff]  ;;  %v102_v23 = vpop.permute.xlu0 %101  ;;  %v104_v24 = vpop.permute.xlu1 %103  ;;  %v3655_v26 = vld [vmem:[#allocation2 + $0x18] sm:$0xff] }
  0x9a   :  { %v257_v25 = vmul.f32 %v3646_v21, %v3648_v22  ;;  %146 = vst.msk [vmem:[#allocation2 + $0x34] sm:$0xff] %vm141_vm1, %v102_v23  ;;  %147 = vst.msk [vmem:[#allocation2 + $0x3c] sm:$0xff] %vm141_vm1, %v104_v24  ;;  %v260_v34 = vmul.f32 %v3646_v21, %v3655_v26  ;;  %v402_v19 = vmul.f32 %v401_v17, %v3648_v22 }
  0x9b   :  { %v405_v24 = vmul.f32 %v401_v17, %v3655_v26 }
  0x9c   :  { %305 = vrot.lane.b32.xlu0 %v257_v25, %s3559_s5 }
  0x9d   :  { %v3657_v27 = vld [vmem:[#allocation2 + $0x8] sm:$0xff]  ;;  %v3659_v28 = vld [vmem:[#allocation2 + $0x10] sm:$0xf]  ;;  %v3661_v29 = vld [vmem:[#allocation2 + $0x20] sm:$0xff]  ;;  %v108_v30 = vpop.permute.xlu1 %107  ;;  %v106_v31 = vpop.permute.xlu0 %105 }
  0x9e   :  { %v258_v32 = vmul.f32 %v3646_v21, %v3657_v27  ;;  %v259_v33 = vmul.f32 %v3646_v21, %v3659_v28  ;;  %149 = vst.msk [vmem:[#allocation2 + $0x54] sm:$0xff] %vm141_vm1, %v108_v30  ;;  %148 = vst.msk [vmem:[#allocation2 + $0x4c] sm:$0xff] %vm141_vm1, %v106_v31  ;;  %v261_v35 = vmul.f32 %v3646_v21, %v3661_v29  ;;  %v3675_v36 = vld [vmem:[#allocation2 + $0x28] sm:$0xf] }
  0x9f   :  { %v262_v40 = vmul.f32 %v3646_v21, %v3675_v36  ;;  %v403_v20 = vmul.f32 %v401_v17, %v3657_v27  ;;  %v404_v23 = vmul.f32 %v401_v17, %v3659_v28  ;;  %v406_v25 = vmul.f32 %v401_v17, %v3661_v29 }
  0xa0   :  { %307 = vrot.lane.b32.xlu1 %v258_v32, %s3559_s5  ;;  %309 = vrot.lane.b32.xlu0 %v259_v33, %s3559_s5 }
  0xa1   :  { %v3677_v37 = vld [vmem:[#allocation2 + $0x30] sm:$0xff]  ;;  %v110_v38 = vpop.permute.xlu0 %109  ;;  %v112_v39 = vpop.permute.xlu1 %111  ;;  %v3687_v42 = vld [vmem:[#allocation2 + $0x38] sm:$0xff]  ;;  %v3689_v43 = vld [vmem:[#allocation2 + $0x40] sm:$0xf] }
  0xa2   :  { %150 = vst.msk [vmem:[#allocation2 + $0x64] sm:$0xff] %vm141_vm1, %v110_v38  ;;  %151 = vst.msk [vmem:[#allocation2 + $0x6c] sm:$0xff] %vm141_vm1, %v112_v39  ;;  %v263_v41 = vmul.f32 %v3646_v21, %v3677_v37  ;;  %v264_v46 = vmul.f32 %v3646_v21, %v3687_v42  ;;  %v265_v47 = vmul.f32 %v3646_v21, %v3689_v43 }
  0xa3   :  { %v408_v30 = vmul.f32 %v401_v17, %v3677_v37  ;;  %v409_v31 = vmul.f32 %v401_v17, %v3687_v42  ;;  %v410_v32 = vmul.f32 %v401_v17, %v3689_v43 }
  0xa4   :  { %311 = vrot.lane.b32.xlu1 %v260_v34, %s3559_s5  ;;  %313 = vrot.lane.b32.xlu0 %v261_v35, %s3559_s5 }
  0xa5   :  { %v116_v44 = vpop.permute.xlu1 %115  ;;  %v114_v45 = vpop.permute.xlu0 %113  ;;  %v3699_v48 = vld [vmem:[#allocation2 + $0x48] sm:$0xff]  ;;  %v3701_v49 = vld [vmem:[#allocation2 + $0x50] sm:$0xff]  ;;  %v3711_v54 = vld [vmem:[#allocation2 + $0x58] sm:$0xf] }
  0xa6   :  { %153 = vst.msk [vmem:[#allocation2 + $0x84] sm:$0xff] %vm141_vm1, %v116_v44  ;;  %152 = vst.msk [vmem:[#allocation2 + $0x7c] sm:$0xff] %vm141_vm1, %v114_v45  ;;  %v266_v52 = vmul.f32 %v3646_v21, %v3699_v48  ;;  %v267_v53 = vmul.f32 %v3646_v21, %v3701_v49  ;;  %v268_v58 = vmul.f32 %v3646_v21, %v3711_v54 }
  0xa7   :  { %v411_v33 = vmul.f32 %v401_v17, %v3699_v48  ;;  %v412_v34 = vmul.f32 %v401_v17, %v3701_v49  ;;  %v413_v35 = vmul.f32 %v401_v17, %v3711_v54 }
  0xa8   :  { %315 = vrot.lane.b32.xlu1 %v262_v40, %s3559_s5  ;;  %317 = vrot.lane.b32.xlu0 %v263_v41, %s3559_s5 }
  0xa9   :  { %v118_v50 = vpop.permute.xlu0 %117  ;;  %v120_v51 = vpop.permute.xlu1 %119  ;;  %v3713_v55 = vld [vmem:[#allocation2 + $0x60] sm:$0xff]  ;;  %v3723_v60 = vld [vmem:[#allocation2 + $0x68] sm:$0xff]  ;;  %v3725_v61 = vld [vmem:[#allocation2 + $0x70] sm:$0xf] }
  0xaa   :  { %154 = vst.msk [vmem:[#allocation2 + $0x94] sm:$0xff] %vm141_vm1, %v118_v50  ;;  %155 = vst.msk [vmem:[#allocation2 + $0x9c] sm:$0xff] %vm141_vm1, %v120_v51  ;;  %v269_v59 = vmul.f32 %v3646_v21, %v3713_v55  ;;  %v270_v62 = vmul.f32 %v3646_v21, %v3723_v60  ;;  %v271_v63 = vmul.f32 %v3646_v21, %v3725_v61 }
  0xab   :  { %v414_v38 = vmul.f32 %v401_v17, %v3713_v55  ;;  %v415_v39 = vmul.f32 %v401_v17, %v3723_v60  ;;  %v416_v40 = vmul.f32 %v401_v17, %v3725_v61 }
  0xac   :  { %319 = vrot.lane.b32.xlu1 %v264_v46, %s3559_s5  ;;  %321 = vrot.lane.b32.xlu0 %v265_v47, %s3559_s5 }
  0xad   :  { %v124_v56 = vpop.permute.xlu1 %123  ;;  %v122_v57 = vpop.permute.xlu0 %121  ;;  %v3733_v0 = vld [vmem:[#allocation2 + $0x78] sm:$0xff]  ;;  %v3735_v1 = vld [vmem:[#allocation2 + $0x80] sm:$0xff]  ;;  %v3743_v4 = vld [vmem:[#allocation2 + $0x88] sm:$0xf] }
  0xae   :  { %157 = vst.msk [vmem:[#allocation2 + $0xb4] sm:$0xff] %vm141_vm1, %v124_v56  ;;  %156 = vst.msk [vmem:[#allocation2 + $0xac] sm:$0xff] %vm141_vm1, %v122_v57  ;;  %v272_v2 = vmul.f32 %v3646_v21, %v3733_v0  ;;  %v273_v3 = vmul.f32 %v3646_v21, %v3735_v1  ;;  %v274_v6 = vmul.f32 %v3646_v21, %v3743_v4 }
  0xaf   :  { %7117 = vst [vmem:[#allocation9_spill] sm:$0xff] %v3733_v0  ;;  %7118 = vst [vmem:[#allocation10_spill] sm:$0xff] %v3735_v1  ;;  %v417_v41 = vmul.f32 %v401_v17, %v3733_v0  ;;  %v418_v44 = vmul.f32 %v401_v17, %v3735_v1  ;;  %v419_v45 = vmul.f32 %v401_v17, %v3743_v4 }
  0xb0   :  { %323 = vrot.lane.b32.xlu1 %v266_v52, %s3559_s5  ;;  %325 = vrot.lane.b32.xlu0 %v267_v53, %s3559_s5  ;;  %7119 = vst [vmem:[#allocation11_spill] sm:$0xff] %v3743_v4  ;;  %v3824_v53 = vstv %s3482_s8 }
  0xb1   :  { %v3745_v5 = vld [vmem:[#allocation2 + $0x90] sm:$0xff]  ;;  %v3753_v8 = vld [vmem:[#allocation2 + $0x98] sm:$0xff]  ;;  %v3755_v9 = vld [vmem:[#allocation2 + $0xa0] sm:$0xf]  ;;  %v547_v57 = vmul.f32 %v3824_v53, %v3648_v22 }
  0xb2   :  { %7120 = vst [vmem:[#allocation12_spill] sm:$0xff] %v3745_v5  ;;  %v275_v7 = vmul.f32 %v3646_v21, %v3745_v5  ;;  %7121 = vst [vmem:[#allocation13_spill] sm:$0xff] %v3753_v8  ;;  %v276_v10 = vmul.f32 %v3646_v21, %v3753_v8  ;;  %v277_v11 = vmul.f32 %v3646_v21, %v3755_v9 }
  0xb3   :  { %7122 = vst [vmem:[#allocation14_spill] sm:$0xff] %v3755_v9  ;;  %v420_v46 = vmul.f32 %v401_v17, %v3745_v5  ;;  %v421_v47 = vmul.f32 %v401_v17, %v3753_v8  ;;  %v422_v50 = vmul.f32 %v401_v17, %v3755_v9 }
  0xb4   :  { %327 = vrot.lane.b32.xlu1 %v268_v58, %s3559_s5  ;;  %329 = vrot.lane.b32.xlu0 %v269_v59, %s3559_s5  ;;  %v548_v58 = vmul.f32 %v3824_v53, %v3657_v27  ;;  %v549_v59 = vmul.f32 %v3824_v53, %v3659_v28 }
  0xb5   :  { %v3763_v12 = vld [vmem:[#allocation2 + $0xa8] sm:$0xff]  ;;  %v3765_v13 = vld [vmem:[#allocation2 + $0xb0] sm:$0xff]  ;;  %v3773_v16 = vld [vmem:[#allocation2 + $0xb8] sm:$0xf] }
  0xb6   :  { %v278_v14 = vmul.f32 %v3646_v21, %v3763_v12  ;;  %v279_v15 = vmul.f32 %v3646_v21, %v3765_v13  ;;  %v280_v18 = vmul.f32 %v3646_v21, %v3773_v16  ;;  %v407_v21 = vmul.f32 %v401_v17, %v3675_v36 }
  0xb7   :  { %v423_v51 = vmul.f32 %v401_v17, %v3763_v12  ;;  %v424_v52 = vmul.f32 %v401_v17, %v3765_v13  ;;  %v425_v56 = vmul.f32 %v401_v17, %v3773_v16 }
  0xb8   :  { %331 = vrot.lane.b32.xlu1 %v270_v62, %s3559_s5  ;;  %333 = vrot.lane.b32.xlu0 %v271_v63, %s3559_s5  ;;  %v550_v62 = vmul.f32 %v3824_v53, %v3655_v26  ;;  %v551_v63 = vmul.f32 %v3824_v53, %v3661_v29 }
  0xbc   :  { %335 = vrot.lane.b32.xlu1 %v272_v2, %s3559_s5  ;;  %337 = vrot.lane.b32.xlu0 %v273_v3, %s3559_s5  ;;  %v552_v2 = vmul.f32 %v3824_v53, %v3675_v36  ;;  %v553_v3 = vmul.f32 %v3824_v53, %v3677_v37 }
  0xc0   :  { %339 = vrot.lane.b32.xlu1 %v274_v6, %s3559_s5  ;;  %341 = vrot.lane.b32.xlu0 %v275_v7, %s3559_s5  ;;  %v554_v6 = vmul.f32 %v3824_v53, %v3687_v42  ;;  %v555_v7 = vmul.f32 %v3824_v53, %v3689_v43 }
  0xc4   :  { %343 = vrot.lane.b32.xlu1 %v276_v10, %s3559_s5  ;;  %345 = vrot.lane.b32.xlu0 %v277_v11, %s3559_s5  ;;  %v556_v11 = vmul.f32 %v3824_v53, %v3699_v48 }
  0xc8   :  { %347 = vrot.lane.b32.xlu1 %v278_v14, %s3559_s5  ;;  %349 = vrot.lane.b32.xlu0 %v279_v15, %s3559_s5  ;;  %v557_v14 = vmul.f32 %v3824_v53, %v3701_v49 }
  0xcc   :  { %351 = vrot.lane.b32.xlu1 %v280_v18, %s3559_s5  ;;  %450 = vrot.lane.b32.xlu0 %v402_v19, %s3560_s7  ;;  %v558_v18 = vmul.f32 %v3824_v53, %v3711_v54  ;;  %v559_v19 = vmul.f32 %v3824_v53, %v3713_v55 }
  0xd0   :  { %452 = vrot.lane.b32.xlu1 %v403_v20, %s3560_s7  ;;  %454 = vrot.lane.b32.xlu0 %v404_v23, %s3560_s7 }
  0xd4   :  { %456 = vrot.lane.b32.xlu1 %v405_v24, %s3560_s7  ;;  %458 = vrot.lane.b32.xlu0 %v406_v25, %s3560_s7  ;;  %v560_v24 = vmul.f32 %v3824_v53, %v3723_v60  ;;  %v561_v25 = vmul.f32 %v3824_v53, %v3725_v61 }
  0xd8   :  { %460 = vrot.lane.b32.xlu1 %v407_v21, %s3560_s7  ;;  %462 = vrot.lane.b32.xlu0 %v408_v30, %s3560_s7 }
  0xdc   :  { %464 = vrot.lane.b32.xlu1 %v409_v31, %s3560_s7  ;;  %466 = vrot.lane.b32.xlu0 %v410_v32, %s3560_s7  ;;  %v562_v31 = vmul.f32 %v3824_v53, %v3733_v0  ;;  %v563_v32 = vmul.f32 %v3824_v53, %v3735_v1 }
  0xe0   :  { %468 = vrot.lane.b32.xlu1 %v411_v33, %s3560_s7  ;;  %470 = vrot.lane.b32.xlu0 %v412_v34, %s3560_s7 }
  0xe4   :  { %472 = vrot.lane.b32.xlu1 %v413_v35, %s3560_s7  ;;  %474 = vrot.lane.b32.xlu0 %v414_v38, %s3560_s7  ;;  %v564_v35 = vmul.f32 %v3824_v53, %v3743_v4  ;;  %v565_v38 = vmul.f32 %v3824_v53, %v3745_v5 }
  0xe8   :  { %476 = vrot.lane.b32.xlu1 %v415_v39, %s3560_s7  ;;  %478 = vrot.lane.b32.xlu0 %v416_v40, %s3560_s7 }
  0xec   :  { %480 = vrot.lane.b32.xlu1 %v417_v41, %s3560_s7  ;;  %482 = vrot.lane.b32.xlu0 %v418_v44, %s3560_s7  ;;  %v566_v41 = vmul.f32 %v3824_v53, %v3753_v8  ;;  %v567_v44 = vmul.f32 %v3824_v53, %v3755_v9 }
  0xf0   :  { %484 = vrot.lane.b32.xlu1 %v419_v45, %s3560_s7  ;;  %486 = vrot.lane.b32.xlu0 %v420_v46, %s3560_s7 }
  0xf4   :  { %488 = vrot.lane.b32.xlu1 %v421_v47, %s3560_s7  ;;  %490 = vrot.lane.b32.xlu0 %v422_v50, %s3560_s7  ;;  %v568_v47 = vmul.f32 %v3824_v53, %v3763_v12  ;;  %v569_v50 = vmul.f32 %v3824_v53, %v3765_v13 }
  0xf8   :  { %492 = vrot.lane.b32.xlu1 %v423_v51, %s3560_s7  ;;  %494 = vrot.lane.b32.xlu0 %v424_v52, %s3560_s7  ;;  %v3923_v51 = vstv %s3483_s10 }
  0xfc   :  { %496 = vrot.lane.b32.xlu1 %v425_v56, %s3560_s7  ;;  %595 = vrot.lane.b32.xlu0 %v547_v57, %s3561_s9  ;;  %v570_v57 = vmul.f32 %v3824_v53, %v3773_v16 }
 0x100   :  { %597 = vrot.lane.b32.xlu1 %v548_v58, %s3561_s9  ;;  %599 = vrot.lane.b32.xlu0 %v549_v59, %s3561_s9  ;;  %v692_v58 = vmul.f32 %v3923_v51, %v3648_v22 }
 0x104   :  { %601 = vrot.lane.b32.xlu1 %v550_v62, %s3561_s9  ;;  %603 = vrot.lane.b32.xlu0 %v551_v63, %s3561_s9  ;;  %v693_v63 = vmul.f32 %v3923_v51, %v3657_v27 }
 0x108   :  { %605 = vrot.lane.b32.xlu1 %v552_v2, %s3561_s9  ;;  %607 = vrot.lane.b32.xlu0 %v553_v3, %s3561_s9  ;;  %v694_v2 = vmul.f32 %v3923_v51, %v3659_v28 }
 0x10c   :  { %609 = vrot.lane.b32.xlu1 %v554_v6, %s3561_s9  ;;  %611 = vrot.lane.b32.xlu0 %v555_v7, %s3561_s9  ;;  %v695_v6 = vmul.f32 %v3923_v51, %v3655_v26  ;;  %v696_v7 = vmul.f32 %v3923_v51, %v3661_v29 }
 0x10e   :  { %v3857_v10 = vpop.permute.xlu0 %305 }
 0x110   :  { %613 = vrot.lane.b32.xlu1 %v556_v11, %s3561_s9  ;;  %615 = vrot.lane.b32.xlu0 %v557_v14, %s3561_s9 }
 0x112   :  { %v3865_v15 = vpop.permute.xlu1 %307  ;;  %v3867_v17 = vpop.permute.xlu0 %309 }
 0x114   :  { %617 = vrot.lane.b32.xlu1 %v558_v18, %s3561_s9  ;;  %619 = vrot.lane.b32.xlu0 %v559_v19, %s3561_s9  ;;  %v697_v18 = vmul.f32 %v3923_v51, %v3675_v36  ;;  %v698_v19 = vmul.f32 %v3923_v51, %v3677_v37 }
 0x116   :  { %v3875_v20 = vpop.permute.xlu1 %311  ;;  %v3877_v23 = vpop.permute.xlu0 %313 }
 0x118   :  { %621 = vrot.lane.b32.xlu1 %v560_v24, %s3561_s9  ;;  %623 = vrot.lane.b32.xlu0 %v561_v25, %s3561_s9 }
 0x11a   :  { %v3885_v21 = vpop.permute.xlu1 %315  ;;  %v3887_v30 = vpop.permute.xlu0 %317 }
 0x11c   :  { %625 = vrot.lane.b32.xlu1 %v562_v31, %s3561_s9  ;;  %627 = vrot.lane.b32.xlu0 %v563_v32, %s3561_s9  ;;  %v699_v31 = vmul.f32 %v3923_v51, %v3687_v42  ;;  %v700_v32 = vmul.f32 %v3923_v51, %v3689_v43 }
 0x11e   :  { %v3895_v33 = vpop.permute.xlu1 %319  ;;  %v3897_v34 = vpop.permute.xlu0 %321 }
 0x120   :  { %629 = vrot.lane.b32.xlu1 %v564_v35, %s3561_s9  ;;  %631 = vrot.lane.b32.xlu0 %v565_v38, %s3561_s9 }
 0x122   :  { %v3905_v39 = vpop.permute.xlu1 %323  ;;  %v3907_v40 = vpop.permute.xlu0 %325 }
 0x123   :  { %7123 = vst [vmem:[#allocation15_spill] sm:$0xff] %v3905_v39  ;;  %7124 = vst [vmem:[#allocation16_spill] sm:$0xff] %v3907_v40  ;;  %v4171_v40 = vld [vmem:[#allocation2 + $0x89] sm:$0xf]  ;;  %v4173_v39 = vld [vmem:[#allocation2 + $0x91] sm:$0xff] }
 0x124   :  { %633 = vrot.lane.b32.xlu1 %v566_v41, %s3561_s9  ;;  %635 = vrot.lane.b32.xlu0 %v567_v44, %s3561_s9  ;;  %v701_v41 = vmul.f32 %v3923_v51, %v3699_v48  ;;  %v702_v44 = vmul.f32 %v3923_v51, %v3701_v49  ;;  %7157 = vst [vmem:[#allocation49_spill] sm:$0xff] %v4171_v40  ;;  %7158 = vst [vmem:[#allocation50_spill] sm:$0xff] %v4173_v39 }
 0x126   :  { %v3915_v45 = vpop.permute.xlu1 %327  ;;  %v3917_v46 = vpop.permute.xlu0 %329 }
 0x127   :  { %7125 = vst [vmem:[#allocation17_spill] sm:$0xff] %v3915_v45  ;;  %7126 = vst [vmem:[#allocation18_spill] sm:$0xff] %v3917_v46  ;;  %v4157_v45 = vld [vmem:[#allocation2 + $0x79] sm:$0xff] }
 0x128   :  { %637 = vrot.lane.b32.xlu1 %v568_v47, %s3561_s9  ;;  %639 = vrot.lane.b32.xlu0 %v569_v50, %s3561_s9  ;;  %7155 = vst [vmem:[#allocation47_spill] sm:$0xff] %v4157_v45 }
 0x12a   :  { %v3927_v52 = vpop.permute.xlu1 %331  ;;  %v3929_v56 = vpop.permute.xlu0 %333 }
 0x12b   :  { %7127 = vst [vmem:[#allocation19_spill] sm:$0xff] %v3927_v52  ;;  %7128 = vst [vmem:[#allocation20_spill] sm:$0xff] %v3929_v56  ;;  %v4131_v56 = vld [vmem:[#allocation2 + $0x61] sm:$0xff] }
 0x12c   :  { %641 = vrot.lane.b32.xlu1 %v570_v57, %s3561_s9  ;;  %740 = vrot.lane.b32.xlu0 %v692_v58, %s3562_s11  ;;  %v703_v57 = vmul.f32 %v3923_v51, %v3711_v54  ;;  %v704_v58 = vmul.f32 %v3923_v51, %v3713_v55 }
 0x12e   :  { %v3937_v59 = vpop.permute.xlu1 %335  ;;  %v3939_v62 = vpop.permute.xlu0 %337 }
 0x12f   :  { %7129 = vst [vmem:[#allocation21_spill] sm:$0xff] %v3937_v59  ;;  %7130 = vst [vmem:[#allocation22_spill] sm:$0xff] %v3939_v62  ;;  %v4101_v62 = vld [vmem:[#allocation2 + $0x39] sm:$0xff]  ;;  %v4103_v59 = vld [vmem:[#allocation2 + $0x41] sm:$0xf] }
 0x130   :  { %742 = vrot.lane.b32.xlu1 %v693_v63, %s3562_s11  ;;  %744 = vrot.lane.b32.xlu0 %v694_v2, %s3562_s11 }
 0x132   :  { %v3947_v53 = vpop.permute.xlu1 %339  ;;  %v3949_v3 = vpop.permute.xlu0 %341 }
 0x133   :  { %7131 = vst [vmem:[#allocation23_spill] sm:$0xff] %v3947_v53  ;;  %7132 = vst [vmem:[#allocation24_spill] sm:$0xff] %v3949_v3  ;;  %v4075_v53 = vld [vmem:[#allocation2 + $0x21] sm:$0xff] }
 0x134   :  { %746 = vrot.lane.b32.xlu1 %v695_v6, %s3562_s11  ;;  %748 = vrot.lane.b32.xlu0 %v696_v7, %s3562_s11  ;;  %v705_v6 = vmul.f32 %v3923_v51, %v3723_v60  ;;  %v706_v7 = vmul.f32 %v3923_v51, %v3725_v61 }
 0x136   :  { %v3957_v11 = vpop.permute.xlu1 %343  ;;  %v3959_v14 = vpop.permute.xlu0 %345 }
 0x137   :  { %7133 = vst [vmem:[#allocation25_spill] sm:$0xff] %v3957_v11  ;;  %7134 = vst [vmem:[#allocation26_spill] sm:$0xff] %v3959_v14  ;;  %v4047_v14 = vstv %s3485_s12  ;;  %v715_v11 = vmul.f32 %v3923_v51, %v3773_v16 }
 0x138   :  { %750 = vrot.lane.b32.xlu1 %v697_v18, %s3562_s11  ;;  %752 = vrot.lane.b32.xlu0 %v698_v19, %s3562_s11  ;;  %v922_v52 = vmul.f32 %v4047_v14, %v4131_v56 }
 0x13a   :  { %v3967_v24 = vpop.permute.xlu1 %347  ;;  %v3969_v25 = vpop.permute.xlu0 %349 }
 0x13b   :  { %7135 = vst [vmem:[#allocation27_spill] sm:$0xff] %v3967_v24  ;;  %7136 = vst [vmem:[#allocation28_spill] sm:$0xff] %v3969_v25  ;;  %v4045_v24 = vld [vmem:[#allocation2 + $0x1] sm:$0xff] }
 0x13c   :  { %754 = vrot.lane.b32.xlu1 %v699_v31, %s3562_s11  ;;  %756 = vrot.lane.b32.xlu0 %v700_v32, %s3562_s11  ;;  %v707_v31 = vmul.f32 %v3923_v51, %v3733_v0  ;;  %v708_v32 = vmul.f32 %v3923_v51, %v3735_v1 }
 0x13e   :  { %v3977_v35 = vpop.permute.xlu1 %351  ;;  %v3979_v38 = vpop.permute.xlu0 %450 }
 0x13f   :  { %7137 = vst [vmem:[#allocation29_spill] sm:$0xff] %v3977_v35 }
 0x140   :  { %758 = vrot.lane.b32.xlu1 %v701_v41, %s3562_s11  ;;  %760 = vrot.lane.b32.xlu0 %v702_v44, %s3562_s11 }
 0x142   :  { %v3987_v47 = vpop.permute.xlu1 %452  ;;  %v3989_v50 = vpop.permute.xlu0 %454 }
 0x144   :  { %762 = vrot.lane.b32.xlu1 %v703_v57, %s3562_s11  ;;  %764 = vrot.lane.b32.xlu0 %v704_v58, %s3562_s11  ;;  %v709_v57 = vmul.f32 %v3923_v51, %v3743_v4  ;;  %v710_v58 = vmul.f32 %v3923_v51, %v3745_v5  ;;  %v4089_v5 = vld [vmem:[#allocation2 + $0x31] sm:$0xff]  ;;  %v4129_v4 = vld [vmem:[#allocation2 + $0x59] sm:$0xf] }
 0x146   :  { %v3997_v63 = vpop.permute.xlu1 %456  ;;  %v3999_v2 = vpop.permute.xlu0 %458 }
 0x148   :  { %766 = vrot.lane.b32.xlu1 %v705_v6, %s3562_s11  ;;  %768 = vrot.lane.b32.xlu0 %v706_v7, %s3562_s11 }
 0x14a   :  { %v4007_v18 = vpop.permute.xlu1 %460  ;;  %v4009_v19 = vpop.permute.xlu0 %462 }
 0x14c   :  { %770 = vrot.lane.b32.xlu1 %v707_v31, %s3562_s11  ;;  %772 = vrot.lane.b32.xlu0 %v708_v32, %s3562_s11  ;;  %v711_v31 = vmul.f32 %v3923_v51, %v3753_v8  ;;  %v712_v32 = vmul.f32 %v3923_v51, %v3755_v9  ;;  %v4059_v9 = vld [vmem:[#allocation2 + $0x9] sm:$0xff] }
 0x14d   :  { %v911_v3 = vmul.f32 %v4047_v14, %v4059_v9  ;;  %v4087_v8 = vld [vmem:[#allocation2 + $0x29] sm:$0xf] }
 0x14e   :  { %v4017_v41 = vpop.permute.xlu1 %464  ;;  %v4019_v44 = vpop.permute.xlu0 %466 }
 0x14f   :  { %7138 = vst [vmem:[#allocation30_spill] sm:$0xff] %v4017_v41  ;;  %7139 = vst [vmem:[#allocation31_spill] sm:$0xff] %v4019_v44  ;;  %v927_v44 = vmul.f32 %v4047_v14, %v4171_v40  ;;  %v928_v41 = vmul.f32 %v4047_v14, %v4173_v39  ;;  %v4199_v39 = vld [vmem:[#allocation2 + $0xa9] sm:$0xff] }
 0x150   :  { %774 = vrot.lane.b32.xlu1 %v709_v57, %s3562_s11  ;;  %776 = vrot.lane.b32.xlu0 %v710_v58, %s3562_s11  ;;  %v713_v57 = vmul.f32 %v3923_v51, %v3763_v12  ;;  %v714_v58 = vmul.f32 %v3923_v51, %v3765_v13  ;;  %v910_v12 = vmul.f32 %v4047_v14, %v4045_v24  ;;  %v4061_v13 = vld [vmem:[#allocation2 + $0x11] sm:$0xf]  ;;  %v4073_v51 = vld [vmem:[#allocation2 + $0x19] sm:$0xff] }
 0x151   :  { %v912_v16 = vmul.f32 %v4047_v14, %v4061_v13  ;;  %7165 = vst [vmem:[#allocation57_spill] sm:$0xff] %v4199_v39 }
 0x152   :  { %v4027_v6 = vpop.permute.xlu1 %468  ;;  %v4029_v7 = vpop.permute.xlu0 %470 }
 0x153   :  { %7140 = vst [vmem:[#allocation32_spill] sm:$0xff] %v4027_v6  ;;  %7141 = vst [vmem:[#allocation33_spill] sm:$0xff] %v4029_v7  ;;  %v4159_v7 = vld [vmem:[#allocation2 + $0x81] sm:$0xff]  ;;  %v925_v6 = vmul.f32 %v4047_v14, %v4157_v45  ;;  %v4185_v45 = vld [vmem:[#allocation2 + $0x99] sm:$0xff] }
 0x154   :  { %778 = vrot.lane.b32.xlu1 %v711_v31, %s3562_s11  ;;  %780 = vrot.lane.b32.xlu0 %v712_v32, %s3562_s11  ;;  %7156 = vst [vmem:[#allocation48_spill] sm:$0xff] %v4159_v7  ;;  %v926_v0 = vmul.f32 %v4047_v14, %v4159_v7  ;;  %7161 = vst [vmem:[#allocation53_spill] sm:$0xff] %v4185_v45  ;;  %v4187_v7 = vld [vmem:[#allocation2 + $0xa1] sm:$0xf] }
 0x155   :  { %7162 = vst [vmem:[#allocation54_spill] sm:$0xff] %v4187_v7  ;;  %v930_v40 = vmul.f32 %v4047_v14, %v4187_v7  ;;  %v4215_v7 = vstv %s3486_s13 }
 0x156   :  { %v4037_v35 = vpop.permute.xlu1 %472  ;;  %v4039_v25 = vpop.permute.xlu0 %474 }
 0x157   :  { %7142 = vst [vmem:[#allocation34_spill] sm:$0xff] %v4037_v35  ;;  %7143 = vst [vmem:[#allocation35_spill] sm:$0xff] %v4039_v25  ;;  %v4143_v25 = vld [vmem:[#allocation2 + $0x69] sm:$0xff]  ;;  %v4145_v35 = vld [vmem:[#allocation2 + $0x71] sm:$0xf] }
 0x158   :  { %782 = vrot.lane.b32.xlu1 %v713_v57, %s3562_s11  ;;  %784 = vrot.lane.b32.xlu0 %v714_v58, %s3562_s11  ;;  %v923_v1 = vmul.f32 %v4047_v14, %v4143_v25  ;;  %v924_v46 = vmul.f32 %v4047_v14, %v4145_v35 }
 0x15a   :  { %v4051_v31 = vpop.permute.xlu1 %476  ;;  %v4053_v32 = vpop.permute.xlu0 %478 }
 0x15b   :  { %7144 = vst [vmem:[#allocation36_spill] sm:$0xff] %v4051_v31  ;;  %7145 = vst [vmem:[#allocation37_spill] sm:$0xff] %v4053_v32  ;;  %v4115_v32 = vld [vmem:[#allocation2 + $0x49] sm:$0xff]  ;;  %v4117_v31 = vld [vmem:[#allocation2 + $0x51] sm:$0xff] }
 0x15c   :  { %786 = vrot.lane.b32.xlu1 %v715_v11, %s3562_s11  ;;  %958 = vrot.lane.b32.xlu0 %v910_v12, %s3559_s5 }
 0x15e   :  { %v4065_v57 = vpop.permute.xlu1 %480  ;;  %v4067_v58 = vpop.permute.xlu0 %482 }
 0x15f   :  { %7146 = vst [vmem:[#allocation38_spill] sm:$0xff] %v4065_v57  ;;  %7147 = vst [vmem:[#allocation39_spill] sm:$0xff] %v4067_v58  ;;  %v913_v58 = vmul.f32 %v4047_v14, %v4073_v51  ;;  %v914_v57 = vmul.f32 %v4047_v14, %v4075_v53 }
 0x160   :  { %960 = vrot.lane.b32.xlu1 %v911_v3, %s3559_s5  ;;  %962 = vrot.lane.b32.xlu0 %v912_v16, %s3559_s5 }
 0x162   :  { %v4079_v11 = vpop.permute.xlu1 %484  ;;  %v4081_v12 = vpop.permute.xlu0 %486 }
 0x163   :  { %7148 = vst [vmem:[#allocation40_spill] sm:$0xff] %v4079_v11  ;;  %7149 = vst [vmem:[#allocation41_spill] sm:$0xff] %v4081_v12  ;;  %v915_v12 = vmul.f32 %v4047_v14, %v4087_v8  ;;  %v916_v11 = vmul.f32 %v4047_v14, %v4089_v5 }
 0x164   :  { %964 = vrot.lane.b32.xlu1 %v913_v58, %s3559_s5  ;;  %966 = vrot.lane.b32.xlu0 %v914_v57, %s3559_s5 }
 0x166   :  { %v4093_v3 = vpop.permute.xlu1 %488  ;;  %v4095_v16 = vpop.permute.xlu0 %490 }
 0x167   :  { %7150 = vst [vmem:[#allocation42_spill] sm:$0xff] %v4093_v3  ;;  %7151 = vst [vmem:[#allocation43_spill] sm:$0xff] %v4095_v16  ;;  %v917_v16 = vmul.f32 %v4047_v14, %v4101_v62  ;;  %v918_v3 = vmul.f32 %v4047_v14, %v4103_v59 }
 0x168   :  { %968 = vrot.lane.b32.xlu1 %v915_v12, %s3559_s5  ;;  %970 = vrot.lane.b32.xlu0 %v916_v11, %s3559_s5 }
 0x16a   :  { %v4107_v58 = vpop.permute.xlu1 %492  ;;  %v4109_v57 = vpop.permute.xlu0 %494 }
 0x16b   :  { %7152 = vst [vmem:[#allocation44_spill] sm:$0xff] %v4107_v58  ;;  %7153 = vst [vmem:[#allocation45_spill] sm:$0xff] %v4109_v57  ;;  %v919_v57 = vmul.f32 %v4047_v14, %v4115_v32  ;;  %v920_v58 = vmul.f32 %v4047_v14, %v4117_v31 }
 0x16c   :  { %972 = vrot.lane.b32.xlu1 %v917_v16, %s3559_s5  ;;  %974 = vrot.lane.b32.xlu0 %v918_v3, %s3559_s5 }
 0x16e   :  { %v4121_v12 = vpop.permute.xlu1 %496  ;;  %v4123_v11 = vpop.permute.xlu0 %595 }
 0x16f   :  { %7154 = vst [vmem:[#allocation46_spill] sm:$0xff] %v4121_v12  ;;  %v921_v12 = vmul.f32 %v4047_v14, %v4129_v4 }
 0x170   :  { %976 = vrot.lane.b32.xlu1 %v919_v57, %s3559_s5  ;;  %978 = vrot.lane.b32.xlu0 %v920_v58, %s3559_s5 }
 0x172   :  { %v4135_v16 = vpop.permute.xlu1 %597  ;;  %v4137_v3 = vpop.permute.xlu0 %599 }
 0x174   :  { %980 = vrot.lane.b32.xlu1 %v921_v12, %s3559_s5  ;;  %982 = vrot.lane.b32.xlu0 %v922_v52, %s3559_s5 }
 0x176   :  { %v4149_v57 = vpop.permute.xlu1 %601  ;;  %v4151_v58 = vpop.permute.xlu0 %603 }
 0x178   :  { %984 = vrot.lane.b32.xlu1 %v923_v1, %s3559_s5  ;;  %986 = vrot.lane.b32.xlu0 %v924_v46, %s3559_s5 }
 0x17a   :  { %v4163_v12 = vpop.permute.xlu1 %605  ;;  %v4165_v52 = vpop.permute.xlu0 %607 }
 0x17c   :  { %988 = vrot.lane.b32.xlu1 %v925_v6, %s3559_s5  ;;  %990 = vrot.lane.b32.xlu0 %v926_v0, %s3559_s5 }
 0x17e   :  { %v4177_v1 = vpop.permute.xlu1 %609  ;;  %v4179_v46 = vpop.permute.xlu0 %611 }
 0x17f   :  { %7159 = vst [vmem:[#allocation51_spill] sm:$0xff] %v4177_v1  ;;  %7160 = vst [vmem:[#allocation52_spill] sm:$0xff] %v4179_v46  ;;  %v929_v46 = vmul.f32 %v4047_v14, %v4185_v45  ;;  %v4201_v1 = vld [vmem:[#allocation2 + $0xb1] sm:$0xff] }
 0x180   :  { %992 = vrot.lane.b32.xlu1 %v927_v44, %s3559_s5  ;;  %994 = vrot.lane.b32.xlu0 %v928_v41, %s3559_s5  ;;  %7166 = vst [vmem:[#allocation58_spill] sm:$0xff] %v4201_v1  ;;  %v932_v45 = vmul.f32 %v4047_v14, %v4201_v1 }
 0x182   :  { %v4191_v0 = vpop.permute.xlu1 %613  ;;  %v4193_v6 = vpop.permute.xlu0 %615 }
 0x183   :  { %7163 = vst [vmem:[#allocation55_spill] sm:$0xff] %v4191_v0  ;;  %7164 = vst [vmem:[#allocation56_spill] sm:$0xff] %v4193_v6  ;;  %v931_v6 = vmul.f32 %v4047_v14, %v4199_v39  ;;  %v4213_v0 = vld [vmem:[#allocation2 + $0xb9] sm:$0xf]  ;;  %v1055_v39 = vmul.f32 %v4215_v7, %v4045_v24 }
 0x184   :  { %996 = vrot.lane.b32.xlu1 %v929_v46, %s3559_s5  ;;  %998 = vrot.lane.b32.xlu0 %v930_v40, %s3559_s5  ;;  %7169 = vst [vmem:[#allocation61_spill] sm:$0xff] %v4213_v0 }
 0x186   :  { %v4205_v44 = vpop.permute.xlu1 %617  ;;  %v4207_v41 = vpop.permute.xlu0 %619 }
 0x187   :  { %7167 = vst [vmem:[#allocation59_spill] sm:$0xff] %v4205_v44  ;;  %7168 = vst [vmem:[#allocation60_spill] sm:$0xff] %v4207_v41  ;;  %v933_v41 = vmul.f32 %v4047_v14, %v4213_v0  ;;  %v1062_v44 = vmul.f32 %v4215_v7, %v4101_v62 }
 0x188   :  { %1000 = vrot.lane.b32.xlu1 %v931_v6, %s3559_s5  ;;  %1002 = vrot.lane.b32.xlu0 %v932_v45, %s3559_s5  ;;  %v1056_v45 = vmul.f32 %v4215_v7, %v4059_v9 }
 0x18a   :  { %v4219_v46 = vpop.permute.xlu1 %621  ;;  %v4221_v40 = vpop.permute.xlu0 %623 }
 0x18b   :  { %7170 = vst [vmem:[#allocation62_spill] sm:$0xff] %v4219_v46  ;;  %7171 = vst [vmem:[#allocation63_spill] sm:$0xff] %v4221_v40  ;;  %v1057_v40 = vmul.f32 %v4215_v7, %v4061_v13  ;;  %v4261_v46 = vstv %s3487_s15 }
 0x18c   :  { %1004 = vrot.lane.b32.xlu1 %v933_v41, %s3559_s5  ;;  %1103 = vrot.lane.b32.xlu0 %v1055_v39, %s3560_s7  ;;  %v1058_v39 = vmul.f32 %v4215_v7, %v4073_v51 }
 0x18e   :  { %v4229_v1 = vpop.permute.xlu1 %625  ;;  %v4231_v6 = vpop.permute.xlu0 %627 }
 0x18f   :  { %7172 = vst [vmem:[#allocation64_spill] sm:$0xff] %v4229_v1  ;;  %7173 = vst [vmem:[#allocation65_spill] sm:$0xff] %v4231_v6  ;;  %v1059_v6 = vmul.f32 %v4215_v7, %v4075_v53  ;;  %v4247_v1 = vstv %s158_s14 }
 0x190   :  { %1105 = vrot.lane.b32.xlu1 %v1056_v45, %s3560_s7  ;;  %1107 = vrot.lane.b32.xlu0 %v1057_v40, %s3560_s7  ;;  %v208_v0 = vmul.f32 %v4247_v1, %v3648_v22  ;;  %v1063_v22 = vmul.f32 %v4215_v7, %v4103_v59 }
 0x192   :  { %v4239_v14 = vpop.permute.xlu1 %629  ;;  %v4241_v41 = vpop.permute.xlu0 %631 }
 0x193   :  { %7174 = vst [vmem:[#allocation66_spill] sm:$0xff] %v4239_v14  ;;  %7175 = vst [vmem:[#allocation67_spill] sm:$0xff] %v4241_v41  ;;  %v1060_v41 = vmul.f32 %v4215_v7, %v4087_v8  ;;  %v1061_v14 = vmul.f32 %v4215_v7, %v4089_v5 }
 0x194   :  { %1109 = vrot.lane.b32.xlu1 %v1058_v39, %s3560_s7  ;;  %1111 = vrot.lane.b32.xlu0 %v1059_v6, %s3560_s7  ;;  %v377_v6 = vadd.f32 %v3857_v10, %v208_v0  ;;  %v211_v39 = vmul.f32 %v4247_v1, %v3655_v26  ;;  %v4282_v10 = vmul.f32 %v4261_v46, %v4073_v51 }
 0x195   :  { %v209_v26 = vmul.f32 %v4247_v1, %v3657_v27  ;;  %v210_v0 = vmul.f32 %v4247_v1, %v3659_v28  ;;  %v4299_v27 = vstv %s3484_s16 }
 0x196   :  { %v4251_v45 = vpop.permute.xlu1 %633  ;;  %v4253_v40 = vpop.permute.xlu0 %635  ;;  %7181 = vst [vmem:[#allocation73_spill] sm:$0xff] %v4282_v10  ;;  %v215_v10 = vmul.f32 %v4247_v1, %v3687_v42  ;;  %v4312_v42 = vmul.f32 %v4247_v1, %v3701_v49  ;;  %v380_v49 = vadd.f32 %v3875_v20, %v211_v39 }
 0x197   :  { %7176 = vst [vmem:[#allocation68_spill] sm:$0xff] %v4251_v45  ;;  %7177 = vst [vmem:[#allocation69_spill] sm:$0xff] %v4253_v40  ;;  %v378_v28 = vadd.f32 %v3865_v15, %v209_v26  ;;  %v1064_v15 = vmul.f32 %v4215_v7, %v4115_v32  ;;  %v4331_v26 = vmul.f32 %v4247_v1, %v3713_v55 }
 0x198   :  { %1113 = vrot.lane.b32.xlu1 %v1060_v41, %s3560_s7  ;;  %1115 = vrot.lane.b32.xlu0 %v1061_v14, %s3560_s7  ;;  %v4278_v41 = vmul.f32 %v4261_v46, %v4045_v24  ;;  %v212_v14 = vmul.f32 %v4247_v1, %v3661_v29  ;;  %v379_v29 = vadd.f32 %v3867_v17, %v210_v0 }
 0x199   :  { %v1065_v17 = vmul.f32 %v4215_v7, %v4117_v31  ;;  %v1067_v55 = vmul.f32 %v4215_v7, %v4131_v56 }
 0x19a   :  { %v4268_v40 = vpop.permute.xlu1 %637  ;;  %v4270_v45 = vpop.permute.xlu0 %639  ;;  %7180 = vst [vmem:[#allocation72_spill] sm:$0xff] %v4278_v41  ;;  %v214_v41 = vmul.f32 %v4247_v1, %v3677_v37  ;;  %v4308_v37 = vmul.f32 %v4247_v1, %v3699_v48  ;;  %v861_v48 = vmul.f32 %v4299_v27, %v4045_v24 }
 0x19b   :  { %7178 = vst [vmem:[#allocation70_spill] sm:$0xff] %v4268_v40  ;;  %7179 = vst [vmem:[#allocation71_spill] sm:$0xff] %v4270_v45  ;;  %v522_v45 = vadd.f32 %v3979_v38, %v377_v6  ;;  %v213_v40 = vmul.f32 %v4247_v1, %v3675_v36  ;;  %v216_v38 = vmul.f32 %v4247_v1, %v3689_v43 }
 0x19c   :  { %1117 = vrot.lane.b32.xlu1 %v1062_v44, %s3560_s7  ;;  %1119 = vrot.lane.b32.xlu0 %v1063_v22, %s3560_s7  ;;  %v523_v43 = vadd.f32 %v3987_v47, %v378_v28  ;;  %v4327_v22 = vmul.f32 %v4247_v1, %v3711_v54  ;;  %v381_v47 = vadd.f32 %v3877_v23, %v212_v14 }
 0x19d   :  { %v667_v36 = vadd.f32 %v4123_v11, %v522_v45  ;;  %v524_v11 = vadd.f32 %v3989_v50, %v379_v29  ;;  %v1066_v54 = vmul.f32 %v4215_v7, %v4129_v4  ;;  %v862_v29 = vmul.f32 %v4299_v27, %v4059_v9 }
 0x19e   :  { %v4314_v44 = vpop.permute.xlu1 %641  ;;  %v741_v6 = vpop.permute.xlu0 %740  ;;  %v668_v50 = vadd.f32 %v4135_v16, %v523_v43  ;;  %v863_v23 = vmul.f32 %v4299_v27, %v4061_v13  ;;  %v525_v16 = vadd.f32 %v3997_v63, %v380_v49 }
 0x19f   :  { %v812_v45 = vadd.f32 %v741_v6, %v667_v36  ;;  %v669_v0 = vadd.f32 %v4137_v3, %v524_v11  ;;  %v526_v3 = vadd.f32 %v3999_v2, %v381_v47  ;;  %v382_v6 = vadd.f32 %v3885_v21, %v213_v40 }
 0x1a0   :  { %1121 = vrot.lane.b32.xlu1 %v1064_v15, %s3560_s7  ;;  %1123 = vrot.lane.b32.xlu0 %v1065_v17, %s3560_s7  ;;  %v383_v15 = vadd.f32 %v3887_v30, %v214_v41  ;;  %v4354_v17 = vmul.f32 %v4247_v1, %v3723_v60  ;;  %v670_v43 = vadd.f32 %v4149_v57, %v525_v16 }
 0x1a1   :  { %v4338_v28 = vadd.f32 %v861_v48, %v812_v45  ;;  %v671_v63 = vadd.f32 %v4151_v58, %v526_v3  ;;  %v1068_v30 = vmul.f32 %v4215_v7, %v4143_v25  ;;  %v1069_v60 = vmul.f32 %v4215_v7, %v4145_v35 }
 0x1a2   :  { %v743_v20 = vpop.permute.xlu1 %742  ;;  %v745_v39 = vpop.permute.xlu0 %744  ;;  %v864_v40 = vmul.f32 %v4299_v27, %v4073_v51  ;;  %v865_v57 = vmul.f32 %v4299_v27, %v4075_v53  ;;  %v527_v58 = vadd.f32 %v4007_v18, %v382_v6  ;;  %v528_v41 = vadd.f32 %v4009_v19, %v383_v15  ;;  %v7187_v15 = vld [vmem:[#allocation16_spill] sm:$0xff] }
 0x1a3   :  { %v813_v14 = vadd.f32 %v743_v20, %v668_v50  ;;  %v814_v36 = vadd.f32 %v745_v39, %v669_v0  ;;  %v384_v47 = vadd.f32 %v3895_v33, %v215_v10  ;;  %v385_v50 = vadd.f32 %v3897_v34, %v216_v38  ;;  %v7182_v33 = vld [vmem:[#allocation47_spill] sm:$0xff]  ;;  %v7183_v10 = vld [vmem:[#allocation48_spill] sm:$0xff] }
 0x1a4   :  { %1125 = vrot.lane.b32.xlu1 %v1066_v54, %s3560_s7  ;;  %1127 = vrot.lane.b32.xlu0 %v1067_v55, %s3560_s7  ;;  %v222_v0 = vmul.f32 %v4247_v1, %v3725_v61  ;;  %v672_v20 = vadd.f32 %v4163_v12, %v527_v58  ;;  %v673_v39 = vadd.f32 %v4165_v52, %v528_v41 }
 0x1a5   :  { %v4360_v11 = vadd.f32 %v862_v29, %v813_v14  ;;  %v4362_v2 = vadd.f32 %v863_v23, %v814_v36  ;;  %v1070_v34 = vmul.f32 %v4215_v7, %v7182_v33  ;;  %v1071_v61 = vmul.f32 %v4215_v7, %v7183_v10  ;;  %v7184_v29 = vld [vmem:[#allocation30_spill] sm:$0xff]  ;;  %v7185_v23 = vld [vmem:[#allocation31_spill] sm:$0xff] }
 0x1a6   :  { %v747_v45 = vpop.permute.xlu1 %746  ;;  %v749_v21 = vpop.permute.xlu0 %748  ;;  %v866_v38 = vmul.f32 %v4299_v27, %v4087_v8  ;;  %v867_v12 = vmul.f32 %v4299_v27, %v4089_v5  ;;  %v529_v52 = vadd.f32 %v7184_v29, %v384_v47  ;;  %v530_v16 = vadd.f32 %v7185_v23, %v385_v50  ;;  %v7186_v36 = vld [vmem:[#allocation15_spill] sm:$0xff] }
 0x1a7   :  { %v815_v48 = vadd.f32 %v747_v45, %v670_v43  ;;  %v816_v49 = vadd.f32 %v749_v21, %v671_v63  ;;  %v386_v6 = vadd.f32 %v7186_v36, %v4308_v37  ;;  %v387_v43 = vadd.f32 %v7187_v15, %v4312_v42  ;;  %v7188_v63 = vld [vmem:[#allocation9_spill] sm:$0xff]  ;;  %v7189_v21 = vld [vmem:[#allocation51_spill] sm:$0xff] }
 0x1a8   :  { %1129 = vrot.lane.b32.xlu1 %v1068_v30, %s3560_s7  ;;  %1131 = vrot.lane.b32.xlu0 %v1069_v60, %s3560_s7  ;;  %v223_v45 = vmul.f32 %v4247_v1, %v7188_v63  ;;  %v674_v30 = vadd.f32 %v7189_v21, %v529_v52  ;;  %v7190_v60 = vld [vmem:[#allocation52_spill] sm:$0xff]  ;;  %v868_v50 = vmul.f32 %v4299_v27, %v4101_v62  ;;  %v7196_v52 = vld [vmem:[#allocation18_spill] sm:$0xff] }
 0x1a9   :  { %v4382_v18 = vadd.f32 %v864_v40, %v815_v48  ;;  %v4384_v19 = vadd.f32 %v865_v57, %v816_v49  ;;  %v675_v40 = vadd.f32 %v7190_v60, %v530_v16  ;;  %v7191_v48 = vld [vmem:[#allocation49_spill] sm:$0xff]  ;;  %v7192_v49 = vld [vmem:[#allocation50_spill] sm:$0xff]  ;;  %v389_v23 = vadd.f32 %v7196_v52, %v4331_v26 }
 0x1aa   :  { %v751_v54 = vpop.permute.xlu1 %750  ;;  %v753_v55 = vpop.permute.xlu0 %752  ;;  %v1072_v42 = vmul.f32 %v4215_v7, %v7191_v48  ;;  %v1073_v47 = vmul.f32 %v4215_v7, %v7192_v49  ;;  %v7197_v16 = vld [vmem:[#allocation10_spill] sm:$0xff] }
 0x1ab   :  { %v817_v3 = vadd.f32 %v751_v54, %v672_v20  ;;  %v818_v14 = vadd.f32 %v753_v55, %v673_v39  ;;  %v869_v20 = vmul.f32 %v4299_v27, %v4103_v59  ;;  %v7193_v39 = vld [vmem:[#allocation32_spill] sm:$0xff]  ;;  %v7194_v55 = vld [vmem:[#allocation33_spill] sm:$0xff]  ;;  %v7203_v60 = vld [vmem:[#allocation54_spill] sm:$0xff] }
 0x1ac   :  { %1133 = vrot.lane.b32.xlu1 %v1070_v34, %s3560_s7  ;;  %1135 = vrot.lane.b32.xlu0 %v1071_v61, %s3560_s7  ;;  %v531_v54 = vadd.f32 %v7193_v39, %v386_v6  ;;  %v532_v34 = vadd.f32 %v7194_v55, %v387_v43  ;;  %v7199_v6 = vld [vmem:[#allocation56_spill] sm:$0xff]  ;;  %v7206_v55 = vld [vmem:[#allocation19_spill] sm:$0xff] }
 0x1ad   :  { %v4406_v57 = vadd.f32 %v866_v38, %v817_v3  ;;  %v4408_v58 = vadd.f32 %v867_v12, %v818_v14  ;;  %v7195_v12 = vld [vmem:[#allocation17_spill] sm:$0xff]  ;;  %v224_v3 = vmul.f32 %v4247_v1, %v7197_v16  ;;  %v7198_v14 = vld [vmem:[#allocation55_spill] sm:$0xff] }
 0x1ae   :  { %v755_v41 = vpop.permute.xlu1 %754  ;;  %v757_v37 = vpop.permute.xlu0 %756  ;;  %v388_v29 = vadd.f32 %v7195_v12, %v4327_v22  ;;  %v676_v36 = vadd.f32 %v7198_v14, %v531_v54  ;;  %v677_v15 = vadd.f32 %v7199_v6, %v532_v34  ;;  %v390_v34 = vadd.f32 %v7206_v55, %v4354_v17  ;;  %v7208_v12 = vld [vmem:[#allocation11_spill] sm:$0xff]  ;;  %v7210_v6 = vld [vmem:[#allocation60_spill] sm:$0xff]  ;;  %v7213_v17 = vld [vmem:[#allocation57_spill] sm:$0xff] }
 0x1af   :  { %v819_v61 = vadd.f32 %v755_v41, %v674_v30  ;;  %v820_v38 = vadd.f32 %v757_v37, %v675_v40  ;;  %v7202_v30 = vld [vmem:[#allocation53_spill] sm:$0xff]  ;;  %v1075_v40 = vmul.f32 %v4215_v7, %v7203_v60  ;;  %v870_v41 = vmul.f32 %v4299_v27, %v4115_v32  ;;  %v7209_v16 = vld [vmem:[#allocation59_spill] sm:$0xff] }
 0x1b0   :  { %1137 = vrot.lane.b32.xlu1 %v1072_v42, %s3560_s7  ;;  %1139 = vrot.lane.b32.xlu0 %v1073_v47, %s3560_s7  ;;  %v1074_v26 = vmul.f32 %v4215_v7, %v7202_v30  ;;  %v871_v37 = vmul.f32 %v4299_v27, %v4117_v31  ;;  %v7204_v42 = vld [vmem:[#allocation34_spill] sm:$0xff]  ;;  %v225_v52 = vmul.f32 %v4247_v1, %v7208_v12 }
 0x1b1   :  { %v4430_v43 = vadd.f32 %v868_v50, %v819_v61  ;;  %v4432_v63 = vadd.f32 %v869_v20, %v820_v38  ;;  %v533_v47 = vadd.f32 %v7204_v42, %v388_v29  ;;  %v7205_v50 = vld [vmem:[#allocation35_spill] sm:$0xff]  ;;  %v7207_v61 = vld [vmem:[#allocation20_spill] sm:$0xff] }
 0x1b2   :  { %v759_v21 = vpop.permute.xlu1 %758  ;;  %v761_v22 = vpop.permute.xlu0 %760  ;;  %v534_v39 = vadd.f32 %v7205_v50, %v389_v23  ;;  %v391_v38 = vadd.f32 %v7207_v61, %v222_v0  ;;  %v1076_v0 = vmul.f32 %v4215_v7, %v7213_v17  ;;  %v7218_v61 = vld [vmem:[#allocation22_spill] sm:$0xff] }
 0x1b3   :  { %7200 = vst [vmem:[#allocation47_spill] sm:$0xff] %v4430_v43  ;;  %7201 = vst [vmem:[#allocation48_spill] sm:$0xff] %v4432_v63  ;;  %v821_v20 = vadd.f32 %v759_v21, %v676_v36  ;;  %v822_v54 = vadd.f32 %v761_v22, %v677_v15  ;;  %v678_v14 = vadd.f32 %v7209_v16, %v533_v47  ;;  %v7214_v21 = vld [vmem:[#allocation58_spill] sm:$0xff]  ;;  %v7215_v47 = vld [vmem:[#allocation36_spill] sm:$0xff] }
 0x1b4   :  { %1141 = vrot.lane.b32.xlu1 %v1074_v26, %s3560_s7  ;;  %1143 = vrot.lane.b32.xlu0 %v1075_v40, %s3560_s7  ;;  %v679_v29 = vadd.f32 %v7210_v6, %v534_v39  ;;  %v1077_v22 = vmul.f32 %v4215_v7, %v7214_v21  ;;  %v872_v26 = vmul.f32 %v4299_v27, %v4129_v4  ;;  %v7219_v16 = vld [vmem:[#allocation12_spill] sm:$0xff]  ;;  %v7221_v63 = vld [vmem:[#allocation63_spill] sm:$0xff] }
 0x1b5   :  { %v4453_v42 = vadd.f32 %v870_v41, %v821_v20  ;;  %v4455_v23 = vadd.f32 %v871_v37, %v822_v54  ;;  %v873_v40 = vmul.f32 %v4299_v27, %v4131_v56  ;;  %v535_v50 = vadd.f32 %v7215_v47, %v390_v34  ;;  %v7216_v41 = vld [vmem:[#allocation37_spill] sm:$0xff] }
 0x1b6   :  { %v763_v36 = vpop.permute.xlu1 %762  ;;  %v765_v15 = vpop.permute.xlu0 %764  ;;  %v536_v39 = vadd.f32 %v7216_v41, %v391_v38  ;;  %v7217_v54 = vld [vmem:[#allocation21_spill] sm:$0xff]  ;;  %v393_v12 = vadd.f32 %v7218_v61, %v224_v3  ;;  %v226_v6 = vmul.f32 %v4247_v1, %v7219_v16  ;;  %v7228_v41 = vld [vmem:[#allocation23_spill] sm:$0xff]  ;;  %v7232_v16 = vld [vmem:[#allocation64_spill] sm:$0xff] }
 0x1b7   :  { %7211 = vst [vmem:[#allocation30_spill] sm:$0xff] %v4453_v42  ;;  %7212 = vst [vmem:[#allocation31_spill] sm:$0xff] %v4455_v23  ;;  %v823_v37 = vadd.f32 %v763_v36, %v678_v14  ;;  %v824_v20 = vadd.f32 %v765_v15, %v679_v29  ;;  %v392_v55 = vadd.f32 %v7217_v54, %v223_v45  ;;  %v7220_v23 = vld [vmem:[#allocation62_spill] sm:$0xff]  ;;  %v7224_v14 = vld [vmem:[#allocation13_spill] sm:$0xff] }
 0x1b8   :  { %1145 = vrot.lane.b32.xlu1 %v1076_v0, %s3560_s7  ;;  %1147 = vrot.lane.b32.xlu0 %v1077_v22, %s3560_s7  ;;  %v680_v42 = vadd.f32 %v7220_v23, %v535_v50  ;;  %v681_v43 = vadd.f32 %v7221_v63, %v536_v39  ;;  %v227_v45 = vmul.f32 %v4247_v1, %v7224_v14  ;;  %v7225_v36 = vld [vmem:[#allocation61_spill] sm:$0xff]  ;;  %v7226_v22 = vld [vmem:[#allocation38_spill] sm:$0xff] }
 0x1b9   :  { %v4475_v34 = vadd.f32 %v872_v26, %v823_v37  ;;  %v4477_v38 = vadd.f32 %v873_v40, %v824_v20  ;;  %v1078_v15 = vmul.f32 %v4215_v7, %v7225_v36  ;;  %v874_v0 = vmul.f32 %v4299_v27, %v4143_v25  ;;  %v7227_v26 = vld [vmem:[#allocation39_spill] sm:$0xff]  ;;  %v7229_v37 = vld [vmem:[#allocation24_spill] sm:$0xff]  ;;  %v7230_v54 = vld [vmem:[#allocation14_spill] sm:$0xff] }
 0x1ba   :  { %v767_v29 = vpop.permute.xlu1 %766  ;;  %v769_v3 = vpop.permute.xlu0 %768  ;;  %v875_v23 = vmul.f32 %v4299_v27, %v4145_v35  ;;  %v537_v63 = vadd.f32 %v7226_v22, %v392_v55  ;;  %v538_v47 = vadd.f32 %v7227_v26, %v393_v12  ;;  %v394_v39 = vadd.f32 %v7228_v41, %v225_v52  ;;  %v7231_v7 = vld [vmem:[#allocation72_spill] sm:$0xff] }
 0x1bb   :  { %7222 = vst [vmem:[#allocation15_spill] sm:$0xff] %v4475_v34  ;;  %7223 = vst [vmem:[#allocation16_spill] sm:$0xff] %v4477_v38  ;;  %v825_v40 = vadd.f32 %v767_v29, %v680_v42  ;;  %v826_v50 = vadd.f32 %v769_v3, %v681_v43  ;;  %v395_v20 = vadd.f32 %v7229_v37, %v226_v6  ;;  %v7233_v38 = vld [vmem:[#allocation65_spill] sm:$0xff]  ;;  %v3514_v37 = vld [vmem:[#allocation2 + $0xa8] sm:$0xff] }
 0x1bc   :  { %v228_v61 = vmul.f32 %v4247_v1, %v7230_v54  ;;  %1149 = vrot.lane.b32.xlu1 %v1078_v15, %s3560_s7  ;;  %1248 = vrot.lane.b32.xlu0 %v7231_v7, %s3561_s9  ;;  %v682_v14 = vadd.f32 %v7232_v16, %v537_v63  ;;  %v683_v55 = vadd.f32 %v7233_v38, %v538_v47  ;;  %v7236_v15 = vld [vmem:[#allocation40_spill] sm:$0xff]  ;;  %v7238_v47 = vld [vmem:[#allocation25_spill] sm:$0xff]  ;;  %v7240_v7 = vld [vmem:[#allocation66_spill] sm:$0xff] }
 0x1bd   :  { %v4498_v22 = vadd.f32 %v874_v0, %v825_v40  ;;  %v4500_v42 = vadd.f32 %v875_v23, %v826_v50  ;;  %v1201_v12 = vmul.f32 %v4261_v46, %v4059_v9  ;;  %v1202_v6 = vmul.f32 %v4261_v46, %v4061_v13  ;;  %v7237_v0 = vld [vmem:[#allocation41_spill] sm:$0xff]  ;;  %v7239_v50 = vld [vmem:[#allocation26_spill] sm:$0xff] }
 0x1be   :  { %v771_v43 = vpop.permute.xlu1 %770  ;;  %v773_v52 = vpop.permute.xlu0 %772  ;;  %v876_v29 = vmul.f32 %v4299_v27, %v7182_v33  ;;  %v877_v3 = vmul.f32 %v4299_v27, %v7183_v10  ;;  %v539_v38 = vadd.f32 %v7236_v15, %v394_v39  ;;  %v540_v63 = vadd.f32 %v7237_v0, %v395_v20  ;;  %v7246_v0 = vld [vmem:[#allocation27_spill] sm:$0xff]  ;;  %v4913_v34 = vld [vmem:[#allocation2 + $0xa2] sm:$0xf] }
 0x1bf   :  { %7234 = vst [vmem:[#allocation9_spill] sm:$0xff] %v4498_v22  ;;  %7235 = vst [vmem:[#allocation51_spill] sm:$0xff] %v4500_v42  ;;  %v827_v23 = vadd.f32 %v771_v43, %v682_v14  ;;  %v828_v26 = vadd.f32 %v773_v52, %v683_v55  ;;  %v396_v40 = vadd.f32 %v7238_v47, %v227_v45  ;;  %v7241_v42 = vld [vmem:[#allocation67_spill] sm:$0xff]  ;;  %v3516_v47 = vld [vmem:[#allocation2 + $0xb8] sm:$0xf] }
 0x1c0   :  { %v397_v41 = vadd.f32 %v7239_v50, %v228_v61  ;;  %v229_v54 = vmul.f32 %v3514_v37, %v4247_v1  ;;  %1250 = vrot.lane.b32.xlu1 %v1201_v12, %s3561_s9  ;;  %1252 = vrot.lane.b32.xlu0 %v1202_v6, %s3561_s9  ;;  %v684_v16 = vadd.f32 %v7240_v7, %v539_v38  ;;  %v3515_v14 = vld [vmem:[#allocation2 + $0xb0] sm:$0xff]  ;;  %v7244_v6 = vld [vmem:[#allocation42_spill] sm:$0xff]  ;;  %v7248_v37 = vld [vmem:[#allocation73_spill] sm:$0xff] }
 0x1c1   :  { %v685_v22 = vadd.f32 %v7241_v42, %v540_v63  ;;  %v4519_v39 = vadd.f32 %v876_v29, %v827_v23  ;;  %v4521_v20 = vadd.f32 %v877_v3, %v828_v26  ;;  %v230_v45 = vmul.f32 %v3515_v14, %v4247_v1  ;;  %v7245_v29 = vld [vmem:[#allocation43_spill] sm:$0xff]  ;;  %v7247_v23 = vld [vmem:[#allocation28_spill] sm:$0xff]  ;;  %7295 = vst [vmem:[#allocation25_spill] sm:$0xff] %v4913_v34 }
 0x1c2   :  { %v775_v55 = vpop.permute.xlu1 %774  ;;  %v777_v61 = vpop.permute.xlu0 %776  ;;  %v1204_v43 = vmul.f32 %v4261_v46, %v4075_v53  ;;  %v878_v52 = vmul.f32 %v4299_v27, %v7191_v48  ;;  %v879_v12 = vmul.f32 %v4299_v27, %v7192_v49  ;;  %v541_v42 = vadd.f32 %v7244_v6, %v396_v40  ;;  %v7249_v7 = vld [vmem:[#allocation68_spill] sm:$0xff] }
 0x1c3   :  { %7242 = vst [vmem:[#allocation52_spill] sm:$0xff] %v4519_v39  ;;  %7243 = vst [vmem:[#allocation49_spill] sm:$0xff] %v4521_v20  ;;  %v542_v15 = vadd.f32 %v7245_v29, %v397_v41  ;;  %v829_v3 = vadd.f32 %v775_v55, %v684_v16  ;;  %v830_v38 = vadd.f32 %v777_v61, %v685_v22  ;;  %v7250_v20 = vld [vmem:[#allocation69_spill] sm:$0xff]  ;;  %v7253_v61 = vld [vmem:[#allocation44_spill] sm:$0xff] }
 0x1c4   :  { %v398_v63 = vadd.f32 %v7246_v0, %v229_v54  ;;  %v399_v26 = vadd.f32 %v7247_v23, %v230_v45  ;;  %v231_v50 = vmul.f32 %v3516_v47, %v4247_v1  ;;  %1254 = vrot.lane.b32.xlu1 %v7248_v37, %s3561_s9  ;;  %1256 = vrot.lane.b32.xlu0 %v1204_v43, %s3561_s9  ;;  %v7254_v43 = vld [vmem:[#allocation45_spill] sm:$0xff]  ;;  %v7257_v0 = vld [vmem:[#allocation71_spill] sm:$0xff] }
 0x1c5   :  { %v686_v14 = vadd.f32 %v7249_v7, %v541_v42  ;;  %v687_v40 = vadd.f32 %v7250_v20, %v542_v15  ;;  %v4540_v6 = vadd.f32 %v878_v52, %v829_v3  ;;  %v4542_v41 = vadd.f32 %v879_v12, %v830_v38  ;;  %v7255_v29 = vld [vmem:[#allocation29_spill] sm:$0xff]  ;;  %v7256_v3 = vld [vmem:[#allocation70_spill] sm:$0xff] }
 0x1c6   :  { %v779_v22 = vpop.permute.xlu1 %778  ;;  %v781_v54 = vpop.permute.xlu0 %780  ;;  %v1205_v16 = vmul.f32 %v4261_v46, %v4087_v8  ;;  %v1206_v1 = vmul.f32 %v4261_v46, %v4089_v5  ;;  %v880_v45 = vmul.f32 %v4299_v27, %v7202_v30  ;;  %v881_v55 = vmul.f32 %v4299_v27, %v7203_v60  ;;  %v4883_v39 = vld [vmem:[#allocation2 + $0x7a] sm:$0xff] }
 0x1c7   :  { %7251 = vst [vmem:[#allocation50_spill] sm:$0xff] %v4540_v6  ;;  %7252 = vst [vmem:[#allocation32_spill] sm:$0xff] %v4542_v41  ;;  %v543_v20 = vadd.f32 %v7253_v61, %v398_v63  ;;  %v544_v52 = vadd.f32 %v7254_v43, %v399_v26  ;;  %v831_v12 = vadd.f32 %v779_v22, %v686_v14  ;;  %v4855_v41 = vld [vmem:[#allocation2 + $0x5a] sm:$0xf] }
 0x1c8   :  { %v832_v42 = vadd.f32 %v781_v54, %v687_v40  ;;  %v400_v15 = vadd.f32 %v7255_v29, %v231_v50  ;;  %1258 = vrot.lane.b32.xlu1 %v1205_v16, %s3561_s9  ;;  %1260 = vrot.lane.b32.xlu0 %v1206_v1, %s3561_s9  ;;  %v1207_v26 = vmul.f32 %v4261_v46, %v4101_v62  ;;  %v7260_v40 = vld [vmem:[#allocation46_spill] sm:$0xff] }
 0x1c9   :  { %v688_v38 = vadd.f32 %v7256_v3, %v543_v20  ;;  %v689_v23 = vadd.f32 %v7257_v0, %v544_v52  ;;  %v4559_v47 = vadd.f32 %v880_v45, %v831_v12  ;;  %v1208_v50 = vmul.f32 %v4261_v46, %v4103_v59 }
 0x1ca   :  { %v4561_v37 = vadd.f32 %v881_v55, %v832_v42  ;;  %v783_v7 = vpop.permute.xlu1 %782  ;;  %v785_v63 = vpop.permute.xlu0 %784  ;;  %v882_v14 = vmul.f32 %v4299_v27, %v7213_v17  ;;  %v545_v22 = vadd.f32 %v7260_v40, %v400_v15  ;;  %v883_v1 = vmul.f32 %v4299_v27, %v7214_v21 }
 0x1cb   :  { %7258 = vst [vmem:[#allocation33_spill] sm:$0xff] %v4559_v47  ;;  %v833_v54 = vadd.f32 %v783_v7, %v688_v38  ;;  %v834_v16 = vadd.f32 %v785_v63, %v689_v23  ;;  %v1209_v52 = vmul.f32 %v4261_v46, %v4115_v32  ;;  %v1210_v12 = vmul.f32 %v4261_v46, %v4117_v31  ;;  %v4827_v47 = vld [vmem:[#allocation2 + $0x3a] sm:$0xff] }
 0x1cc   :  { %7259 = vst [vmem:[#allocation17_spill] sm:$0xff] %v4561_v37  ;;  %1262 = vrot.lane.b32.xlu1 %v1207_v26, %s3561_s9  ;;  %1264 = vrot.lane.b32.xlu0 %v1208_v50, %s3561_s9  ;;  %v690_v45 = vadd.f32 %v4314_v44, %v545_v22  ;;  %v884_v29 = vmul.f32 %v4299_v27, %v7225_v36 }
 0x1cd   :  { %v4575_v55 = vadd.f32 %v882_v14, %v833_v54  ;;  %v4577_v61 = vadd.f32 %v883_v1, %v834_v16  ;;  %v1211_v38 = vmul.f32 %v4261_v46, %v4129_v4  ;;  %v1212_v0 = vmul.f32 %v4261_v46, %v4131_v56 }
 0x1ce   :  { %v787_v20 = vpop.permute.xlu1 %786  ;;  %v4579_v43 = vpop.permute.xlu0 %958  ;;  %v1213_v7 = vmul.f32 %v4261_v46, %v4143_v25  ;;  %v1214_v63 = vmul.f32 %v4261_v46, %v4145_v35  ;;  %v1215_v14 = vmul.f32 %v4261_v46, %v7182_v33  ;;  %v1216_v40 = vmul.f32 %v4261_v46, %v7183_v10 }
 0x1cf   :  { %7261 = vst [vmem:[#allocation18_spill] sm:$0xff] %v4575_v55  ;;  %7262 = vst [vmem:[#allocation10_spill] sm:$0xff] %v4577_v61  ;;  %v835_v42 = vadd.f32 %v787_v20, %v690_v45  ;;  %v1217_v16 = vmul.f32 %v4261_v46, %v7191_v48  ;;  %v1218_v1 = vmul.f32 %v4261_v46, %v7192_v49  ;;  %v4813_v55 = vld [vmem:[#allocation2 + $0x2a] sm:$0xf] }
 0x1d0   :  { %1266 = vrot.lane.b32.xlu1 %v1209_v52, %s3561_s9  ;;  %1268 = vrot.lane.b32.xlu0 %v1210_v12, %s3561_s9  ;;  %v1219_v52 = vmul.f32 %v4261_v46, %v7202_v30  ;;  %v1220_v12 = vmul.f32 %v4261_v46, %v7203_v60 }
 0x1d1   :  { %v4589_v44 = vadd.f32 %v884_v29, %v835_v42 }
 0x1d2   :  { %v4591_v15 = vpop.permute.xlu1 %960  ;;  %v4593_v3 = vpop.permute.xlu0 %962 }
 0x1d3   :  { %7263 = vst [vmem:[#allocation55_spill] sm:$0xff] %v4589_v44 }
 0x1d4   :  { %1270 = vrot.lane.b32.xlu1 %v1211_v38, %s3561_s9  ;;  %1272 = vrot.lane.b32.xlu0 %v1212_v0, %s3561_s9  ;;  %v1221_v38 = vmul.f32 %v4261_v46, %v7213_v17  ;;  %v1222_v0 = vmul.f32 %v4261_v46, %v7214_v21 }
 0x1d6   :  { %v4601_v27 = vpop.permute.xlu1 %964  ;;  %v4603_v23 = vpop.permute.xlu0 %966 }
 0x1d8   :  { %1274 = vrot.lane.b32.xlu1 %v1213_v7, %s3561_s9  ;;  %1276 = vrot.lane.b32.xlu0 %v1214_v63, %s3561_s9  ;;  %v4649_v7 = vstv %s3488_s17 }
 0x1da   :  { %v4611_v26 = vpop.permute.xlu1 %968  ;;  %v4613_v50 = vpop.permute.xlu0 %970 }
 0x1dc   :  { %1278 = vrot.lane.b32.xlu1 %v1215_v14, %s3561_s9  ;;  %1280 = vrot.lane.b32.xlu0 %v1216_v40, %s3561_s9  ;;  %v1223_v40 = vmul.f32 %v4261_v46, %v7225_v36 }
 0x1de   :  { %v4621_v22 = vpop.permute.xlu1 %972  ;;  %v4623_v54 = vpop.permute.xlu0 %974 }
 0x1e0   :  { %1282 = vrot.lane.b32.xlu1 %v1217_v16, %s3561_s9  ;;  %1284 = vrot.lane.b32.xlu0 %v1218_v1, %s3561_s9  ;;  %v1345_v16 = vmul.f32 %v4649_v7, %v4045_v24 }
 0x1e2   :  { %v4631_v45 = vpop.permute.xlu1 %976  ;;  %v4633_v20 = vpop.permute.xlu0 %978 }
 0x1e4   :  { %1286 = vrot.lane.b32.xlu1 %v1219_v52, %s3561_s9  ;;  %1288 = vrot.lane.b32.xlu0 %v1220_v12, %s3561_s9  ;;  %v1346_v12 = vmul.f32 %v4649_v7, %v4059_v9 }
 0x1e6   :  { %v4641_v42 = vpop.permute.xlu1 %980  ;;  %v4643_v29 = vpop.permute.xlu0 %982 }
 0x1e7   :  { %7264 = vst [vmem:[#allocation56_spill] sm:$0xff] %v4641_v42  ;;  %7265 = vst [vmem:[#allocation53_spill] sm:$0xff] %v4643_v29  ;;  %v4911_v42 = vld [vmem:[#allocation2 + $0x9a] sm:$0xff] }
 0x1e8   :  { %1290 = vrot.lane.b32.xlu1 %v1221_v38, %s3561_s9  ;;  %1292 = vrot.lane.b32.xlu0 %v1222_v0, %s3561_s9  ;;  %v1347_v38 = vmul.f32 %v4649_v7, %v4061_v13  ;;  %v1348_v0 = vmul.f32 %v4649_v7, %v4073_v51  ;;  %7294 = vst [vmem:[#allocation41_spill] sm:$0xff] %v4911_v42 }
 0x1ea   :  { %v4653_v63 = vpop.permute.xlu1 %984  ;;  %v4655_v14 = vpop.permute.xlu0 %986 }
 0x1eb   :  { %7266 = vst [vmem:[#allocation54_spill] sm:$0xff] %v4653_v63  ;;  %7267 = vst [vmem:[#allocation34_spill] sm:$0xff] %v4655_v14  ;;  %v4897_v63 = vld [vmem:[#allocation2 + $0x8a] sm:$0xf] }
 0x1ec   :  { %1294 = vrot.lane.b32.xlu1 %v1223_v40, %s3561_s9  ;;  %1393 = vrot.lane.b32.xlu0 %v1345_v16, %s3562_s11  ;;  %v1349_v40 = vmul.f32 %v4649_v7, %v4075_v53  ;;  %v1350_v16 = vmul.f32 %v4649_v7, %v4087_v8  ;;  %7292 = vst [vmem:[#allocation65_spill] sm:$0xff] %v4897_v63 }
 0x1ee   :  { %v4663_v1 = vpop.permute.xlu1 %988  ;;  %v4665_v52 = vpop.permute.xlu0 %990 }
 0x1ef   :  { %7268 = vst [vmem:[#allocation35_spill] sm:$0xff] %v4663_v1  ;;  %7269 = vst [vmem:[#allocation19_spill] sm:$0xff] %v4665_v52 }
 0x1f0   :  { %1395 = vrot.lane.b32.xlu1 %v1346_v12, %s3562_s11  ;;  %1397 = vrot.lane.b32.xlu0 %v1347_v38, %s3562_s11  ;;  %v1351_v12 = vmul.f32 %v4649_v7, %v4089_v5  ;;  %v1352_v38 = vmul.f32 %v4649_v7, %v4101_v62 }
 0x1f2   :  { %v4673_v46 = vpop.permute.xlu1 %992  ;;  %v4675_v24 = vpop.permute.xlu0 %994 }
 0x1f3   :  { %7270 = vst [vmem:[#allocation20_spill] sm:$0xff] %v4673_v46  ;;  %7271 = vst [vmem:[#allocation11_spill] sm:$0xff] %v4675_v24  ;;  %v4843_v24 = vld [vmem:[#allocation2 + $0x52] sm:$0xff]  ;;  %v4857_v46 = vld [vmem:[#allocation2 + $0x62] sm:$0xff] }
 0x1f4   :  { %1399 = vrot.lane.b32.xlu1 %v1348_v0, %s3562_s11  ;;  %1401 = vrot.lane.b32.xlu0 %v1349_v40, %s3562_s11  ;;  %v1353_v0 = vmul.f32 %v4649_v7, %v4103_v59  ;;  %v1354_v40 = vmul.f32 %v4649_v7, %v4115_v32 }
 0x1f6   :  { %v4683_v9 = vpop.permute.xlu1 %996  ;;  %v4685_v13 = vpop.permute.xlu0 %998 }
 0x1f7   :  { %7272 = vst [vmem:[#allocation59_spill] sm:$0xff] %v4683_v9  ;;  %7273 = vst [vmem:[#allocation60_spill] sm:$0xff] %v4685_v13  ;;  %v4815_v13 = vld [vmem:[#allocation2 + $0x32] sm:$0xff] }
 0x1f8   :  { %1403 = vrot.lane.b32.xlu1 %v1350_v16, %s3562_s11  ;;  %1405 = vrot.lane.b32.xlu0 %v1351_v12, %s3562_s11  ;;  %v1355_v16 = vmul.f32 %v4649_v7, %v4117_v31  ;;  %v1356_v12 = vmul.f32 %v4649_v7, %v4129_v4 }
 0x1fa   :  { %v4693_v51 = vpop.permute.xlu1 %1000  ;;  %v4695_v53 = vpop.permute.xlu0 %1002 }
 0x1fb   :  { %7274 = vst [vmem:[#allocation57_spill] sm:$0xff] %v4693_v51  ;;  %7275 = vst [vmem:[#allocation58_spill] sm:$0xff] %v4695_v53  ;;  %v4801_v53 = vld [vmem:[#allocation2 + $0x22] sm:$0xff] }
 0x1fc   :  { %1407 = vrot.lane.b32.xlu1 %v1352_v38, %s3562_s11  ;;  %1409 = vrot.lane.b32.xlu0 %v1353_v0, %s3562_s11  ;;  %v1357_v38 = vmul.f32 %v4649_v7, %v4131_v56  ;;  %v1358_v0 = vmul.f32 %v4649_v7, %v4143_v25 }
 0x1fe   :  { %v4703_v8 = vpop.permute.xlu1 %1004  ;;  %v4705_v5 = vpop.permute.xlu0 %1103 }
 0x1ff   :  { %7276 = vst [vmem:[#allocation36_spill] sm:$0xff] %v4703_v8  ;;  %v4785_v8 = vld [vmem:[#allocation2 + $0xa] sm:$0xff] }
 0x200   :  { %1411 = vrot.lane.b32.xlu1 %v1354_v40, %s3562_s11  ;;  %1413 = vrot.lane.b32.xlu0 %v1355_v16, %s3562_s11  ;;  %v1359_v40 = vmul.f32 %v4649_v7, %v4145_v35  ;;  %v1360_v16 = vmul.f32 %v4649_v7, %v7182_v33 }
 0x202   :  { %v4713_v62 = vpop.permute.xlu1 %1105  ;;  %v4715_v59 = vpop.permute.xlu0 %1107 }
 0x204   :  { %1415 = vrot.lane.b32.xlu1 %v1356_v12, %s3562_s11  ;;  %1417 = vrot.lane.b32.xlu0 %v1357_v38, %s3562_s11  ;;  %v1361_v12 = vmul.f32 %v4649_v7, %v7183_v10  ;;  %v1362_v38 = vmul.f32 %v4649_v7, %v7191_v48 }
 0x206   :  { %v4723_v32 = vpop.permute.xlu1 %1109  ;;  %v4725_v31 = vpop.permute.xlu0 %1111 }
 0x208   :  { %1419 = vrot.lane.b32.xlu1 %v1358_v0, %s3562_s11  ;;  %1421 = vrot.lane.b32.xlu0 %v1359_v40, %s3562_s11  ;;  %v1363_v0 = vmul.f32 %v4649_v7, %v7192_v49  ;;  %v1364_v40 = vmul.f32 %v4649_v7, %v7202_v30  ;;  %v4773_v30 = vstv %s3490_s18 }
 0x209   :  { %v1564_v44 = vmul.f32 %v4773_v30, %v4785_v8  ;;  %v1567_v51 = vmul.f32 %v4773_v30, %v4801_v53  ;;  %v1568_v37 = vmul.f32 %v4773_v30, %v4813_v55  ;;  %v1569_v9 = vmul.f32 %v4773_v30, %v4815_v13 }
 0x20a   :  { %v4733_v4 = vpop.permute.xlu1 %1113  ;;  %v4735_v56 = vpop.permute.xlu0 %1115  ;;  %v1575_v6 = vmul.f32 %v4773_v30, %v4857_v46 }
 0x20c   :  { %1423 = vrot.lane.b32.xlu1 %v1360_v16, %s3562_s11  ;;  %1425 = vrot.lane.b32.xlu0 %v1361_v12, %s3562_s11  ;;  %v1365_v16 = vmul.f32 %v4649_v7, %v7203_v60  ;;  %v1366_v12 = vmul.f32 %v4649_v7, %v7213_v17 }
 0x20e   :  { %v4743_v25 = vpop.permute.xlu1 %1117  ;;  %v4745_v35 = vpop.permute.xlu0 %1119 }
 0x210   :  { %1427 = vrot.lane.b32.xlu1 %v1362_v38, %s3562_s11  ;;  %1429 = vrot.lane.b32.xlu0 %v1363_v0, %s3562_s11  ;;  %v1367_v38 = vmul.f32 %v4649_v7, %v7214_v21  ;;  %v4771_v0 = vld [vmem:[#allocation2 + $0x2] sm:$0xff]  ;;  %v4787_v21 = vld [vmem:[#allocation2 + $0x12] sm:$0xf] }
 0x211   :  { %v1563_v17 = vmul.f32 %v4773_v30, %v4771_v0 }
 0x212   :  { %v4753_v33 = vpop.permute.xlu1 %1121  ;;  %v4755_v10 = vpop.permute.xlu0 %1123 }
 0x213   :  { %7277 = vst [vmem:[#allocation37_spill] sm:$0xff] %v4753_v33  ;;  %7278 = vst [vmem:[#allocation21_spill] sm:$0xff] %v4755_v10  ;;  %v1582_v10 = vmul.f32 %v4773_v30, %v4911_v42  ;;  %v1583_v33 = vmul.f32 %v4773_v30, %v4913_v34  ;;  %v4941_v34 = vstv %s3491_s19 }
 0x214   :  { %1431 = vrot.lane.b32.xlu1 %v1364_v40, %s3562_s11  ;;  %1433 = vrot.lane.b32.xlu0 %v1365_v16, %s3562_s11  ;;  %v1368_v16 = vmul.f32 %v4649_v7, %v7225_v36  ;;  %v1565_v36 = vmul.f32 %v4773_v30, %v4787_v21  ;;  %v4799_v7 = vld [vmem:[#allocation2 + $0x1a] sm:$0xff] }
 0x215   :  { %v1566_v61 = vmul.f32 %v4773_v30, %v4799_v7 }
 0x216   :  { %v4763_v48 = vpop.permute.xlu1 %1125  ;;  %v4765_v49 = vpop.permute.xlu0 %1127 }
 0x217   :  { %7279 = vst [vmem:[#allocation22_spill] sm:$0xff] %v4763_v48  ;;  %7280 = vst [vmem:[#allocation12_spill] sm:$0xff] %v4765_v49  ;;  %v4899_v49 = vld [vmem:[#allocation2 + $0x92] sm:$0xff]  ;;  %v1580_v48 = vmul.f32 %v4773_v30, %v4897_v63 }
 0x218   :  { %1435 = vrot.lane.b32.xlu1 %v1366_v12, %s3562_s11  ;;  %1437 = vrot.lane.b32.xlu0 %v1367_v38, %s3562_s11  ;;  %7293 = vst [vmem:[#allocation40_spill] sm:$0xff] %v4899_v49  ;;  %v1581_v29 = vmul.f32 %v4773_v30, %v4899_v49  ;;  %v4925_v49 = vld [vmem:[#allocation2 + $0xaa] sm:$0xff]  ;;  %v4927_v63 = vld [vmem:[#allocation2 + $0xb2] sm:$0xff] }
 0x219   :  { %7298 = vst [vmem:[#allocation67_spill] sm:$0xff] %v4925_v49  ;;  %7299 = vst [vmem:[#allocation42_spill] sm:$0xff] %v4927_v63  ;;  %v1585_v42 = vmul.f32 %v4773_v30, %v4927_v63 }
 0x21a   :  { %v4777_v60 = vpop.permute.xlu1 %1129  ;;  %v4779_v40 = vpop.permute.xlu0 %1131 }
 0x21b   :  { %7281 = vst [vmem:[#allocation62_spill] sm:$0xff] %v4777_v60  ;;  %7282 = vst [vmem:[#allocation63_spill] sm:$0xff] %v4779_v40  ;;  %v4885_v40 = vld [vmem:[#allocation2 + $0x82] sm:$0xff]  ;;  %v1578_v60 = vmul.f32 %v4773_v30, %v4883_v39 }
 0x21c   :  { %1439 = vrot.lane.b32.xlu1 %v1368_v16, %s3562_s11  ;;  %1611 = vrot.lane.b32.xlu0 %v1563_v17, %s3559_s5  ;;  %v1579_v14 = vmul.f32 %v4773_v30, %v4885_v40 }
 0x21e   :  { %v4791_v12 = vpop.permute.xlu1 %1133  ;;  %v4793_v38 = vpop.permute.xlu0 %1135 }
 0x21f   :  { %7283 = vst [vmem:[#allocation13_spill] sm:$0xff] %v4791_v12  ;;  %7284 = vst [vmem:[#allocation61_spill] sm:$0xff] %v4793_v38  ;;  %v4869_v38 = vld [vmem:[#allocation2 + $0x6a] sm:$0xff]  ;;  %v4871_v12 = vld [vmem:[#allocation2 + $0x72] sm:$0xf] }
 0x220   :  { %1613 = vrot.lane.b32.xlu1 %v1564_v44, %s3559_s5  ;;  %1615 = vrot.lane.b32.xlu0 %v1565_v36, %s3559_s5  ;;  %v1576_v52 = vmul.f32 %v4773_v30, %v4869_v38  ;;  %v1577_v1 = vmul.f32 %v4773_v30, %v4871_v12 }
 0x222   :  { %v4805_v16 = vpop.permute.xlu1 %1137  ;;  %v4807_v17 = vpop.permute.xlu0 %1139 }
 0x223   :  { %7285 = vst [vmem:[#allocation38_spill] sm:$0xff] %v4805_v16  ;;  %7286 = vst [vmem:[#allocation39_spill] sm:$0xff] %v4807_v17  ;;  %v4829_v17 = vld [vmem:[#allocation2 + $0x42] sm:$0xf]  ;;  %v4841_v16 = vld [vmem:[#allocation2 + $0x4a] sm:$0xff] }
 0x224   :  { %1617 = vrot.lane.b32.xlu1 %v1566_v61, %s3559_s5  ;;  %1619 = vrot.lane.b32.xlu0 %v1567_v51, %s3559_s5 }
 0x226   :  { %v4819_v44 = vpop.permute.xlu1 %1141  ;;  %v4821_v36 = vpop.permute.xlu0 %1143 }
 0x227   :  { %7287 = vst [vmem:[#allocation23_spill] sm:$0xff] %v4819_v44  ;;  %7288 = vst [vmem:[#allocation24_spill] sm:$0xff] %v4821_v36  ;;  %v1570_v36 = vmul.f32 %v4773_v30, %v4827_v47  ;;  %v1571_v44 = vmul.f32 %v4773_v30, %v4829_v17 }
 0x228   :  { %1621 = vrot.lane.b32.xlu1 %v1568_v37, %s3559_s5  ;;  %1623 = vrot.lane.b32.xlu0 %v1569_v9, %s3559_s5 }
 0x22a   :  { %v4833_v61 = vpop.permute.xlu1 %1145  ;;  %v4835_v51 = vpop.permute.xlu0 %1147 }
 0x22b   :  { %7289 = vst [vmem:[#allocation14_spill] sm:$0xff] %v4833_v61  ;;  %7290 = vst [vmem:[#allocation72_spill] sm:$0xff] %v4835_v51  ;;  %v1572_v51 = vmul.f32 %v4773_v30, %v4841_v16  ;;  %v1573_v61 = vmul.f32 %v4773_v30, %v4843_v24 }
 0x22c   :  { %1625 = vrot.lane.b32.xlu1 %v1570_v36, %s3559_s5  ;;  %1627 = vrot.lane.b32.xlu0 %v1571_v44, %s3559_s5 }
 0x22e   :  { %v4847_v37 = vpop.permute.xlu1 %1149  ;;  %v4849_v9 = vpop.permute.xlu0 %1248 }
 0x22f   :  { %7291 = vst [vmem:[#allocation64_spill] sm:$0xff] %v4847_v37  ;;  %v1574_v37 = vmul.f32 %v4773_v30, %v4855_v41 }
 0x230   :  { %1629 = vrot.lane.b32.xlu1 %v1572_v51, %s3559_s5  ;;  %1631 = vrot.lane.b32.xlu0 %v1573_v61, %s3559_s5 }
 0x232   :  { %v4861_v36 = vpop.permute.xlu1 %1250  ;;  %v4863_v44 = vpop.permute.xlu0 %1252 }
 0x234   :  { %1633 = vrot.lane.b32.xlu1 %v1574_v37, %s3559_s5  ;;  %1635 = vrot.lane.b32.xlu0 %v1575_v6, %s3559_s5 }
 0x236   :  { %v4875_v51 = vpop.permute.xlu1 %1254  ;;  %v4877_v61 = vpop.permute.xlu0 %1256 }
 0x238   :  { %1637 = vrot.lane.b32.xlu1 %v1576_v52, %s3559_s5  ;;  %1639 = vrot.lane.b32.xlu0 %v1577_v1, %s3559_s5 }
 0x23a   :  { %v4889_v37 = vpop.permute.xlu1 %1258  ;;  %v4891_v6 = vpop.permute.xlu0 %1260 }
 0x23c   :  { %1641 = vrot.lane.b32.xlu1 %v1578_v60, %s3559_s5  ;;  %1643 = vrot.lane.b32.xlu0 %v1579_v14, %s3559_s5 }
 0x23e   :  { %v4903_v52 = vpop.permute.xlu1 %1262  ;;  %v4905_v1 = vpop.permute.xlu0 %1264 }
 0x240   :  { %1645 = vrot.lane.b32.xlu1 %v1580_v48, %s3559_s5  ;;  %1647 = vrot.lane.b32.xlu0 %v1581_v29, %s3559_s5 }
 0x242   :  { %v4917_v14 = vpop.permute.xlu1 %1266  ;;  %v4919_v60 = vpop.permute.xlu0 %1268 }
 0x243   :  { %7296 = vst [vmem:[#allocation26_spill] sm:$0xff] %v4917_v14  ;;  %7297 = vst [vmem:[#allocation66_spill] sm:$0xff] %v4919_v60  ;;  %v1584_v60 = vmul.f32 %v4773_v30, %v4925_v49  ;;  %v4939_v14 = vld [vmem:[#allocation2 + $0xba] sm:$0xf]  ;;  %v1708_v49 = vmul.f32 %v4941_v34, %v4771_v0 }
 0x244   :  { %1649 = vrot.lane.b32.xlu1 %v1582_v10, %s3559_s5  ;;  %1651 = vrot.lane.b32.xlu0 %v1583_v33, %s3559_s5  ;;  %7302 = vst [vmem:[#allocation28_spill] sm:$0xff] %v4939_v14 }
 0x246   :  { %v4931_v48 = vpop.permute.xlu1 %1270  ;;  %v4933_v29 = vpop.permute.xlu0 %1272 }
 0x247   :  { %7300 = vst [vmem:[#allocation43_spill] sm:$0xff] %v4931_v48  ;;  %7301 = vst [vmem:[#allocation27_spill] sm:$0xff] %v4933_v29  ;;  %v1586_v29 = vmul.f32 %v4773_v30, %v4939_v14 }
 0x248   :  { %1653 = vrot.lane.b32.xlu1 %v1584_v60, %s3559_s5  ;;  %1655 = vrot.lane.b32.xlu0 %v1585_v42, %s3559_s5  ;;  %v1709_v42 = vmul.f32 %v4941_v34, %v4785_v8  ;;  %v1710_v60 = vmul.f32 %v4941_v34, %v4787_v21 }
 0x24a   :  { %v4945_v10 = vpop.permute.xlu1 %1274  ;;  %v4947_v33 = vpop.permute.xlu0 %1276 }
 0x24b   :  { %7303 = vst [vmem:[#allocation73_spill] sm:$0xff] %v4947_v33 }
 0x24c   :  { %1657 = vrot.lane.b32.xlu1 %v1586_v29, %s3559_s5  ;;  %1756 = vrot.lane.b32.xlu0 %v1708_v49, %s3560_s7  ;;  %v1711_v49 = vmul.f32 %v4941_v34, %v4799_v7  ;;  %v1712_v29 = vmul.f32 %v4941_v34, %v4801_v53 }
 0x24e   :  { %v4955_v63 = vpop.permute.xlu1 %1278  ;;  %v4957_v48 = vpop.permute.xlu0 %1280 }
 0x24f   :  { %7304 = vst [vmem:[#allocation68_spill] sm:$0xff] %v4955_v63  ;;  %7305 = vst [vmem:[#allocation69_spill] sm:$0xff] %v4957_v48 }
 0x250   :  { %1758 = vrot.lane.b32.xlu1 %v1709_v42, %s3560_s7  ;;  %1760 = vrot.lane.b32.xlu0 %v1710_v60, %s3560_s7  ;;  %v1713_v60 = vmul.f32 %v4941_v34, %v4813_v55 }
 0x252   :  { %v4965_v30 = vpop.permute.xlu1 %1282  ;;  %v4967_v14 = vpop.permute.xlu0 %1284 }
 0x253   :  { %7306 = vst [vmem:[#allocation44_spill] sm:$0xff] %v4965_v30  ;;  %7307 = vst [vmem:[#allocation45_spill] sm:$0xff] %v4967_v14  ;;  %v1714_v14 = vmul.f32 %v4941_v34, %v4815_v13 }
 0x254   :  { %1762 = vrot.lane.b32.xlu1 %v1711_v49, %s3560_s7  ;;  %1764 = vrot.lane.b32.xlu0 %v1712_v29, %s3560_s7  ;;  %v1030_v49 = vadd.f32 %v4579_v43, %v4338_v28  ;;  %v1031_v28 = vadd.f32 %v4591_v15, %v4360_v11  ;;  %v1032_v43 = vadd.f32 %v4593_v3, %v4362_v2 }
 0x255   :  { %v1033_v2 = vadd.f32 %v4601_v27, %v4382_v18  ;;  %v1034_v15 = vadd.f32 %v4603_v23, %v4384_v19  ;;  %v1720_v18 = vmul.f32 %v4941_v34, %v4857_v46 }
 0x256   :  { %v4975_v48 = vpop.permute.xlu1 %1286  ;;  %v4977_v42 = vpop.permute.xlu0 %1288  ;;  %v1175_v63 = vadd.f32 %v4705_v5, %v1030_v49  ;;  %v1717_v5 = vmul.f32 %v4941_v34, %v4841_v16  ;;  %v1177_v49 = vadd.f32 %v4715_v59, %v1032_v43  ;;  %v1036_v43 = vadd.f32 %v4613_v50, %v4408_v58 }
 0x257   :  { %7308 = vst [vmem:[#allocation29_spill] sm:$0xff] %v4975_v48  ;;  %7309 = vst [vmem:[#allocation70_spill] sm:$0xff] %v4977_v42  ;;  %v1715_v42 = vmul.f32 %v4941_v34, %v4827_v47  ;;  %v1716_v48 = vmul.f32 %v4941_v34, %v4829_v17  ;;  %v1178_v23 = vadd.f32 %v4723_v32, %v1033_v2  ;;  %v7312_v2 = vld [vmem:[#allocation47_spill] sm:$0xff] }
 0x258   :  { %1766 = vrot.lane.b32.xlu1 %v1713_v60, %s3560_s7  ;;  %1768 = vrot.lane.b32.xlu0 %v1714_v14, %s3560_s7  ;;  %v4998_v14 = vstv %s3489_s20  ;;  %v1320_v60 = vadd.f32 %v4849_v9, %v1175_v63  ;;  %v1322_v63 = vadd.f32 %v4863_v44, %v1177_v49  ;;  %v1722_v58 = vmul.f32 %v4941_v34, %v4871_v12 }
 0x259   :  { %v1514_v11 = vmul.f32 %v4998_v14, %v4771_v0  ;;  %v1515_v27 = vmul.f32 %v4998_v14, %v4785_v8  ;;  %v1516_v19 = vmul.f32 %v4998_v14, %v4787_v21  ;;  %v1518_v50 = vmul.f32 %v4998_v14, %v4801_v53 }
 0x25a   :  { %v4987_v30 = vpop.permute.xlu1 %1290  ;;  %v4989_v29 = vpop.permute.xlu0 %1292 }
 0x25b   :  { %7310 = vst [vmem:[#allocation71_spill] sm:$0xff] %v4987_v30  ;;  %7311 = vst [vmem:[#allocation46_spill] sm:$0xff] %v4989_v29 }
 0x25c   :  { %1770 = vrot.lane.b32.xlu1 %v1715_v42, %s3560_s7  ;;  %1772 = vrot.lane.b32.xlu0 %v1716_v48, %s3560_s7  ;;  %v1718_v42 = vmul.f32 %v4941_v34, %v4843_v24  ;;  %v1176_v48 = vadd.f32 %v4713_v62, %v1031_v28  ;;  %v1035_v28 = vadd.f32 %v4611_v26, %v4406_v57 }
 0x25d   :  { %v1721_v57 = vmul.f32 %v4941_v34, %v4869_v38  ;;  %v1517_v26 = vmul.f32 %v4998_v14, %v4799_v7 }
 0x25e   :  { %v5005_v29 = vpop.permute.xlu1 %1294  ;;  %v1394_v30 = vpop.permute.xlu0 %1393  ;;  %v1321_v3 = vadd.f32 %v4861_v36, %v1176_v48  ;;  %v1179_v36 = vadd.f32 %v4725_v31, %v1034_v15  ;;  %v1037_v15 = vadd.f32 %v4621_v22, %v7312_v2  ;;  %v1723_v22 = vmul.f32 %v4941_v34, %v4883_v39  ;;  %v7320_v2 = vld [vmem:[#allocation15_spill] sm:$0xff] }
 0x25f   :  { %v1465_v33 = vadd.f32 %v1394_v30, %v1320_v60  ;;  %v1719_v30 = vmul.f32 %v4941_v34, %v4855_v41  ;;  %v1323_v60 = vadd.f32 %v4875_v51, %v1178_v23  ;;  %v1180_v51 = vadd.f32 %v4733_v4, %v1035_v28  ;;  %v7315_v28 = vld [vmem:[#allocation31_spill] sm:$0xff] }
 0x260   :  { %1774 = vrot.lane.b32.xlu1 %v1717_v5, %s3560_s7  ;;  %1776 = vrot.lane.b32.xlu0 %v1718_v42, %s3560_s7  ;;  %v1324_v5 = vadd.f32 %v4877_v61, %v1179_v36  ;;  %v1181_v61 = vadd.f32 %v4735_v56, %v1036_v43  ;;  %v1040_v43 = vadd.f32 %v4633_v20, %v7315_v28  ;;  %v7317_v20 = vld [vmem:[#allocation40_spill] sm:$0xff] }
 0x261   :  { %v5023_v62 = vadd.f32 %v1514_v11, %v1465_v33  ;;  %v1523_v28 = vmul.f32 %v4998_v14, %v4841_v16 }
 0x262   :  { %v1396_v59 = vpop.permute.xlu1 %1395  ;;  %v1398_v9 = vpop.permute.xlu0 %1397 }
 0x263   :  { %v1466_v44 = vadd.f32 %v1396_v59, %v1321_v3  ;;  %v1467_v33 = vadd.f32 %v1398_v9, %v1322_v63  ;;  %v7313_v3 = vld [vmem:[#allocation48_spill] sm:$0xff]  ;;  %v1325_v59 = vadd.f32 %v4889_v37, %v1180_v51  ;;  %v1326_v9 = vadd.f32 %v4891_v6, %v1181_v61  ;;  %v7319_v51 = vld [vmem:[#allocation21_spill] sm:$0xff] }
 0x264   :  { %1778 = vrot.lane.b32.xlu1 %v1719_v30, %s3560_s7  ;;  %1780 = vrot.lane.b32.xlu0 %v1720_v18, %s3560_s7  ;;  %v1038_v63 = vadd.f32 %v4623_v54, %v7313_v3  ;;  %v1724_v54 = vmul.f32 %v4941_v34, %v4885_v40  ;;  %v1520_v37 = vmul.f32 %v4998_v14, %v4815_v13 }
 0x265   :  { %v5043_v42 = vadd.f32 %v1515_v27, %v1466_v44  ;;  %v5045_v32 = vadd.f32 %v1516_v19, %v1467_v33  ;;  %v1519_v27 = vmul.f32 %v4998_v14, %v4813_v55  ;;  %v1182_v6 = vadd.f32 %v4743_v25, %v1037_v15  ;;  %v7314_v44 = vld [vmem:[#allocation30_spill] sm:$0xff]  ;;  %v7321_v15 = vld [vmem:[#allocation56_spill] sm:$0xff] }
 0x266   :  { %v1400_v31 = vpop.permute.xlu1 %1399  ;;  %v1402_v48 = vpop.permute.xlu0 %1401  ;;  %v1183_v19 = vadd.f32 %v4745_v35, %v1038_v63  ;;  %v1039_v33 = vadd.f32 %v4631_v45, %v7314_v44  ;;  %v7316_v45 = vld [vmem:[#allocation65_spill] sm:$0xff]  ;;  %v1185_v61 = vadd.f32 %v7319_v51, %v1040_v43  ;;  %v1041_v3 = vadd.f32 %v7321_v15, %v7320_v2  ;;  %v7322_v63 = vld [vmem:[#allocation16_spill] sm:$0xff]  ;;  %v7333_v51 = vld [vmem:[#allocation34_spill] sm:$0xff] }
 0x267   :  { %v1468_v49 = vadd.f32 %v1400_v31, %v1323_v60  ;;  %v1469_v11 = vadd.f32 %v1402_v48, %v1324_v5  ;;  %v1327_v60 = vadd.f32 %v4903_v52, %v1182_v6  ;;  %v1522_v52 = vmul.f32 %v4998_v14, %v4829_v17  ;;  %v7327_v44 = vld [vmem:[#allocation25_spill] sm:$0xff]  ;;  %v7335_v15 = vld [vmem:[#allocation27_spill] sm:$0xff] }
 0x268   :  { %1782 = vrot.lane.b32.xlu1 %v1721_v57, %s3560_s7  ;;  %1784 = vrot.lane.b32.xlu0 %v1722_v58, %s3560_s7  ;;  %v1328_v25 = vadd.f32 %v4905_v1, %v1183_v19  ;;  %v1725_v57 = vmul.f32 %v4941_v34, %v7316_v45  ;;  %v1726_v58 = vmul.f32 %v4941_v34, %v7317_v20 }
 0x269   :  { %v5065_v30 = vadd.f32 %v1517_v26, %v1468_v49  ;;  %v5067_v4 = vadd.f32 %v1518_v50, %v1469_v11  ;;  %v1521_v26 = vmul.f32 %v4998_v14, %v4827_v47  ;;  %v7318_v50 = vld [vmem:[#allocation37_spill] sm:$0xff]  ;;  %v1524_v43 = vmul.f32 %v4998_v14, %v4843_v24 }
 0x26a   :  { %v1404_v56 = vpop.permute.xlu1 %1403  ;;  %v1406_v18 = vpop.permute.xlu0 %1405  ;;  %v1184_v1 = vadd.f32 %v7318_v50, %v1039_v33  ;;  %v1728_v33 = vmul.f32 %v4941_v34, %v7327_v44 }
 0x26b   :  { %v1470_v23 = vadd.f32 %v1404_v56, %v1325_v59  ;;  %v1471_v36 = vadd.f32 %v1406_v18, %v1326_v9  ;;  %v7323_v59 = vld [vmem:[#allocation53_spill] sm:$0xff]  ;;  %v7324_v56 = vld [vmem:[#allocation26_spill] sm:$0xff] }
 0x26c   :  { %1786 = vrot.lane.b32.xlu1 %v1723_v22, %s3560_s7  ;;  %1788 = vrot.lane.b32.xlu0 %v1724_v54, %s3560_s7  ;;  %v1042_v9 = vadd.f32 %v7323_v59, %v7322_v63  ;;  %v1329_v18 = vadd.f32 %v7324_v56, %v1184_v1  ;;  %v7325_v22 = vld [vmem:[#allocation66_spill] sm:$0xff]  ;;  %v7332_v1 = vld [vmem:[#allocation51_spill] sm:$0xff] }
 0x26d   :  { %v5089_v5 = vadd.f32 %v1519_v27, %v1470_v23  ;;  %v5091_v35 = vadd.f32 %v1520_v37, %v1471_v36  ;;  %v1330_v54 = vadd.f32 %v7325_v22, %v1185_v61  ;;  %v7326_v23 = vld [vmem:[#allocation41_spill] sm:$0xff]  ;;  %v1044_v61 = vadd.f32 %v7333_v51, %v7332_v1 }
 0x26e   :  { %v1408_v31 = vpop.permute.xlu1 %1407  ;;  %v1410_v48 = vpop.permute.xlu0 %1409  ;;  %v1727_v36 = vmul.f32 %v4941_v34, %v7326_v23 }
 0x26f   :  { %v1472_v49 = vadd.f32 %v1408_v31, %v1327_v60  ;;  %v1473_v11 = vadd.f32 %v1410_v48, %v1328_v25  ;;  %v7328_v60 = vld [vmem:[#allocation22_spill] sm:$0xff]  ;;  %v7329_v31 = vld [vmem:[#allocation12_spill] sm:$0xff] }
 0x270   :  { %1790 = vrot.lane.b32.xlu1 %v1725_v57, %s3560_s7  ;;  %1792 = vrot.lane.b32.xlu0 %v1726_v58, %s3560_s7  ;;  %v1186_v25 = vadd.f32 %v7328_v60, %v1041_v3  ;;  %v1187_v48 = vadd.f32 %v7329_v31, %v1042_v9 }
 0x271   :  { %v5111_v27 = vadd.f32 %v1521_v26, %v1472_v49  ;;  %v5113_v37 = vadd.f32 %v1522_v52, %v1473_v11  ;;  %v7330_v26 = vld [vmem:[#allocation9_spill] sm:$0xff]  ;;  %v7331_v52 = vld [vmem:[#allocation54_spill] sm:$0xff]  ;;  %v5132_v49 = vstv %s5085_s21  ;;  %v7334_v11 = vld [vmem:[#allocation43_spill] sm:$0xff] }
 0x272   :  { %v1412_v6 = vpop.permute.xlu1 %1411  ;;  %v1414_v19 = vpop.permute.xlu0 %1413  ;;  %v1043_v50 = vadd.f32 %v7331_v52, %v7330_v26  ;;  %v1331_v2 = vadd.f32 %v7334_v11, %v1186_v25  ;;  %v1332_v3 = vadd.f32 %v7335_v15, %v1187_v48  ;;  %v7341_v48 = vld [vmem:[#allocation52_spill] sm:$0xff]  ;;  %v7343_v26 = vld [vmem:[#allocation49_spill] sm:$0xff]  ;;  %v7344_v52 = vld [vmem:[#allocation19_spill] sm:$0xff] }
 0x273   :  { %v1474_v57 = vadd.f32 %v1412_v6, %v1329_v18  ;;  %v1475_v58 = vadd.f32 %v1414_v19, %v1330_v54  ;;  %v7337_v18 = vld [vmem:[#allocation67_spill] sm:$0xff]  ;;  %v7338_v54 = vld [vmem:[#allocation42_spill] sm:$0xff]  ;;  %v1525_v19 = vmul.f32 %v4998_v14, %v4855_v41  ;;  %v1046_v1 = vadd.f32 %v7344_v52, %v7343_v26  ;;  %v7345_v11 = vld [vmem:[#allocation73_spill] sm:$0xff] }
 0x274   :  { %1794 = vrot.lane.b32.xlu1 %v1727_v36, %s3560_s7  ;;  %1796 = vrot.lane.b32.xlu0 %v1728_v33, %s3560_s7  ;;  %v1729_v22 = vmul.f32 %v4941_v34, %v7337_v18  ;;  %v1730_v6 = vmul.f32 %v4941_v34, %v7338_v54  ;;  %v1526_v36 = vmul.f32 %v4998_v14, %v4857_v46  ;;  %v7339_v33 = vld [vmem:[#allocation62_spill] sm:$0xff]  ;;  %v7355_v26 = vld [vmem:[#allocation68_spill] sm:$0xff] }
 0x275   :  { %v5136_v63 = vadd.f32 %v1523_v28, %v1474_v57  ;;  %v5138_v59 = vadd.f32 %v1524_v43, %v1475_v58  ;;  %v1188_v60 = vadd.f32 %v7339_v33, %v1043_v50  ;;  %v7340_v28 = vld [vmem:[#allocation63_spill] sm:$0xff] }
 0x276   :  { %v1416_v9 = vpop.permute.xlu1 %1415  ;;  %v1418_v56 = vpop.permute.xlu0 %1417  ;;  %v1189_v25 = vadd.f32 %v7340_v28, %v1044_v61  ;;  %v7342_v57 = vld [vmem:[#allocation35_spill] sm:$0xff] }
 0x277   :  { %7336 = vst [vmem:[#allocation47_spill] sm:$0xff] %v5138_v59  ;;  %v1476_v43 = vadd.f32 %v1416_v9, %v1331_v2  ;;  %v1477_v31 = vadd.f32 %v1418_v56, %v1332_v3  ;;  %v1045_v58 = vadd.f32 %v7342_v57, %v7341_v48  ;;  %v1333_v51 = vadd.f32 %v4945_v10, %v1188_v60  ;;  %v7348_v3 = vld [vmem:[#allocation28_spill] sm:$0xff] }
 0x278   :  { %1798 = vrot.lane.b32.xlu1 %v1729_v22, %s3560_s7  ;;  %1800 = vrot.lane.b32.xlu0 %v1730_v6, %s3560_s7  ;;  %v1334_v15 = vadd.f32 %v7345_v11, %v1189_v25  ;;  %v1731_v9 = vmul.f32 %v4941_v34, %v7348_v3  ;;  %v1853_v56 = vmul.f32 %v5132_v49, %v4771_v0  ;;  %v7349_v6 = vld [vmem:[#allocation13_spill] sm:$0xff]  ;;  %v7351_v25 = vld [vmem:[#allocation50_spill] sm:$0xff]  ;;  %v7353_v48 = vld [vmem:[#allocation32_spill] sm:$0xff] }
 0x279   :  { %v5158_v59 = vadd.f32 %v1525_v19, %v1476_v43  ;;  %v5160_v50 = vadd.f32 %v1526_v36, %v1477_v31  ;;  %v1527_v22 = vmul.f32 %v4998_v14, %v4869_v38  ;;  %v1528_v10 = vmul.f32 %v4998_v14, %v4871_v12  ;;  %v7350_v19 = vld [vmem:[#allocation61_spill] sm:$0xff]  ;;  %v7352_v43 = vld [vmem:[#allocation20_spill] sm:$0xff]  ;;  %v7354_v34 = vld [vmem:[#allocation11_spill] sm:$0xff] }
 0x27a   :  { %v1420_v61 = vpop.permute.xlu1 %1419  ;;  %v1422_v2 = vpop.permute.xlu0 %1421  ;;  %v1190_v33 = vadd.f32 %v7349_v6, %v1045_v58  ;;  %v1191_v60 = vadd.f32 %v7350_v19, %v1046_v1  ;;  %v1047_v31 = vadd.f32 %v7352_v43, %v7351_v25  ;;  %v1048_v57 = vadd.f32 %v7354_v34, %v7353_v48  ;;  %v7356_v11 = vld [vmem:[#allocation69_spill] sm:$0xff]  ;;  %v7364_v43 = vld [vmem:[#allocation60_spill] sm:$0xff] }
 0x27b   :  { %7346 = vst [vmem:[#allocation48_spill] sm:$0xff] %v5158_v59  ;;  %7347 = vst [vmem:[#allocation30_spill] sm:$0xff] %v5160_v50  ;;  %v1478_v36 = vadd.f32 %v1420_v61, %v1333_v51  ;;  %v1479_v28 = vadd.f32 %v1422_v2, %v1334_v15  ;;  %v1854_v15 = vmul.f32 %v5132_v49, %v4785_v8  ;;  %v7363_v25 = vld [vmem:[#allocation17_spill] sm:$0xff]  ;;  %v7365_v34 = vld [vmem:[#allocation44_spill] sm:$0xff] }
 0x27c   :  { %1802 = vrot.lane.b32.xlu1 %v1731_v9, %s3560_s7  ;;  %1901 = vrot.lane.b32.xlu0 %v1853_v56, %s3561_s9  ;;  %v1335_v52 = vadd.f32 %v7355_v26, %v1190_v33  ;;  %v1336_v50 = vadd.f32 %v7356_v11, %v1191_v60  ;;  %v1855_v61 = vmul.f32 %v5132_v49, %v4787_v21  ;;  %v7359_v56 = vld [vmem:[#allocation38_spill] sm:$0xff]  ;;  %v7361_v60 = vld [vmem:[#allocation33_spill] sm:$0xff] }
 0x27d   :  { %v5180_v59 = vadd.f32 %v1527_v22, %v1478_v36  ;;  %v5182_v58 = vadd.f32 %v1528_v10, %v1479_v28  ;;  %v1529_v2 = vmul.f32 %v4998_v14, %v4883_v39  ;;  %v1530_v9 = vmul.f32 %v4998_v14, %v4885_v40  ;;  %v7360_v22 = vld [vmem:[#allocation39_spill] sm:$0xff]  ;;  %v7366_v11 = vld [vmem:[#allocation45_spill] sm:$0xff] }
 0x27e   :  { %v1424_v1 = vpop.permute.xlu1 %1423  ;;  %v1426_v51 = vpop.permute.xlu0 %1425  ;;  %v1192_v6 = vadd.f32 %v7359_v56, %v1047_v31  ;;  %v1193_v33 = vadd.f32 %v7360_v22, %v1048_v57  ;;  %v7362_v36 = vld [vmem:[#allocation59_spill] sm:$0xff]  ;;  %v1050_v48 = vadd.f32 %v7364_v43, %v7363_v25  ;;  %v7375_v43 = vld [vmem:[#allocation29_spill] sm:$0xff] }
 0x27f   :  { %7357 = vst [vmem:[#allocation31_spill] sm:$0xff] %v5180_v59  ;;  %7358 = vst [vmem:[#allocation65_spill] sm:$0xff] %v5182_v58  ;;  %v1480_v10 = vadd.f32 %v1424_v1, %v1335_v52  ;;  %v1481_v19 = vadd.f32 %v1426_v51, %v1336_v50  ;;  %v1049_v28 = vadd.f32 %v7362_v36, %v7361_v60  ;;  %v7373_v60 = vld [vmem:[#allocation10_spill] sm:$0xff] }
 0x280   :  { %1903 = vrot.lane.b32.xlu1 %v1854_v15, %s3561_s9  ;;  %1905 = vrot.lane.b32.xlu0 %v1855_v61, %s3561_s9  ;;  %v1337_v26 = vadd.f32 %v7365_v34, %v1192_v6  ;;  %v1338_v58 = vadd.f32 %v7366_v11, %v1193_v33  ;;  %v1856_v52 = vmul.f32 %v5132_v49, %v4799_v7  ;;  %v7369_v61 = vld [vmem:[#allocation23_spill] sm:$0xff]  ;;  %v7371_v33 = vld [vmem:[#allocation18_spill] sm:$0xff] }
 0x281   :  { %v5202_v59 = vadd.f32 %v1529_v2, %v1480_v10  ;;  %v5204_v31 = vadd.f32 %v1530_v9, %v1481_v19  ;;  %v1857_v1 = vmul.f32 %v5132_v49, %v4801_v53  ;;  %v1531_v51 = vmul.f32 %v4998_v14, %v7316_v45  ;;  %v7370_v2 = vld [vmem:[#allocation24_spill] sm:$0xff]  ;;  %v7372_v10 = vld [vmem:[#allocation57_spill] sm:$0xff]  ;;  %v7374_v36 = vld [vmem:[#allocation58_spill] sm:$0xff] }
 0x282   :  { %v1428_v57 = vpop.permute.xlu1 %1427  ;;  %v1430_v50 = vpop.permute.xlu0 %1429  ;;  %v1532_v15 = vmul.f32 %v4998_v14, %v7317_v20  ;;  %v1194_v56 = vadd.f32 %v7369_v61, %v1049_v28  ;;  %v1195_v6 = vadd.f32 %v7370_v2, %v1050_v48  ;;  %v1051_v19 = vadd.f32 %v7372_v10, %v7371_v33  ;;  %v7376_v11 = vld [vmem:[#allocation70_spill] sm:$0xff]  ;;  %v7383_v33 = vld [vmem:[#allocation71_spill] sm:$0xff] }
 0x283   :  { %7367 = vst [vmem:[#allocation40_spill] sm:$0xff] %v5202_v59  ;;  %7368 = vst [vmem:[#allocation37_spill] sm:$0xff] %v5204_v31  ;;  %v1482_v9 = vadd.f32 %v1428_v57, %v1337_v26  ;;  %v1483_v22 = vadd.f32 %v1430_v50, %v1338_v58  ;;  %v1052_v25 = vadd.f32 %v7374_v36, %v7373_v60  ;;  %v7384_v60 = vld [vmem:[#allocation46_spill] sm:$0xff] }
 0x284   :  { %1907 = vrot.lane.b32.xlu1 %v1856_v52, %s3561_s9  ;;  %1909 = vrot.lane.b32.xlu0 %v1857_v1, %s3561_s9  ;;  %v1339_v34 = vadd.f32 %v7375_v43, %v1194_v56  ;;  %v1340_v31 = vadd.f32 %v7376_v11, %v1195_v6  ;;  %v1858_v26 = vmul.f32 %v5132_v49, %v4813_v55  ;;  %v7379_v1 = vld [vmem:[#allocation14_spill] sm:$0xff]  ;;  %v7381_v6 = vld [vmem:[#allocation55_spill] sm:$0xff] }
 0x285   :  { %v5224_v59 = vadd.f32 %v1531_v51, %v1482_v9  ;;  %v5226_v28 = vadd.f32 %v1532_v15, %v1483_v22  ;;  %v1859_v57 = vmul.f32 %v5132_v49, %v4815_v13  ;;  %v1533_v50 = vmul.f32 %v4998_v14, %v7326_v23  ;;  %v7380_v51 = vld [vmem:[#allocation72_spill] sm:$0xff] }
 0x286   :  { %v1432_v48 = vpop.permute.xlu1 %1431  ;;  %v1434_v58 = vpop.permute.xlu0 %1433  ;;  %v1534_v52 = vmul.f32 %v4998_v14, %v7327_v44  ;;  %v1196_v61 = vadd.f32 %v7379_v1, %v1051_v19  ;;  %v1197_v56 = vadd.f32 %v7380_v51, %v1052_v25  ;;  %v7382_v9 = vld [vmem:[#allocation36_spill] sm:$0xff]  ;;  %v1861_v25 = vmul.f32 %v5132_v49, %v4829_v17 }
 0x287   :  { %7377 = vst [vmem:[#allocation21_spill] sm:$0xff] %v5224_v59  ;;  %7378 = vst [vmem:[#allocation15_spill] sm:$0xff] %v5226_v28  ;;  %v1484_v15 = vadd.f32 %v1432_v48, %v1339_v34  ;;  %v1485_v2 = vadd.f32 %v1434_v58, %v1340_v31  ;;  %v1053_v22 = vadd.f32 %v7382_v9, %v7381_v6  ;;  %v7387_v48 = vld [vmem:[#allocation64_spill] sm:$0xff]  ;;  %v5542_v59 = vld [vmem:[#allocation2 + $0x63] sm:$0xff] }
 0x288   :  { %1911 = vrot.lane.b32.xlu1 %v1858_v26, %s3561_s9  ;;  %1913 = vrot.lane.b32.xlu0 %v1859_v57, %s3561_s9  ;;  %v1341_v10 = vadd.f32 %v7383_v33, %v1196_v61  ;;  %v1342_v36 = vadd.f32 %v7384_v60, %v1197_v56  ;;  %v1860_v31 = vmul.f32 %v5132_v49, %v4827_v47  ;;  %v5528_v28 = vld [vmem:[#allocation2 + $0x53] sm:$0xff] }
 0x289   :  { %v5244_v43 = vadd.f32 %v1533_v50, %v1484_v15  ;;  %v5246_v11 = vadd.f32 %v1534_v52, %v1485_v2  ;;  %v1535_v34 = vmul.f32 %v4998_v14, %v7337_v18  ;;  %v1198_v58 = vadd.f32 %v7387_v48, %v1053_v22 }
 0x28a   :  { %v1436_v19 = vpop.permute.xlu1 %1435  ;;  %v1438_v1 = vpop.permute.xlu0 %1437  ;;  %v1536_v50 = vmul.f32 %v4998_v14, %v7338_v54  ;;  %v1862_v2 = vmul.f32 %v5132_v49, %v4841_v16  ;;  %v1863_v6 = vmul.f32 %v5132_v49, %v4843_v24  ;;  %v1537_v22 = vmul.f32 %v4998_v14, %v7348_v3 }
 0x28b   :  { %7385 = vst [vmem:[#allocation56_spill] sm:$0xff] %v5244_v43  ;;  %7386 = vst [vmem:[#allocation16_spill] sm:$0xff] %v5246_v11  ;;  %v1486_v26 = vadd.f32 %v1436_v19, %v1341_v10  ;;  %v1487_v57 = vadd.f32 %v1438_v1, %v1342_v36  ;;  %v1343_v52 = vadd.f32 %v5005_v29, %v1198_v58  ;;  %v5500_v11 = vld [vmem:[#allocation2 + $0x33] sm:$0xff] }
 0x28c   :  { %1915 = vrot.lane.b32.xlu1 %v1860_v31, %s3561_s9  ;;  %1917 = vrot.lane.b32.xlu0 %v1861_v25, %s3561_s9  ;;  %v1864_v60 = vmul.f32 %v5132_v49, %v4855_v41  ;;  %v1865_v36 = vmul.f32 %v5132_v49, %v4857_v46  ;;  %v1866_v1 = vmul.f32 %v5132_v49, %v4869_v38 }
 0x28d   :  { %v5260_v61 = vadd.f32 %v1535_v34, %v1486_v26  ;;  %v5262_v51 = vadd.f32 %v1536_v50, %v1487_v57  ;;  %v1867_v31 = vmul.f32 %v5132_v49, %v4871_v12  ;;  %v1868_v48 = vmul.f32 %v5132_v49, %v4883_v39 }
 0x28e   :  { %v1440_v56 = vpop.permute.xlu1 %1439  ;;  %v5264_v15 = vpop.permute.xlu0 %1611  ;;  %v1869_v58 = vmul.f32 %v5132_v49, %v4885_v40  ;;  %v1870_v50 = vmul.f32 %v5132_v49, %v7316_v45 }
 0x28f   :  { %7388 = vst [vmem:[#allocation53_spill] sm:$0xff] %v5260_v61  ;;  %7389 = vst [vmem:[#allocation26_spill] sm:$0xff] %v5262_v51  ;;  %v1488_v9 = vadd.f32 %v1440_v56, %v1343_v52  ;;  %v1871_v52 = vmul.f32 %v5132_v49, %v7317_v20  ;;  %v5486_v51 = vld [vmem:[#allocation2 + $0x23] sm:$0xff] }
 0x290   :  { %1919 = vrot.lane.b32.xlu1 %v1862_v2, %s3561_s9  ;;  %1921 = vrot.lane.b32.xlu0 %v1863_v6, %s3561_s9  ;;  %v1872_v6 = vmul.f32 %v5132_v49, %v7326_v23 }
 0x291   :  { %v5274_v29 = vadd.f32 %v1537_v22, %v1488_v9  ;;  %v1873_v9 = vmul.f32 %v5132_v49, %v7327_v44 }
 0x292   :  { %v5276_v33 = vpop.permute.xlu1 %1613  ;;  %v5278_v10 = vpop.permute.xlu0 %1615 }
 0x293   :  { %7390 = vst [vmem:[#allocation66_spill] sm:$0xff] %v5274_v29  ;;  %v5470_v29 = vld [vmem:[#allocation2 + $0xb] sm:$0xff] }
 0x294   :  { %1923 = vrot.lane.b32.xlu1 %v1864_v60, %s3561_s9  ;;  %1925 = vrot.lane.b32.xlu0 %v1865_v36, %s3561_s9  ;;  %v1874_v36 = vmul.f32 %v5132_v49, %v7337_v18 }
 0x296   :  { %v5286_v14 = vpop.permute.xlu1 %1617  ;;  %v5288_v19 = vpop.permute.xlu0 %1619 }
 0x298   :  { %1927 = vrot.lane.b32.xlu1 %v1866_v1, %s3561_s9  ;;  %1929 = vrot.lane.b32.xlu0 %v1867_v31, %s3561_s9  ;;  %v1875_v1 = vmul.f32 %v5132_v49, %v7338_v54  ;;  %v5334_v31 = vstv %s3493_s22 }
 0x29a   :  { %v5296_v25 = vpop.permute.xlu1 %1621  ;;  %v5298_v34 = vpop.permute.xlu0 %1623 }
 0x29c   :  { %1931 = vrot.lane.b32.xlu1 %v1868_v48, %s3561_s9  ;;  %1933 = vrot.lane.b32.xlu0 %v1869_v58, %s3561_s9 }
 0x29e   :  { %v5306_v26 = vpop.permute.xlu1 %1625  ;;  %v5308_v57 = vpop.permute.xlu0 %1627 }
 0x2a0   :  { %1935 = vrot.lane.b32.xlu1 %v1870_v50, %s3561_s9  ;;  %1937 = vrot.lane.b32.xlu0 %v1871_v52, %s3561_s9  ;;  %v1876_v50 = vmul.f32 %v5132_v49, %v7348_v3  ;;  %v1998_v52 = vmul.f32 %v5334_v31, %v4771_v0 }
 0x2a2   :  { %v5316_v56 = vpop.permute.xlu1 %1629  ;;  %v5318_v2 = vpop.permute.xlu0 %1631 }
 0x2a3   :  { %7391 = vst [vmem:[#allocation41_spill] sm:$0xff] %v5318_v2  ;;  %v5598_v2 = vld [vmem:[#allocation2 + $0xa3] sm:$0xf] }
 0x2a4   :  { %1939 = vrot.lane.b32.xlu1 %v1872_v6, %s3561_s9  ;;  %1941 = vrot.lane.b32.xlu0 %v1873_v9, %s3561_s9  ;;  %7425 = vst [vmem:[#allocation44_spill] sm:$0xff] %v5598_v2 }
 0x2a6   :  { %v5326_v22 = vpop.permute.xlu1 %1633  ;;  %v5328_v60 = vpop.permute.xlu0 %1635 }
 0x2a7   :  { %7392 = vst [vmem:[#allocation25_spill] sm:$0xff] %v5326_v22  ;;  %7393 = vst [vmem:[#allocation22_spill] sm:$0xff] %v5328_v60  ;;  %v5584_v60 = vld [vmem:[#allocation2 + $0x93] sm:$0xff] }
 0x2a8   :  { %1943 = vrot.lane.b32.xlu1 %v1874_v36, %s3561_s9  ;;  %1945 = vrot.lane.b32.xlu0 %v1875_v1, %s3561_s9  ;;  %v1999_v36 = vmul.f32 %v5334_v31, %v4785_v8  ;;  %v2000_v1 = vmul.f32 %v5334_v31, %v4787_v21  ;;  %7421 = vst [vmem:[#allocation33_spill] sm:$0xff] %v5584_v60 }
 0x2aa   :  { %v5338_v48 = vpop.permute.xlu1 %1637  ;;  %v5340_v58 = vpop.permute.xlu0 %1639 }
 0x2ab   :  { %7394 = vst [vmem:[#allocation12_spill] sm:$0xff] %v5338_v48  ;;  %7395 = vst [vmem:[#allocation9_spill] sm:$0xff] %v5340_v58  ;;  %v5570_v58 = vld [vmem:[#allocation2 + $0x83] sm:$0xff] }
 0x2ac   :  { %1947 = vrot.lane.b32.xlu1 %v1876_v50, %s3561_s9  ;;  %2046 = vrot.lane.b32.xlu0 %v1998_v52, %s3562_s11  ;;  %v2001_v50 = vmul.f32 %v5334_v31, %v4799_v7  ;;  %v2002_v52 = vmul.f32 %v5334_v31, %v4801_v53 }
 0x2ae   :  { %v5348_v6 = vpop.permute.xlu1 %1641  ;;  %v5350_v9 = vpop.permute.xlu0 %1643 }
 0x2af   :  { %7396 = vst [vmem:[#allocation54_spill] sm:$0xff] %v5348_v6  ;;  %7397 = vst [vmem:[#allocation51_spill] sm:$0xff] %v5350_v9  ;;  %v5556_v9 = vld [vmem:[#allocation2 + $0x73] sm:$0xf] }
 0x2b0   :  { %2048 = vrot.lane.b32.xlu1 %v1999_v36, %s3562_s11  ;;  %2050 = vrot.lane.b32.xlu0 %v2000_v1, %s3562_s11  ;;  %v2003_v36 = vmul.f32 %v5334_v31, %v4813_v55  ;;  %v2004_v1 = vmul.f32 %v5334_v31, %v4815_v13 }
 0x2b2   :  { %v5358_v49 = vpop.permute.xlu1 %1645  ;;  %v5360_v0 = vpop.permute.xlu0 %1647 }
 0x2b3   :  { %7398 = vst [vmem:[#allocation34_spill] sm:$0xff] %v5358_v49  ;;  %7399 = vst [vmem:[#allocation43_spill] sm:$0xff] %v5360_v0  ;;  %v5526_v0 = vld [vmem:[#allocation2 + $0x4b] sm:$0xff]  ;;  %v5540_v49 = vld [vmem:[#allocation2 + $0x5b] sm:$0xf] }
 0x2b4   :  { %2052 = vrot.lane.b32.xlu1 %v2001_v50, %s3562_s11  ;;  %2054 = vrot.lane.b32.xlu0 %v2002_v52, %s3562_s11  ;;  %v2005_v50 = vmul.f32 %v5334_v31, %v4827_v47  ;;  %v2006_v52 = vmul.f32 %v5334_v31, %v4829_v17 }
 0x2b6   :  { %v5368_v8 = vpop.permute.xlu1 %1649  ;;  %v5370_v21 = vpop.permute.xlu0 %1651 }
 0x2b7   :  { %7400 = vst [vmem:[#allocation27_spill] sm:$0xff] %v5368_v8  ;;  %7401 = vst [vmem:[#allocation67_spill] sm:$0xff] %v5370_v21  ;;  %v5498_v21 = vld [vmem:[#allocation2 + $0x2b] sm:$0xf] }
 0x2b8   :  { %2056 = vrot.lane.b32.xlu1 %v2003_v36, %s3562_s11  ;;  %2058 = vrot.lane.b32.xlu0 %v2004_v1, %s3562_s11  ;;  %v2007_v36 = vmul.f32 %v5334_v31, %v4841_v16  ;;  %v2008_v1 = vmul.f32 %v5334_v31, %v4843_v24 }
 0x2ba   :  { %v5378_v7 = vpop.permute.xlu1 %1653  ;;  %v5380_v53 = vpop.permute.xlu0 %1655 }
 0x2bb   :  { %7402 = vst [vmem:[#allocation42_spill] sm:$0xff] %v5378_v7  ;;  %7403 = vst [vmem:[#allocation62_spill] sm:$0xff] %v5380_v53 }
 0x2bc   :  { %2060 = vrot.lane.b32.xlu1 %v2005_v50, %s3562_s11  ;;  %2062 = vrot.lane.b32.xlu0 %v2006_v52, %s3562_s11  ;;  %v2009_v50 = vmul.f32 %v5334_v31, %v4855_v41  ;;  %v2010_v52 = vmul.f32 %v5334_v31, %v4857_v46 }
 0x2be   :  { %v5388_v55 = vpop.permute.xlu1 %1657  ;;  %v5390_v13 = vpop.permute.xlu0 %1756 }
 0x2bf   :  { %7404 = vst [vmem:[#allocation63_spill] sm:$0xff] %v5388_v55  ;;  %v5456_v55 = vld [vmem:[#allocation2 + $0x3] sm:$0xff] }
 0x2c0   :  { %2064 = vrot.lane.b32.xlu1 %v2007_v36, %s3562_s11  ;;  %2066 = vrot.lane.b32.xlu0 %v2008_v1, %s3562_s11  ;;  %v2011_v36 = vmul.f32 %v5334_v31, %v4869_v38  ;;  %v2012_v1 = vmul.f32 %v5334_v31, %v4871_v12 }
 0x2c2   :  { %v5398_v47 = vpop.permute.xlu1 %1758  ;;  %v5400_v17 = vpop.permute.xlu0 %1760 }
 0x2c4   :  { %2068 = vrot.lane.b32.xlu1 %v2009_v50, %s3562_s11  ;;  %2070 = vrot.lane.b32.xlu0 %v2010_v52, %s3562_s11  ;;  %v2013_v50 = vmul.f32 %v5334_v31, %v4883_v39  ;;  %v2014_v52 = vmul.f32 %v5334_v31, %v4885_v40 }
 0x2c6   :  { %v5408_v16 = vpop.permute.xlu1 %1762  ;;  %v5410_v24 = vpop.permute.xlu0 %1764 }
 0x2c8   :  { %2072 = vrot.lane.b32.xlu1 %v2011_v36, %s3562_s11  ;;  %2074 = vrot.lane.b32.xlu0 %v2012_v1, %s3562_s11  ;;  %v2015_v36 = vmul.f32 %v5334_v31, %v7316_v45  ;;  %v2016_v1 = vmul.f32 %v5334_v31, %v7317_v20 }
 0x2ca   :  { %v5418_v41 = vpop.permute.xlu1 %1766  ;;  %v5420_v46 = vpop.permute.xlu0 %1768 }
 0x2cc   :  { %2076 = vrot.lane.b32.xlu1 %v2013_v50, %s3562_s11  ;;  %2078 = vrot.lane.b32.xlu0 %v2014_v52, %s3562_s11  ;;  %v2017_v50 = vmul.f32 %v5334_v31, %v7326_v23  ;;  %v2018_v52 = vmul.f32 %v5334_v31, %v7327_v44  ;;  %v5458_v23 = vstv %s3495_s23 }
 0x2cd   :  { %v2217_v53 = vmul.f32 %v5458_v23, %v5470_v29  ;;  %v2220_v61 = vmul.f32 %v5458_v23, %v5486_v51  ;;  %v2221_v8 = vmul.f32 %v5458_v23, %v5498_v21  ;;  %v2222_v43 = vmul.f32 %v5458_v23, %v5500_v11 }
 0x2ce   :  { %v5428_v38 = vpop.permute.xlu1 %1770  ;;  %v5430_v12 = vpop.permute.xlu0 %1772 }
 0x2d0   :  { %2080 = vrot.lane.b32.xlu1 %v2015_v36, %s3562_s11  ;;  %2082 = vrot.lane.b32.xlu0 %v2016_v1, %s3562_s11  ;;  %v2019_v36 = vmul.f32 %v5334_v31, %v7337_v18  ;;  %v2020_v1 = vmul.f32 %v5334_v31, %v7338_v54  ;;  %v2216_v18 = vmul.f32 %v5458_v23, %v5456_v55  ;;  %v5472_v54 = vld [vmem:[#allocation2 + $0x13] sm:$0xf] }
 0x2d2   :  { %v5438_v39 = vpop.permute.xlu1 %1774  ;;  %v5440_v40 = vpop.permute.xlu0 %1776 }
 0x2d3   :  { %7405 = vst [vmem:[#allocation52_spill] sm:$0xff] %v5438_v39  ;;  %7406 = vst [vmem:[#allocation35_spill] sm:$0xff] %v5440_v40  ;;  %v2234_v40 = vmul.f32 %v5458_v23, %v5584_v60  ;;  %v5596_v39 = vld [vmem:[#allocation2 + $0x9b] sm:$0xff]  ;;  %v5610_v60 = vld [vmem:[#allocation2 + $0xab] sm:$0xff] }
 0x2d4   :  { %2084 = vrot.lane.b32.xlu1 %v2017_v50, %s3562_s11  ;;  %2086 = vrot.lane.b32.xlu0 %v2018_v52, %s3562_s11  ;;  %v2021_v52 = vmul.f32 %v5334_v31, %v7348_v3  ;;  %v2218_v3 = vmul.f32 %v5458_v23, %v5472_v54  ;;  %v5484_v31 = vld [vmem:[#allocation2 + $0x1b] sm:$0xff]  ;;  %7424 = vst [vmem:[#allocation60_spill] sm:$0xff] %v5596_v39  ;;  %7428 = vst [vmem:[#allocation24_spill] sm:$0xff] %v5610_v60 }
 0x2d5   :  { %v2219_v7 = vmul.f32 %v5458_v23, %v5484_v31 }
 0x2d6   :  { %v5448_v45 = vpop.permute.xlu1 %1778  ;;  %v5450_v20 = vpop.permute.xlu0 %1780 }
 0x2d7   :  { %7407 = vst [vmem:[#allocation49_spill] sm:$0xff] %v5448_v45  ;;  %7408 = vst [vmem:[#allocation19_spill] sm:$0xff] %v5450_v20  ;;  %v2232_v20 = vmul.f32 %v5458_v23, %v5570_v58  ;;  %v5582_v45 = vld [vmem:[#allocation2 + $0x8b] sm:$0xf] }
 0x2d8   :  { %2088 = vrot.lane.b32.xlu1 %v2019_v36, %s3562_s11  ;;  %2090 = vrot.lane.b32.xlu0 %v2020_v1, %s3562_s11  ;;  %7420 = vst [vmem:[#allocation39_spill] sm:$0xff] %v5582_v45  ;;  %v2233_v22 = vmul.f32 %v5458_v23, %v5582_v45  ;;  %v2236_v45 = vmul.f32 %v5458_v23, %v5598_v2  ;;  %v5626_v2 = vstv %s3496_s24 }
 0x2da   :  { %v5462_v44 = vpop.permute.xlu1 %1782  ;;  %v5464_v50 = vpop.permute.xlu0 %1784 }
 0x2db   :  { %7409 = vst [vmem:[#allocation73_spill] sm:$0xff] %v5462_v44  ;;  %7410 = vst [vmem:[#allocation28_spill] sm:$0xff] %v5464_v50  ;;  %v2230_v50 = vmul.f32 %v5458_v23, %v5556_v9  ;;  %v5568_v44 = vld [vmem:[#allocation2 + $0x7b] sm:$0xff] }
 0x2dc   :  { %2092 = vrot.lane.b32.xlu1 %v2021_v52, %s3562_s11  ;;  %2264 = vrot.lane.b32.xlu0 %v2216_v18, %s3559_s5  ;;  %v2231_v48 = vmul.f32 %v5458_v23, %v5568_v44 }
 0x2de   :  { %v5476_v36 = vpop.permute.xlu1 %1786  ;;  %v5478_v1 = vpop.permute.xlu0 %1788 }
 0x2df   :  { %7411 = vst [vmem:[#allocation13_spill] sm:$0xff] %v5476_v36  ;;  %7412 = vst [vmem:[#allocation61_spill] sm:$0xff] %v5478_v1  ;;  %v2228_v1 = vmul.f32 %v5458_v23, %v5542_v59  ;;  %v5554_v36 = vld [vmem:[#allocation2 + $0x6b] sm:$0xff] }
 0x2e0   :  { %2266 = vrot.lane.b32.xlu1 %v2217_v53, %s3559_s5  ;;  %2268 = vrot.lane.b32.xlu0 %v2218_v3, %s3559_s5  ;;  %v2229_v6 = vmul.f32 %v5458_v23, %v5554_v36 }
 0x2e2   :  { %v5490_v52 = vpop.permute.xlu1 %1790  ;;  %v5492_v18 = vpop.permute.xlu0 %1792 }
 0x2e3   :  { %7413 = vst [vmem:[#allocation50_spill] sm:$0xff] %v5490_v52  ;;  %7414 = vst [vmem:[#allocation20_spill] sm:$0xff] %v5492_v18  ;;  %v5512_v18 = vld [vmem:[#allocation2 + $0x3b] sm:$0xff]  ;;  %v5514_v52 = vld [vmem:[#allocation2 + $0x43] sm:$0xf] }
 0x2e4   :  { %2270 = vrot.lane.b32.xlu1 %v2219_v7, %s3559_s5  ;;  %2272 = vrot.lane.b32.xlu0 %v2220_v61, %s3559_s5 }
 0x2e6   :  { %v5504_v53 = vpop.permute.xlu1 %1794  ;;  %v5506_v3 = vpop.permute.xlu0 %1796 }
 0x2e7   :  { %7415 = vst [vmem:[#allocation32_spill] sm:$0xff] %v5504_v53  ;;  %7416 = vst [vmem:[#allocation11_spill] sm:$0xff] %v5506_v3  ;;  %v2223_v3 = vmul.f32 %v5458_v23, %v5512_v18  ;;  %v2224_v53 = vmul.f32 %v5458_v23, %v5514_v52 }
 0x2e8   :  { %2274 = vrot.lane.b32.xlu1 %v2221_v8, %s3559_s5  ;;  %2276 = vrot.lane.b32.xlu0 %v2222_v43, %s3559_s5 }
 0x2ea   :  { %v5518_v7 = vpop.permute.xlu1 %1798  ;;  %v5520_v61 = vpop.permute.xlu0 %1800 }
 0x2eb   :  { %7417 = vst [vmem:[#allocation68_spill] sm:$0xff] %v5518_v7  ;;  %7418 = vst [vmem:[#allocation69_spill] sm:$0xff] %v5520_v61  ;;  %v2225_v61 = vmul.f32 %v5458_v23, %v5526_v0  ;;  %v2226_v7 = vmul.f32 %v5458_v23, %v5528_v28 }
 0x2ec   :  { %2278 = vrot.lane.b32.xlu1 %v2223_v3, %s3559_s5  ;;  %2280 = vrot.lane.b32.xlu0 %v2224_v53, %s3559_s5 }
 0x2ee   :  { %v5532_v8 = vpop.permute.xlu1 %1802  ;;  %v5534_v43 = vpop.permute.xlu0 %1901 }
 0x2ef   :  { %7419 = vst [vmem:[#allocation38_spill] sm:$0xff] %v5532_v8  ;;  %v2227_v8 = vmul.f32 %v5458_v23, %v5540_v49 }
 0x2f0   :  { %2282 = vrot.lane.b32.xlu1 %v2225_v61, %s3559_s5  ;;  %2284 = vrot.lane.b32.xlu0 %v2226_v7, %s3559_s5 }
 0x2f2   :  { %v5546_v3 = vpop.permute.xlu1 %1903  ;;  %v5548_v53 = vpop.permute.xlu0 %1905 }
 0x2f4   :  { %2286 = vrot.lane.b32.xlu1 %v2227_v8, %s3559_s5  ;;  %2288 = vrot.lane.b32.xlu0 %v2228_v1, %s3559_s5 }
 0x2f6   :  { %v5560_v61 = vpop.permute.xlu1 %1907  ;;  %v5562_v7 = vpop.permute.xlu0 %1909 }
 0x2f8   :  { %2290 = vrot.lane.b32.xlu1 %v2229_v6, %s3559_s5  ;;  %2292 = vrot.lane.b32.xlu0 %v2230_v50, %s3559_s5 }
 0x2fa   :  { %v5574_v8 = vpop.permute.xlu1 %1911  ;;  %v5576_v1 = vpop.permute.xlu0 %1913 }
 0x2fc   :  { %2294 = vrot.lane.b32.xlu1 %v2231_v48, %s3559_s5  ;;  %2296 = vrot.lane.b32.xlu0 %v2232_v20, %s3559_s5 }
 0x2fe   :  { %v5588_v6 = vpop.permute.xlu1 %1915  ;;  %v5590_v50 = vpop.permute.xlu0 %1917 }
 0x2ff   :  { %7422 = vst [vmem:[#allocation59_spill] sm:$0xff] %v5588_v6  ;;  %7423 = vst [vmem:[#allocation17_spill] sm:$0xff] %v5590_v50  ;;  %v2235_v50 = vmul.f32 %v5458_v23, %v5596_v39  ;;  %v5612_v6 = vld [vmem:[#allocation2 + $0xb3] sm:$0xff] }
 0x300   :  { %2298 = vrot.lane.b32.xlu1 %v2233_v22, %s3559_s5  ;;  %2300 = vrot.lane.b32.xlu0 %v2234_v40, %s3559_s5  ;;  %7429 = vst [vmem:[#allocation18_spill] sm:$0xff] %v5612_v6  ;;  %v2238_v39 = vmul.f32 %v5458_v23, %v5612_v6 }
 0x302   :  { %v5602_v48 = vpop.permute.xlu1 %1919  ;;  %v5604_v20 = vpop.permute.xlu0 %1921 }
 0x303   :  { %7426 = vst [vmem:[#allocation45_spill] sm:$0xff] %v5602_v48  ;;  %7427 = vst [vmem:[#allocation23_spill] sm:$0xff] %v5604_v20  ;;  %v2237_v20 = vmul.f32 %v5458_v23, %v5610_v60  ;;  %v5624_v48 = vld [vmem:[#allocation2 + $0xbb] sm:$0xf]  ;;  %v2361_v60 = vmul.f32 %v5626_v2, %v5456_v55 }
 0x304   :  { %2302 = vrot.lane.b32.xlu1 %v2235_v50, %s3559_s5  ;;  %2304 = vrot.lane.b32.xlu0 %v2236_v45, %s3559_s5  ;;  %7432 = vst [vmem:[#allocation58_spill] sm:$0xff] %v5624_v48 }
 0x306   :  { %v5616_v22 = vpop.permute.xlu1 %1923  ;;  %v5618_v40 = vpop.permute.xlu0 %1925 }
 0x307   :  { %7430 = vst [vmem:[#allocation57_spill] sm:$0xff] %v5616_v22  ;;  %7431 = vst [vmem:[#allocation10_spill] sm:$0xff] %v5618_v40  ;;  %v2239_v40 = vmul.f32 %v5458_v23, %v5624_v48 }
 0x308   :  { %2306 = vrot.lane.b32.xlu1 %v2237_v20, %s3559_s5  ;;  %2308 = vrot.lane.b32.xlu0 %v2238_v39, %s3559_s5  ;;  %v2362_v39 = vmul.f32 %v5626_v2, %v5470_v29  ;;  %v2363_v20 = vmul.f32 %v5626_v2, %v5472_v54 }
 0x30a   :  { %v5630_v50 = vpop.permute.xlu1 %1927  ;;  %v5632_v45 = vpop.permute.xlu0 %1929 }
 0x30b   :  { %7433 = vst [vmem:[#allocation29_spill] sm:$0xff] %v5632_v45 }
 0x30c   :  { %2310 = vrot.lane.b32.xlu1 %v2239_v40, %s3559_s5  ;;  %2409 = vrot.lane.b32.xlu0 %v2361_v60, %s3560_s7  ;;  %v2364_v60 = vmul.f32 %v5626_v2, %v5484_v31  ;;  %v2365_v40 = vmul.f32 %v5626_v2, %v5486_v51 }
 0x30e   :  { %v5640_v6 = vpop.permute.xlu1 %1931  ;;  %v5642_v22 = vpop.permute.xlu0 %1933 }
 0x30f   :  { %7434 = vst [vmem:[#allocation70_spill] sm:$0xff] %v5640_v6  ;;  %7435 = vst [vmem:[#allocation14_spill] sm:$0xff] %v5642_v22 }
 0x310   :  { %2411 = vrot.lane.b32.xlu1 %v2362_v39, %s3560_s7  ;;  %2413 = vrot.lane.b32.xlu0 %v2363_v20, %s3560_s7  ;;  %v2366_v20 = vmul.f32 %v5626_v2, %v5498_v21 }
 0x312   :  { %v5650_v23 = vpop.permute.xlu1 %1935  ;;  %v5652_v48 = vpop.permute.xlu0 %1937 }
 0x313   :  { %7436 = vst [vmem:[#allocation72_spill] sm:$0xff] %v5650_v23  ;;  %7437 = vst [vmem:[#allocation55_spill] sm:$0xff] %v5652_v48  ;;  %v2367_v48 = vmul.f32 %v5626_v2, %v5500_v11 }
 0x314   :  { %2415 = vrot.lane.b32.xlu1 %v2364_v60, %s3560_s7  ;;  %2417 = vrot.lane.b32.xlu0 %v2365_v40, %s3560_s7  ;;  %v1683_v60 = vadd.f32 %v5264_v15, %v5023_v62  ;;  %v1684_v62 = vadd.f32 %v5276_v33, %v5043_v42  ;;  %v1685_v15 = vadd.f32 %v5278_v10, %v5045_v32 }
 0x315   :  { %v1686_v32 = vadd.f32 %v5286_v14, %v5065_v30  ;;  %v1687_v33 = vadd.f32 %v5288_v19, %v5067_v4  ;;  %v2373_v30 = vmul.f32 %v5626_v2, %v5542_v59 }
 0x316   :  { %v5660_v22 = vpop.permute.xlu1 %1939  ;;  %v5662_v39 = vpop.permute.xlu0 %1941  ;;  %v1828_v6 = vadd.f32 %v5390_v13, %v1683_v60  ;;  %v2370_v13 = vmul.f32 %v5626_v2, %v5526_v0  ;;  %v1830_v60 = vadd.f32 %v5400_v17, %v1685_v15  ;;  %v1689_v15 = vadd.f32 %v5298_v34, %v5091_v35 }
 0x317   :  { %7438 = vst [vmem:[#allocation36_spill] sm:$0xff] %v5660_v22  ;;  %7439 = vst [vmem:[#allocation71_spill] sm:$0xff] %v5662_v39  ;;  %v2368_v39 = vmul.f32 %v5626_v2, %v5512_v18  ;;  %v2369_v22 = vmul.f32 %v5626_v2, %v5514_v52  ;;  %v1831_v19 = vadd.f32 %v5408_v16, %v1686_v32 }
 0x318   :  { %2419 = vrot.lane.b32.xlu1 %v2366_v20, %s3560_s7  ;;  %2421 = vrot.lane.b32.xlu0 %v2367_v48, %s3560_s7  ;;  %v5683_v48 = vstv %s3494_s25  ;;  %v1973_v20 = vadd.f32 %v5534_v43, %v1828_v6  ;;  %v2375_v35 = vmul.f32 %v5626_v2, %v5556_v9  ;;  %v1690_v32 = vadd.f32 %v5306_v26, %v5111_v27 }
 0x319   :  { %v2167_v42 = vmul.f32 %v5683_v48, %v5456_v55  ;;  %v2168_v14 = vmul.f32 %v5683_v48, %v5470_v29  ;;  %v2169_v4 = vmul.f32 %v5683_v48, %v5472_v54  ;;  %v2171_v34 = vmul.f32 %v5683_v48, %v5486_v51 }
 0x31a   :  { %v5672_v23 = vpop.permute.xlu1 %1943  ;;  %v5674_v40 = vpop.permute.xlu0 %1945  ;;  %v2376_v27 = vmul.f32 %v5626_v2, %v5568_v44  ;;  %v2172_v26 = vmul.f32 %v5683_v48, %v5498_v21 }
 0x31b   :  { %7440 = vst [vmem:[#allocation46_spill] sm:$0xff] %v5672_v23  ;;  %7441 = vst [vmem:[#allocation64_spill] sm:$0xff] %v5674_v40 }
 0x31c   :  { %2423 = vrot.lane.b32.xlu1 %v2368_v39, %s3560_s7  ;;  %2425 = vrot.lane.b32.xlu0 %v2369_v22, %s3560_s7  ;;  %v2371_v39 = vmul.f32 %v5626_v2, %v5528_v28  ;;  %v1829_v22 = vadd.f32 %v5398_v47, %v1684_v62  ;;  %v1975_v47 = vadd.f32 %v5548_v53, %v1830_v60 }
 0x31d   :  { %v1688_v62 = vadd.f32 %v5296_v25, %v5089_v5  ;;  %v2374_v5 = vmul.f32 %v5626_v2, %v5554_v36  ;;  %v2170_v25 = vmul.f32 %v5683_v48, %v5484_v31 }
 0x31e   :  { %v5690_v40 = vpop.permute.xlu1 %1947  ;;  %v2047_v23 = vpop.permute.xlu0 %2046  ;;  %v1974_v10 = vadd.f32 %v5546_v3, %v1829_v22  ;;  %v1832_v3 = vadd.f32 %v5410_v24, %v1687_v33  ;;  %v1691_v33 = vadd.f32 %v5308_v57, %v5113_v37  ;;  %v2377_v37 = vmul.f32 %v5626_v2, %v5570_v58 }
 0x31f   :  { %v2118_v45 = vadd.f32 %v2047_v23, %v1973_v20  ;;  %v2372_v23 = vmul.f32 %v5626_v2, %v5540_v49  ;;  %v1976_v20 = vadd.f32 %v5560_v61, %v1831_v19  ;;  %v1833_v61 = vadd.f32 %v5418_v41, %v1688_v62  ;;  %v7444_v19 = vld [vmem:[#allocation41_spill] sm:$0xff] }
 0x320   :  { %2427 = vrot.lane.b32.xlu1 %v2370_v13, %s3560_s7  ;;  %2429 = vrot.lane.b32.xlu0 %v2371_v39, %s3560_s7  ;;  %v1977_v13 = vadd.f32 %v5562_v7, %v1832_v3  ;;  %v1834_v7 = vadd.f32 %v5420_v46, %v1689_v15  ;;  %v2173_v57 = vmul.f32 %v5683_v48, %v5500_v11  ;;  %v7446_v62 = vld [vmem:[#allocation17_spill] sm:$0xff] }
 0x321   :  { %v5708_v43 = vadd.f32 %v2167_v42, %v2118_v45 }
 0x322   :  { %v2049_v17 = vpop.permute.xlu1 %2048  ;;  %v2051_v6 = vpop.permute.xlu0 %2050 }
 0x323   :  { %v2119_v53 = vadd.f32 %v2049_v17, %v1974_v10  ;;  %v2120_v45 = vadd.f32 %v2051_v6, %v1975_v47  ;;  %v1978_v10 = vadd.f32 %v5574_v8, %v1833_v61  ;;  %v1979_v47 = vadd.f32 %v5576_v1, %v1834_v7  ;;  %v7451_v61 = vld [vmem:[#allocation35_spill] sm:$0xff] }
 0x324   :  { %2431 = vrot.lane.b32.xlu1 %v2372_v23, %s3560_s7  ;;  %2433 = vrot.lane.b32.xlu0 %v2373_v30, %s3560_s7  ;;  %v1835_v8 = vadd.f32 %v5428_v38, %v1690_v32  ;;  %v1836_v1 = vadd.f32 %v5430_v12, %v1691_v33  ;;  %v7452_v32 = vld [vmem:[#allocation48_spill] sm:$0xff]  ;;  %v7453_v33 = vld [vmem:[#allocation25_spill] sm:$0xff] }
 0x325   :  { %v5728_v39 = vadd.f32 %v2168_v14, %v2119_v53  ;;  %v5730_v16 = vadd.f32 %v2169_v4, %v2120_v45  ;;  %v1692_v14 = vadd.f32 %v5316_v56, %v5136_v63  ;;  %v7443_v4 = vld [vmem:[#allocation47_spill] sm:$0xff] }
 0x326   :  { %v2053_v24 = vpop.permute.xlu1 %2052  ;;  %v2055_v22 = vpop.permute.xlu0 %2054  ;;  %v1693_v3 = vadd.f32 %v7444_v19, %v7443_v4  ;;  %v7445_v53 = vld [vmem:[#allocation59_spill] sm:$0xff]  ;;  %v1981_v38 = vadd.f32 %v7446_v62, %v1836_v1  ;;  %v7460_v19 = vld [vmem:[#allocation44_spill] sm:$0xff]  ;;  %v7461_v62 = vld [vmem:[#allocation49_spill] sm:$0xff] }
 0x327   :  { %7442 = vst [vmem:[#allocation74_spill] sm:$0xff] %v5730_v16  ;;  %v2121_v60 = vadd.f32 %v2053_v24, %v1976_v20  ;;  %v2122_v42 = vadd.f32 %v2055_v22, %v1977_v13  ;;  %v1980_v45 = vadd.f32 %v7445_v53, %v1835_v8  ;;  %v7448_v63 = vld [vmem:[#allocation39_spill] sm:$0xff]  ;;  %v7449_v24 = vld [vmem:[#allocation33_spill] sm:$0xff]  ;;  %v2176_v53 = vmul.f32 %v5683_v48, %v5526_v0 }
 0x328   :  { %2435 = vrot.lane.b32.xlu1 %v2374_v5, %s3560_s7  ;;  %2437 = vrot.lane.b32.xlu0 %v2375_v35, %s3560_s7  ;;  %v2378_v56 = vmul.f32 %v5626_v2, %v7448_v63  ;;  %v2379_v22 = vmul.f32 %v5626_v2, %v7449_v24  ;;  %v2174_v5 = vmul.f32 %v5683_v48, %v5512_v18 }
 0x329   :  { %v5750_v17 = vadd.f32 %v2170_v25, %v2121_v60  ;;  %v5752_v41 = vadd.f32 %v2171_v34, %v2122_v42  ;;  %v2175_v35 = vmul.f32 %v5683_v48, %v5514_v52  ;;  %v7450_v25 = vld [vmem:[#allocation52_spill] sm:$0xff]  ;;  %v1838_v7 = vadd.f32 %v7451_v61, %v1693_v3  ;;  %v7466_v61 = vld [vmem:[#allocation9_spill] sm:$0xff] }
 0x32a   :  { %v2057_v46 = vpop.permute.xlu1 %2056  ;;  %v2059_v6 = vpop.permute.xlu0 %2058  ;;  %v1837_v34 = vadd.f32 %v7450_v25, %v1692_v14  ;;  %v7459_v14 = vld [vmem:[#allocation60_spill] sm:$0xff]  ;;  %v2381_v3 = vmul.f32 %v5626_v2, %v7460_v19 }
 0x32b   :  { %v2123_v23 = vadd.f32 %v2057_v46, %v1978_v10  ;;  %v2124_v30 = vadd.f32 %v2059_v6, %v1979_v47  ;;  %v1694_v10 = vadd.f32 %v7453_v33, %v7452_v32  ;;  %v7454_v47 = vld [vmem:[#allocation30_spill] sm:$0xff]  ;;  %v2380_v4 = vmul.f32 %v5626_v2, %v7459_v14 }
 0x32c   :  { %2439 = vrot.lane.b32.xlu1 %v2376_v27, %s3560_s7  ;;  %2441 = vrot.lane.b32.xlu0 %v2377_v37, %s3560_s7  ;;  %v7455_v46 = vld [vmem:[#allocation22_spill] sm:$0xff]  ;;  %v7456_v27 = vld [vmem:[#allocation45_spill] sm:$0xff] }
 0x32d   :  { %v5774_v15 = vadd.f32 %v2172_v26, %v2123_v23  ;;  %v5776_v12 = vadd.f32 %v2173_v57, %v2124_v30  ;;  %v1695_v6 = vadd.f32 %v7455_v46, %v7454_v47  ;;  %v1982_v37 = vadd.f32 %v7456_v27, %v1837_v34  ;;  %v7457_v26 = vld [vmem:[#allocation23_spill] sm:$0xff]  ;;  %v7465_v34 = vld [vmem:[#allocation65_spill] sm:$0xff]  ;;  %v7468_v33 = vld [vmem:[#allocation10_spill] sm:$0xff] }
 0x32e   :  { %v2061_v20 = vpop.permute.xlu1 %2060  ;;  %v2063_v13 = vpop.permute.xlu0 %2062  ;;  %v1983_v57 = vadd.f32 %v7457_v26, %v1838_v7  ;;  %v1697_v7 = vadd.f32 %v7466_v61, %v7465_v34 }
 0x32f   :  { %7447 = vst [vmem:[#allocation47_spill] sm:$0xff] %v5774_v15  ;;  %v2125_v60 = vadd.f32 %v2061_v20, %v1980_v45  ;;  %v2126_v42 = vadd.f32 %v2063_v13, %v1981_v38  ;;  %v2177_v45 = vmul.f32 %v5683_v48, %v5528_v28  ;;  %v1839_v38 = vadd.f32 %v7461_v62, %v1694_v10  ;;  %v7462_v20 = vld [vmem:[#allocation19_spill] sm:$0xff] }
 0x330   :  { %2443 = vrot.lane.b32.xlu1 %v2378_v56, %s3560_s7  ;;  %2445 = vrot.lane.b32.xlu0 %v2379_v22, %s3560_s7  ;;  %v1840_v13 = vadd.f32 %v7462_v20, %v1695_v6 }
 0x331   :  { %v5796_v8 = vadd.f32 %v2174_v5, %v2125_v60  ;;  %v5798_v1 = vadd.f32 %v2175_v35, %v2126_v42  ;;  %v7463_v5 = vld [vmem:[#allocation31_spill] sm:$0xff]  ;;  %v7464_v35 = vld [vmem:[#allocation12_spill] sm:$0xff]  ;;  %v5817_v60 = vstv %s5770_s26  ;;  %v7467_v42 = vld [vmem:[#allocation57_spill] sm:$0xff] }
 0x332   :  { %v2065_v23 = vpop.permute.xlu1 %2064  ;;  %v2067_v30 = vpop.permute.xlu0 %2066  ;;  %v1696_v25 = vadd.f32 %v7464_v35, %v7463_v5  ;;  %v1984_v32 = vadd.f32 %v7467_v42, %v1839_v38  ;;  %v1985_v10 = vadd.f32 %v7468_v33, %v1840_v13  ;;  %v7473_v13 = vld [vmem:[#allocation40_spill] sm:$0xff]  ;;  %v7475_v5 = vld [vmem:[#allocation37_spill] sm:$0xff]  ;;  %v7476_v35 = vld [vmem:[#allocation51_spill] sm:$0xff] }
 0x333   :  { %7458 = vst [vmem:[#allocation41_spill] sm:$0xff] %v5798_v1  ;;  %v2127_v56 = vadd.f32 %v2065_v23, %v1982_v37  ;;  %v2128_v22 = vadd.f32 %v2067_v30, %v1983_v57  ;;  %v7469_v37 = vld [vmem:[#allocation24_spill] sm:$0xff]  ;;  %v7470_v57 = vld [vmem:[#allocation18_spill] sm:$0xff]  ;;  %v2178_v30 = vmul.f32 %v5683_v48, %v5540_v49  ;;  %v1699_v34 = vadd.f32 %v7476_v35, %v7475_v5  ;;  %v7477_v42 = vld [vmem:[#allocation29_spill] sm:$0xff] }
 0x334   :  { %2447 = vrot.lane.b32.xlu1 %v2380_v4, %s3560_s7  ;;  %2449 = vrot.lane.b32.xlu0 %v2381_v3, %s3560_s7  ;;  %v2382_v26 = vmul.f32 %v5626_v2, %v7469_v37  ;;  %v2383_v23 = vmul.f32 %v5626_v2, %v7470_v57  ;;  %v2179_v4 = vmul.f32 %v5683_v48, %v5542_v59  ;;  %v7471_v3 = vld [vmem:[#allocation73_spill] sm:$0xff]  ;;  %v7486_v5 = vld [vmem:[#allocation70_spill] sm:$0xff] }
 0x335   :  { %v5821_v47 = vadd.f32 %v2176_v53, %v2127_v56  ;;  %v5823_v46 = vadd.f32 %v2177_v45, %v2128_v22  ;;  %v1841_v62 = vadd.f32 %v7471_v3, %v1696_v25  ;;  %v7472_v53 = vld [vmem:[#allocation28_spill] sm:$0xff]  ;;  %v7474_v56 = vld [vmem:[#allocation54_spill] sm:$0xff] }
 0x336   :  { %v2069_v6 = vpop.permute.xlu1 %2068  ;;  %v2071_v27 = vpop.permute.xlu0 %2070  ;;  %v1842_v38 = vadd.f32 %v7472_v53, %v1697_v7  ;;  %v1698_v22 = vadd.f32 %v7474_v56, %v7473_v13  ;;  %v7484_v13 = vld [vmem:[#allocation15_spill] sm:$0xff] }
 0x337   :  { %v2129_v45 = vadd.f32 %v2069_v6, %v1984_v32  ;;  %v2130_v20 = vadd.f32 %v2071_v27, %v1985_v10  ;;  %v1986_v61 = vadd.f32 %v5630_v50, %v1841_v62  ;;  %v7479_v10 = vld [vmem:[#allocation58_spill] sm:$0xff]  ;;  %v2506_v27 = vmul.f32 %v5817_v60, %v5456_v55 }
 0x338   :  { %2451 = vrot.lane.b32.xlu1 %v2382_v26, %s3560_s7  ;;  %2453 = vrot.lane.b32.xlu0 %v2383_v23, %s3560_s7  ;;  %v1987_v33 = vadd.f32 %v7477_v42, %v1842_v38  ;;  %v2384_v6 = vmul.f32 %v5626_v2, %v7479_v10  ;;  %v2180_v26 = vmul.f32 %v5683_v48, %v5554_v36  ;;  %v7480_v23 = vld [vmem:[#allocation13_spill] sm:$0xff]  ;;  %v7485_v2 = vld [vmem:[#allocation43_spill] sm:$0xff]  ;;  %v7487_v42 = vld [vmem:[#allocation14_spill] sm:$0xff] }
 0x339   :  { %v5843_v1 = vadd.f32 %v2178_v30, %v2129_v45  ;;  %v5845_v25 = vadd.f32 %v2179_v4, %v2130_v20  ;;  %v2181_v50 = vmul.f32 %v5683_v48, %v5556_v9  ;;  %v1843_v3 = vadd.f32 %v7480_v23, %v1698_v22  ;;  %v7481_v30 = vld [vmem:[#allocation61_spill] sm:$0xff]  ;;  %v7483_v45 = vld [vmem:[#allocation34_spill] sm:$0xff] }
 0x33a   :  { %v2073_v7 = vpop.permute.xlu1 %2072  ;;  %v2075_v32 = vpop.permute.xlu0 %2074  ;;  %v1844_v62 = vadd.f32 %v7481_v30, %v1699_v34  ;;  %v7482_v38 = vld [vmem:[#allocation21_spill] sm:$0xff]  ;;  %v1701_v56 = vadd.f32 %v7485_v2, %v7484_v13  ;;  %v7496_v2 = vld [vmem:[#allocation72_spill] sm:$0xff] }
 0x33b   :  { %7478 = vst [vmem:[#allocation59_spill] sm:$0xff] %v5843_v1  ;;  %v2131_v4 = vadd.f32 %v2073_v7, %v1986_v61  ;;  %v2132_v53 = vadd.f32 %v2075_v32, %v1987_v33  ;;  %v1700_v20 = vadd.f32 %v7483_v45, %v7482_v38  ;;  %v1988_v35 = vadd.f32 %v7486_v5, %v1843_v3  ;;  %v7494_v38 = vld [vmem:[#allocation16_spill] sm:$0xff]  ;;  %v7495_v45 = vld [vmem:[#allocation67_spill] sm:$0xff] }
 0x33c   :  { %2455 = vrot.lane.b32.xlu1 %v2384_v6, %s3560_s7  ;;  %2554 = vrot.lane.b32.xlu0 %v2506_v27, %s3561_s9  ;;  %v1989_v1 = vadd.f32 %v7487_v42, %v1844_v62  ;;  %v2507_v33 = vmul.f32 %v5817_v60, %v5470_v29  ;;  %v2508_v7 = vmul.f32 %v5817_v60, %v5472_v54  ;;  %v7490_v27 = vld [vmem:[#allocation50_spill] sm:$0xff]  ;;  %v7492_v62 = vld [vmem:[#allocation56_spill] sm:$0xff]  ;;  %v7497_v42 = vld [vmem:[#allocation55_spill] sm:$0xff] }
 0x33d   :  { %v5865_v15 = vadd.f32 %v2180_v26, %v2131_v4  ;;  %v5867_v22 = vadd.f32 %v2181_v50, %v2132_v53  ;;  %v2182_v32 = vmul.f32 %v5683_v48, %v5568_v44  ;;  %v2183_v6 = vmul.f32 %v5683_v48, %v5570_v58  ;;  %v7491_v26 = vld [vmem:[#allocation20_spill] sm:$0xff]  ;;  %v7493_v4 = vld [vmem:[#allocation27_spill] sm:$0xff] }
 0x33e   :  { %v2077_v34 = vpop.permute.xlu1 %2076  ;;  %v2079_v61 = vpop.permute.xlu0 %2078  ;;  %v1845_v23 = vadd.f32 %v7490_v27, %v1700_v20  ;;  %v1846_v3 = vadd.f32 %v7491_v26, %v1701_v56  ;;  %v1702_v53 = vadd.f32 %v7493_v4, %v7492_v62  ;;  %v1703_v13 = vadd.f32 %v7495_v45, %v7494_v38  ;;  %v7504_v62 = vld [vmem:[#allocation26_spill] sm:$0xff]  ;;  %v7506_v45 = vld [vmem:[#allocation36_spill] sm:$0xff] }
 0x33f   :  { %7488 = vst [vmem:[#allocation17_spill] sm:$0xff] %v5865_v15  ;;  %7489 = vst [vmem:[#allocation39_spill] sm:$0xff] %v5867_v22  ;;  %v2133_v50 = vadd.f32 %v2077_v34, %v1988_v35  ;;  %v2134_v30 = vadd.f32 %v2079_v61, %v1989_v1  ;;  %v2509_v35 = vmul.f32 %v5817_v60, %v5484_v31  ;;  %v7505_v4 = vld [vmem:[#allocation62_spill] sm:$0xff] }
 0x340   :  { %2556 = vrot.lane.b32.xlu1 %v2507_v33, %s3561_s9  ;;  %2558 = vrot.lane.b32.xlu0 %v2508_v7, %s3561_s9  ;;  %v1990_v5 = vadd.f32 %v7496_v2, %v1845_v23  ;;  %v1991_v22 = vadd.f32 %v7497_v42, %v1846_v3  ;;  %v2510_v34 = vmul.f32 %v5817_v60, %v5486_v51  ;;  %v7500_v7 = vld [vmem:[#allocation32_spill] sm:$0xff]  ;;  %v7502_v3 = vld [vmem:[#allocation53_spill] sm:$0xff]  ;;  %v7507_v42 = vld [vmem:[#allocation71_spill] sm:$0xff] }
 0x341   :  { %v5887_v16 = vadd.f32 %v2182_v32, %v2133_v50  ;;  %v5889_v20 = vadd.f32 %v2183_v6, %v2134_v30  ;;  %v2184_v61 = vmul.f32 %v5683_v48, %v7448_v63  ;;  %v2185_v33 = vmul.f32 %v5683_v48, %v7449_v24  ;;  %v7501_v32 = vld [vmem:[#allocation11_spill] sm:$0xff]  ;;  %v7503_v50 = vld [vmem:[#allocation42_spill] sm:$0xff] }
 0x342   :  { %v2081_v56 = vpop.permute.xlu1 %2080  ;;  %v2083_v1 = vpop.permute.xlu0 %2082  ;;  %v1847_v27 = vadd.f32 %v7500_v7, %v1702_v53  ;;  %v1848_v23 = vadd.f32 %v7501_v32, %v1703_v13  ;;  %v1704_v30 = vadd.f32 %v7503_v50, %v7502_v3  ;;  %v1705_v38 = vadd.f32 %v7505_v4, %v7504_v62  ;;  %v7514_v3 = vld [vmem:[#allocation46_spill] sm:$0xff]  ;;  %v7515_v62 = vld [vmem:[#allocation64_spill] sm:$0xff] }
 0x343   :  { %7498 = vst [vmem:[#allocation33_spill] sm:$0xff] %v5887_v16  ;;  %7499 = vst [vmem:[#allocation52_spill] sm:$0xff] %v5889_v20  ;;  %v2135_v6 = vadd.f32 %v2081_v56, %v1990_v5  ;;  %v2136_v26 = vadd.f32 %v2083_v1, %v1991_v22  ;;  %v2511_v5 = vmul.f32 %v5817_v60, %v5498_v21 }
 0x344   :  { %2560 = vrot.lane.b32.xlu1 %v2509_v35, %s3561_s9  ;;  %2562 = vrot.lane.b32.xlu0 %v2510_v34, %s3561_s9  ;;  %v1992_v2 = vadd.f32 %v7506_v45, %v1847_v27  ;;  %v1993_v20 = vadd.f32 %v7507_v42, %v1848_v23  ;;  %v2512_v56 = vmul.f32 %v5817_v60, %v5500_v11  ;;  %v7510_v34 = vld [vmem:[#allocation68_spill] sm:$0xff]  ;;  %v7512_v23 = vld [vmem:[#allocation66_spill] sm:$0xff] }
 0x345   :  { %v5909_v16 = vadd.f32 %v2184_v61, %v2135_v6  ;;  %v5911_v53 = vadd.f32 %v2185_v33, %v2136_v26  ;;  %v2186_v1 = vmul.f32 %v5683_v48, %v7459_v14  ;;  %v2187_v35 = vmul.f32 %v5683_v48, %v7460_v19  ;;  %v7511_v61 = vld [vmem:[#allocation69_spill] sm:$0xff]  ;;  %v7513_v6 = vld [vmem:[#allocation63_spill] sm:$0xff] }
 0x346   :  { %v2085_v13 = vpop.permute.xlu1 %2084  ;;  %v2087_v22 = vpop.permute.xlu0 %2086  ;;  %v1849_v7 = vadd.f32 %v7510_v34, %v1704_v30  ;;  %v1850_v27 = vadd.f32 %v7511_v61, %v1705_v38  ;;  %v1706_v26 = vadd.f32 %v7513_v6, %v7512_v23  ;;  %v2514_v38 = vmul.f32 %v5817_v60, %v5514_v52 }
 0x347   :  { %7508 = vst [vmem:[#allocation35_spill] sm:$0xff] %v5909_v16  ;;  %7509 = vst [vmem:[#allocation48_spill] sm:$0xff] %v5911_v53  ;;  %v2137_v33 = vadd.f32 %v2085_v13, %v1992_v2  ;;  %v2138_v32 = vadd.f32 %v2087_v22, %v1993_v20  ;;  %v2513_v20 = vmul.f32 %v5817_v60, %v5512_v18  ;;  %v7518_v13 = vld [vmem:[#allocation38_spill] sm:$0xff]  ;;  %v6269_v53 = vld [vmem:[#allocation2 + $0x94] sm:$0xff] }
 0x348   :  { %2564 = vrot.lane.b32.xlu1 %v2511_v5, %s3561_s9  ;;  %2566 = vrot.lane.b32.xlu0 %v2512_v56, %s3561_s9  ;;  %v1994_v50 = vadd.f32 %v7514_v3, %v1849_v7  ;;  %v1995_v4 = vadd.f32 %v7515_v62, %v1850_v27  ;;  %v2188_v2 = vmul.f32 %v5683_v48, %v7469_v37 }
 0x349   :  { %v5929_v45 = vadd.f32 %v2186_v1, %v2137_v33  ;;  %v5931_v42 = vadd.f32 %v2187_v35, %v2138_v32  ;;  %v1851_v22 = vadd.f32 %v7518_v13, %v1706_v26  ;;  %v2189_v1 = vmul.f32 %v5683_v48, %v7470_v57 }
 0x34a   :  { %v2089_v30 = vpop.permute.xlu1 %2088  ;;  %v2091_v34 = vpop.permute.xlu0 %2090  ;;  %v2515_v32 = vmul.f32 %v5817_v60, %v5526_v0  ;;  %v2516_v23 = vmul.f32 %v5817_v60, %v5528_v28  ;;  %v2190_v26 = vmul.f32 %v5683_v48, %v7479_v10  ;;  %v2517_v62 = vmul.f32 %v5817_v60, %v5540_v49 }
 0x34b   :  { %7516 = vst [vmem:[#allocation25_spill] sm:$0xff] %v5929_v45  ;;  %7517 = vst [vmem:[#allocation30_spill] sm:$0xff] %v5931_v42  ;;  %v2139_v5 = vadd.f32 %v2089_v30, %v1994_v50  ;;  %v2140_v56 = vadd.f32 %v2091_v34, %v1995_v4  ;;  %v1996_v35 = vadd.f32 %v5690_v40, %v1851_v22  ;;  %v6157_v42 = vld [vmem:[#allocation2 + $0xc] sm:$0xff] }
 0x34c   :  { %2568 = vrot.lane.b32.xlu1 %v2513_v20, %s3561_s9  ;;  %2570 = vrot.lane.b32.xlu0 %v2514_v38, %s3561_s9  ;;  %v2518_v4 = vmul.f32 %v5817_v60, %v5542_v59  ;;  %v2519_v34 = vmul.f32 %v5817_v60, %v5554_v36  ;;  %v2520_v20 = vmul.f32 %v5817_v60, %v5556_v9 }
 0x34d   :  { %v5945_v7 = vadd.f32 %v2188_v2, %v2139_v5  ;;  %v5947_v61 = vadd.f32 %v2189_v1, %v2140_v56  ;;  %v2521_v13 = vmul.f32 %v5817_v60, %v5568_v44  ;;  %v2522_v22 = vmul.f32 %v5817_v60, %v5570_v58 }
 0x34e   :  { %v2093_v27 = vpop.permute.xlu1 %2092  ;;  %v5949_v33 = vpop.permute.xlu0 %2264  ;;  %v2523_v1 = vmul.f32 %v5817_v60, %v7448_v63 }
 0x34f   :  { %7519 = vst [vmem:[#allocation22_spill] sm:$0xff] %v5945_v7  ;;  %7520 = vst [vmem:[#allocation45_spill] sm:$0xff] %v5947_v61  ;;  %v2141_v6 = vadd.f32 %v2093_v27, %v1996_v35  ;;  %v2524_v35 = vmul.f32 %v5817_v60, %v7449_v24 }
 0x350   :  { %2572 = vrot.lane.b32.xlu1 %v2515_v32, %s3561_s9  ;;  %2574 = vrot.lane.b32.xlu0 %v2516_v23, %s3561_s9  ;;  %v2525_v23 = vmul.f32 %v5817_v60, %v7459_v14 }
 0x351   :  { %v5959_v40 = vadd.f32 %v2190_v26, %v2141_v6  ;;  %v2526_v6 = vmul.f32 %v5817_v60, %v7460_v19 }
 0x352   :  { %v5961_v3 = vpop.permute.xlu1 %2266  ;;  %v5963_v50 = vpop.permute.xlu0 %2268 }
 0x353   :  { %7521 = vst [vmem:[#allocation23_spill] sm:$0xff] %v5959_v40  ;;  %7522 = vst [vmem:[#allocation60_spill] sm:$0xff] %v5963_v50  ;;  %v6227_v50 = vld [vmem:[#allocation2 + $0x64] sm:$0xff] }
 0x354   :  { %2576 = vrot.lane.b32.xlu1 %v2517_v62, %s3561_s9  ;;  %2578 = vrot.lane.b32.xlu0 %v2518_v4, %s3561_s9  ;;  %v2527_v4 = vmul.f32 %v5817_v60, %v7469_v37 }
 0x356   :  { %v5971_v48 = vpop.permute.xlu1 %2270  ;;  %v5973_v30 = vpop.permute.xlu0 %2272 }
 0x358   :  { %2580 = vrot.lane.b32.xlu1 %v2519_v34, %s3561_s9  ;;  %2582 = vrot.lane.b32.xlu0 %v2520_v20, %s3561_s9  ;;  %v2528_v34 = vmul.f32 %v5817_v60, %v7470_v57  ;;  %v6019_v20 = vstv %s3498_s27 }
 0x35a   :  { %v5981_v38 = vpop.permute.xlu1 %2274  ;;  %v5983_v2 = vpop.permute.xlu0 %2276 }
 0x35b   :  { %7523 = vst [vmem:[#allocation44_spill] sm:$0xff] %v5981_v38 }
 0x35c   :  { %2584 = vrot.lane.b32.xlu1 %v2521_v13, %s3561_s9  ;;  %2586 = vrot.lane.b32.xlu0 %v2522_v22, %s3561_s9 }
 0x35e   :  { %v5991_v5 = vpop.permute.xlu1 %2278  ;;  %v5993_v56 = vpop.permute.xlu0 %2280 }
 0x35f   :  { %7524 = vst [vmem:[#allocation49_spill] sm:$0xff] %v5993_v56 }
 0x360   :  { %2588 = vrot.lane.b32.xlu1 %v2523_v1, %s3561_s9  ;;  %2590 = vrot.lane.b32.xlu0 %v2524_v35, %s3561_s9  ;;  %v2529_v1 = vmul.f32 %v5817_v60, %v7479_v10  ;;  %v2651_v35 = vmul.f32 %v6019_v20, %v5456_v55 }
 0x362   :  { %v6001_v27 = vpop.permute.xlu1 %2282  ;;  %v6003_v32 = vpop.permute.xlu0 %2284 }
 0x364   :  { %2592 = vrot.lane.b32.xlu1 %v2525_v23, %s3561_s9  ;;  %2594 = vrot.lane.b32.xlu0 %v2526_v6, %s3561_s9 }
 0x366   :  { %v6011_v26 = vpop.permute.xlu1 %2286  ;;  %v6013_v62 = vpop.permute.xlu0 %2288 }
 0x367   :  { %7525 = vst [vmem:[#allocation19_spill] sm:$0xff] %v6011_v26  ;;  %v6185_v26 = vld [vmem:[#allocation2 + $0x34] sm:$0xff] }
 0x368   :  { %2596 = vrot.lane.b32.xlu1 %v2527_v4, %s3561_s9  ;;  %2598 = vrot.lane.b32.xlu0 %v2528_v34, %s3561_s9  ;;  %v2652_v4 = vmul.f32 %v6019_v20, %v5470_v29  ;;  %v2653_v34 = vmul.f32 %v6019_v20, %v5472_v54  ;;  %7551 = vst [vmem:[#allocation20_spill] sm:$0xff] %v6185_v26 }
 0x36a   :  { %v6023_v13 = vpop.permute.xlu1 %2290  ;;  %v6025_v22 = vpop.permute.xlu0 %2292 }
 0x36b   :  { %7526 = vst [vmem:[#allocation31_spill] sm:$0xff] %v6023_v13  ;;  %7527 = vst [vmem:[#allocation12_spill] sm:$0xff] %v6025_v22  ;;  %v6297_v13 = vld [vmem:[#allocation2 + $0xb4] sm:$0xff] }
 0x36c   :  { %2600 = vrot.lane.b32.xlu1 %v2529_v1, %s3561_s9  ;;  %2699 = vrot.lane.b32.xlu0 %v2651_v35, %s3562_s11  ;;  %v2654_v1 = vmul.f32 %v6019_v20, %v5484_v31  ;;  %v2655_v35 = vmul.f32 %v6019_v20, %v5486_v51  ;;  %7563 = vst [vmem:[#allocation62_spill] sm:$0xff] %v6297_v13 }
 0x36e   :  { %v6033_v23 = vpop.permute.xlu1 %2294  ;;  %v6035_v6 = vpop.permute.xlu0 %2296 }
 0x36f   :  { %7528 = vst [vmem:[#allocation65_spill] sm:$0xff] %v6033_v23  ;;  %7529 = vst [vmem:[#allocation9_spill] sm:$0xff] %v6035_v6  ;;  %v6283_v6 = vld [vmem:[#allocation2 + $0x9c] sm:$0xff] }
 0x370   :  { %2701 = vrot.lane.b32.xlu1 %v2652_v4, %s3562_s11  ;;  %2703 = vrot.lane.b32.xlu0 %v2653_v34, %s3562_s11  ;;  %v2656_v4 = vmul.f32 %v6019_v20, %v5498_v21  ;;  %v2657_v34 = vmul.f32 %v6019_v20, %v5500_v11  ;;  %7561 = vst [vmem:[#allocation42_spill] sm:$0xff] %v6283_v6 }
 0x372   :  { %v6043_v60 = vpop.permute.xlu1 %2298  ;;  %v6045_v55 = vpop.permute.xlu0 %2300 }
 0x373   :  { %7530 = vst [vmem:[#allocation57_spill] sm:$0xff] %v6043_v60  ;;  %7531 = vst [vmem:[#allocation10_spill] sm:$0xff] %v6045_v55 }
 0x374   :  { %2705 = vrot.lane.b32.xlu1 %v2654_v1, %s3562_s11  ;;  %2707 = vrot.lane.b32.xlu0 %v2655_v35, %s3562_s11  ;;  %v2658_v1 = vmul.f32 %v6019_v20, %v5512_v18  ;;  %v2659_v35 = vmul.f32 %v6019_v20, %v5514_v52 }
 0x376   :  { %v6053_v29 = vpop.permute.xlu1 %2302  ;;  %v6055_v54 = vpop.permute.xlu0 %2304 }
 0x377   :  { %7532 = vst [vmem:[#allocation24_spill] sm:$0xff] %v6053_v29  ;;  %7533 = vst [vmem:[#allocation18_spill] sm:$0xff] %v6055_v54  ;;  %v6141_v54 = vld [vmem:[#allocation2 + $0x4] sm:$0xff] }
 0x378   :  { %2709 = vrot.lane.b32.xlu1 %v2656_v4, %s3562_s11  ;;  %2711 = vrot.lane.b32.xlu0 %v2657_v34, %s3562_s11  ;;  %v2660_v4 = vmul.f32 %v6019_v20, %v5526_v0  ;;  %v2661_v34 = vmul.f32 %v6019_v20, %v5528_v28  ;;  %v6255_v29 = vld [vmem:[#allocation2 + $0x84] sm:$0xff] }
 0x37a   :  { %v6063_v31 = vpop.permute.xlu1 %2306  ;;  %v6065_v51 = vpop.permute.xlu0 %2308 }
 0x37b   :  { %7534 = vst [vmem:[#allocation73_spill] sm:$0xff] %v6063_v31  ;;  %7535 = vst [vmem:[#allocation28_spill] sm:$0xff] %v6065_v51  ;;  %v6241_v31 = vld [vmem:[#allocation2 + $0x6c] sm:$0xff] }
 0x37c   :  { %2713 = vrot.lane.b32.xlu1 %v2658_v1, %s3562_s11  ;;  %2715 = vrot.lane.b32.xlu0 %v2659_v35, %s3562_s11  ;;  %v2662_v1 = vmul.f32 %v6019_v20, %v5540_v49  ;;  %v2663_v35 = vmul.f32 %v6019_v20, %v5542_v59 }
 0x37e   :  { %v6073_v21 = vpop.permute.xlu1 %2310  ;;  %v6075_v11 = vpop.permute.xlu0 %2409 }
 0x37f   :  { %7536 = vst [vmem:[#allocation40_spill] sm:$0xff] %v6073_v21  ;;  %v6213_v21 = vld [vmem:[#allocation2 + $0x54] sm:$0xff] }
 0x380   :  { %2717 = vrot.lane.b32.xlu1 %v2660_v4, %s3562_s11  ;;  %2719 = vrot.lane.b32.xlu0 %v2661_v34, %s3562_s11  ;;  %v2664_v4 = vmul.f32 %v6019_v20, %v5554_v36  ;;  %v2665_v34 = vmul.f32 %v6019_v20, %v5556_v9 }
 0x382   :  { %v6083_v18 = vpop.permute.xlu1 %2411  ;;  %v6085_v52 = vpop.permute.xlu0 %2413 }
 0x383   :  { %7537 = vst [vmem:[#allocation54_spill] sm:$0xff] %v6085_v52 }
 0x384   :  { %2721 = vrot.lane.b32.xlu1 %v2662_v1, %s3562_s11  ;;  %2723 = vrot.lane.b32.xlu0 %v2663_v35, %s3562_s11  ;;  %v2666_v1 = vmul.f32 %v6019_v20, %v5568_v44  ;;  %v2667_v35 = vmul.f32 %v6019_v20, %v5570_v58 }
 0x386   :  { %v6093_v0 = vpop.permute.xlu1 %2415  ;;  %v6095_v28 = vpop.permute.xlu0 %2417 }
 0x388   :  { %2725 = vrot.lane.b32.xlu1 %v2664_v4, %s3562_s11  ;;  %2727 = vrot.lane.b32.xlu0 %v2665_v34, %s3562_s11  ;;  %v2668_v4 = vmul.f32 %v6019_v20, %v7448_v63  ;;  %v2669_v34 = vmul.f32 %v6019_v20, %v7449_v24 }
 0x38a   :  { %v6103_v49 = vpop.permute.xlu1 %2419  ;;  %v6105_v59 = vpop.permute.xlu0 %2421 }
 0x38b   :  { %7538 = vst [vmem:[#allocation37_spill] sm:$0xff] %v6103_v49  ;;  %v6199_v49 = vld [vmem:[#allocation2 + $0x3c] sm:$0xff] }
 0x38c   :  { %2729 = vrot.lane.b32.xlu1 %v2666_v1, %s3562_s11  ;;  %2731 = vrot.lane.b32.xlu0 %v2667_v35, %s3562_s11  ;;  %v2670_v1 = vmul.f32 %v6019_v20, %v7459_v14  ;;  %v2671_v35 = vmul.f32 %v6019_v20, %v7460_v19  ;;  %v6143_v14 = vstv %s3500_s28  ;;  %v6147_v19 = vld [vmem:[#allocation2 + $0x14] sm:$0xf] }
 0x38d   :  { %v2870_v16 = vmul.f32 %v6143_v14, %v6157_v42  ;;  %v2875_v56 = vmul.f32 %v6143_v14, %v6185_v26  ;;  %v2876_v52 = vmul.f32 %v6143_v14, %v6199_v49  ;;  %v2881_v61 = vmul.f32 %v6143_v14, %v6227_v50 }
 0x38e   :  { %v6113_v36 = vpop.permute.xlu1 %2423  ;;  %v6115_v9 = vpop.permute.xlu0 %2425  ;;  %v2885_v55 = vmul.f32 %v6143_v14, %v6255_v29 }
 0x38f   :  { %7539 = vst [vmem:[#allocation51_spill] sm:$0xff] %v6115_v9 }
 0x390   :  { %2733 = vrot.lane.b32.xlu1 %v2668_v4, %s3562_s11  ;;  %2735 = vrot.lane.b32.xlu0 %v2669_v34, %s3562_s11  ;;  %v2672_v4 = vmul.f32 %v6019_v20, %v7469_v37  ;;  %v2673_v34 = vmul.f32 %v6019_v20, %v7470_v57  ;;  %v2674_v37 = vmul.f32 %v6019_v20, %v7479_v10  ;;  %v6169_v10 = vld [vmem:[#allocation2 + $0x1c] sm:$0xff]  ;;  %v6171_v20 = vld [vmem:[#allocation2 + $0x24] sm:$0xff] }
 0x391   :  { %v2869_v57 = vmul.f32 %v6143_v14, %v6141_v54  ;;  %7546 = vst [vmem:[#allocation15_spill] sm:$0xff] %v6169_v10  ;;  %7547 = vst [vmem:[#allocation43_spill] sm:$0xff] %v6171_v20  ;;  %v2872_v22 = vmul.f32 %v6143_v14, %v6169_v10 }
 0x392   :  { %v6123_v58 = vpop.permute.xlu1 %2427  ;;  %v6125_v44 = vpop.permute.xlu0 %2429 }
 0x394   :  { %2737 = vrot.lane.b32.xlu1 %v2670_v1, %s3562_s11  ;;  %2739 = vrot.lane.b32.xlu0 %v2671_v35, %s3562_s11 }
 0x396   :  { %v6133_v63 = vpop.permute.xlu1 %2431  ;;  %v6135_v24 = vpop.permute.xlu0 %2433 }
 0x397   :  { %7540 = vst [vmem:[#allocation29_spill] sm:$0xff] %v6133_v63  ;;  %7541 = vst [vmem:[#allocation58_spill] sm:$0xff] %v6135_v24  ;;  %v2873_v63 = vmul.f32 %v6143_v14, %v6171_v20 }
 0x398   :  { %2741 = vrot.lane.b32.xlu1 %v2672_v4, %s3562_s11  ;;  %2743 = vrot.lane.b32.xlu0 %v2673_v34, %s3562_s11  ;;  %v2871_v4 = vmul.f32 %v6143_v14, %v6147_v19 }
 0x39a   :  { %v6149_v1 = vpop.permute.xlu1 %2435  ;;  %v6151_v35 = vpop.permute.xlu0 %2437 }
 0x39b   :  { %7542 = vst [vmem:[#allocation13_spill] sm:$0xff] %v6149_v1  ;;  %7543 = vst [vmem:[#allocation61_spill] sm:$0xff] %v6151_v35  ;;  %v6295_v1 = vld [vmem:[#allocation2 + $0xac] sm:$0xff] }
 0x39c   :  { %2745 = vrot.lane.b32.xlu1 %v2674_v37, %s3562_s11  ;;  %2917 = vrot.lane.b32.xlu0 %v2869_v57, %s3559_s5  ;;  %v6175_v37 = vld [vmem:[#allocation2 + $0x2c] sm:$0xf]  ;;  %v2890_v24 = vmul.f32 %v6143_v14, %v6295_v1 }
 0x39d   :  { %7548 = vst [vmem:[#allocation70_spill] sm:$0xff] %v6175_v37 }
 0x39e   :  { %v6163_v34 = vpop.permute.xlu1 %2439  ;;  %v6165_v60 = vpop.permute.xlu0 %2441 }
 0x39f   :  { %7544 = vst [vmem:[#allocation21_spill] sm:$0xff] %v6163_v34  ;;  %7545 = vst [vmem:[#allocation34_spill] sm:$0xff] %v6165_v60  ;;  %v2887_v34 = vmul.f32 %v6143_v14, %v6269_v53 }
 0x3a0   :  { %2919 = vrot.lane.b32.xlu1 %v2870_v16, %s3559_s5  ;;  %2921 = vrot.lane.b32.xlu0 %v2871_v4, %s3559_s5  ;;  %v2874_v16 = vmul.f32 %v6143_v14, %v6175_v37  ;;  %v6191_v4 = vld [vmem:[#allocation2 + $0x44] sm:$0xf] }
 0x3a2   :  { %v6177_v57 = vpop.permute.xlu1 %2443  ;;  %v6179_v35 = vpop.permute.xlu0 %2445 }
 0x3a3   :  { %7549 = vst [vmem:[#allocation14_spill] sm:$0xff] %v6177_v57  ;;  %7550 = vst [vmem:[#allocation50_spill] sm:$0xff] %v6179_v35 }
 0x3a4   :  { %2923 = vrot.lane.b32.xlu1 %v2872_v22, %s3559_s5  ;;  %2925 = vrot.lane.b32.xlu0 %v2873_v63, %s3559_s5  ;;  %v2877_v22 = vmul.f32 %v6143_v14, %v6191_v4 }
 0x3a6   :  { %v6193_v57 = vpop.permute.xlu1 %2447  ;;  %v6195_v9 = vpop.permute.xlu0 %2449 }
 0x3a7   :  { %7552 = vst [vmem:[#allocation56_spill] sm:$0xff] %v6193_v57  ;;  %7553 = vst [vmem:[#allocation27_spill] sm:$0xff] %v6195_v9  ;;  %v6211_v9 = vld [vmem:[#allocation2 + $0x4c] sm:$0xff]  ;;  %v2882_v57 = vmul.f32 %v6143_v14, %v6241_v31 }
 0x3a8   :  { %2927 = vrot.lane.b32.xlu1 %v2874_v16, %s3559_s5  ;;  %2929 = vrot.lane.b32.xlu0 %v2875_v56, %s3559_s5  ;;  %v6217_v16 = vld [vmem:[#allocation2 + $0x5c] sm:$0xf] }
 0x3a9   :  { %7556 = vst [vmem:[#allocation72_spill] sm:$0xff] %v6217_v16 }
 0x3aa   :  { %v6205_v63 = vpop.permute.xlu1 %2451  ;;  %v6207_v38 = vpop.permute.xlu0 %2453 }
 0x3ab   :  { %7554 = vst [vmem:[#allocation16_spill] sm:$0xff] %v6205_v63  ;;  %7555 = vst [vmem:[#allocation67_spill] sm:$0xff] %v6207_v38  ;;  %v2878_v38 = vmul.f32 %v6143_v14, %v6211_v9  ;;  %v2879_v63 = vmul.f32 %v6143_v14, %v6213_v21 }
 0x3ac   :  { %2931 = vrot.lane.b32.xlu1 %v2876_v52, %s3559_s5  ;;  %2933 = vrot.lane.b32.xlu0 %v2877_v22, %s3559_s5  ;;  %v2880_v52 = vmul.f32 %v6143_v14, %v6217_v16  ;;  %v6233_v22 = vld [vmem:[#allocation2 + $0x74] sm:$0xf] }
 0x3ae   :  { %v6219_v56 = vpop.permute.xlu1 %2455  ;;  %v6221_v40 = vpop.permute.xlu0 %2554 }
 0x3af   :  { %7557 = vst [vmem:[#allocation55_spill] sm:$0xff] %v6219_v56 }
 0x3b0   :  { %2935 = vrot.lane.b32.xlu1 %v2878_v38, %s3559_s5  ;;  %2937 = vrot.lane.b32.xlu0 %v2879_v63, %s3559_s5  ;;  %v2883_v38 = vmul.f32 %v6143_v14, %v6233_v22 }
 0x3b2   :  { %v6235_v56 = vpop.permute.xlu1 %2556  ;;  %v6237_v51 = vpop.permute.xlu0 %2558 }
 0x3b3   :  { %7558 = vst [vmem:[#allocation32_spill] sm:$0xff] %v6237_v51  ;;  %v6253_v51 = vld [vmem:[#allocation2 + $0x7c] sm:$0xff] }
 0x3b4   :  { %2939 = vrot.lane.b32.xlu1 %v2880_v52, %s3559_s5  ;;  %2941 = vrot.lane.b32.xlu0 %v2881_v61, %s3559_s5  ;;  %v6259_v52 = vld [vmem:[#allocation2 + $0x8c] sm:$0xf]  ;;  %v2884_v35 = vmul.f32 %v6143_v14, %v6253_v51 }
 0x3b6   :  { %v6247_v63 = vpop.permute.xlu1 %2560  ;;  %v6249_v7 = vpop.permute.xlu0 %2562 }
 0x3b8   :  { %2943 = vrot.lane.b32.xlu1 %v2882_v57, %s3559_s5  ;;  %2945 = vrot.lane.b32.xlu0 %v2883_v38, %s3559_s5  ;;  %v2886_v57 = vmul.f32 %v6143_v14, %v6259_v52  ;;  %v6275_v38 = vld [vmem:[#allocation2 + $0xa4] sm:$0xf] }
 0x3ba   :  { %v6261_v61 = vpop.permute.xlu1 %2564  ;;  %v6263_v45 = vpop.permute.xlu0 %2566 }
 0x3bb   :  { %7559 = vst [vmem:[#allocation11_spill] sm:$0xff] %v6261_v61 }
 0x3bc   :  { %2947 = vrot.lane.b32.xlu1 %v2884_v35, %s3559_s5  ;;  %2949 = vrot.lane.b32.xlu0 %v2885_v55, %s3559_s5  ;;  %v2889_v55 = vmul.f32 %v6143_v14, %v6275_v38 }
 0x3be   :  { %v6277_v61 = vpop.permute.xlu1 %2568  ;;  %v6279_v60 = vpop.permute.xlu0 %2570 }
 0x3bf   :  { %7560 = vst [vmem:[#allocation53_spill] sm:$0xff] %v6279_v60  ;;  %v2888_v60 = vmul.f32 %v6143_v14, %v6283_v6  ;;  %v2891_v6 = vmul.f32 %v6143_v14, %v6297_v13 }
 0x3c0   :  { %2951 = vrot.lane.b32.xlu1 %v2886_v57, %s3559_s5  ;;  %2953 = vrot.lane.b32.xlu0 %v2887_v34, %s3559_s5  ;;  %v6301_v57 = vld [vmem:[#allocation2 + $0xbc] sm:$0xf] }
 0x3c2   :  { %v6289_v35 = vpop.permute.xlu1 %2572  ;;  %v6291_v23 = vpop.permute.xlu0 %2574 }
 0x3c3   :  { %7562 = vst [vmem:[#allocation26_spill] sm:$0xff] %v6291_v23  ;;  %v6311_v23 = vstv %s3501_s0 }
 0x3c4   :  { %2955 = vrot.lane.b32.xlu1 %v2888_v60, %s3559_s5  ;;  %2957 = vrot.lane.b32.xlu0 %v2889_v55, %s3559_s5  ;;  %v2892_v60 = vmul.f32 %v6143_v14, %v6301_v57  ;;  %v3016_v13 = vmul.f32 %v6311_v23, %v6147_v19  ;;  %v3015_v14 = vmul.f32 %v6311_v23, %v6157_v42 }
 0x3c6   :  { %v6303_v34 = vpop.permute.xlu1 %2576  ;;  %v6305_v15 = vpop.permute.xlu0 %2578 }
 0x3c7   :  { %7564 = vst [vmem:[#allocation36_spill] sm:$0xff] %v6303_v34  ;;  %7565 = vst [vmem:[#allocation71_spill] sm:$0xff] %v6305_v15  ;;  %v3014_v15 = vmul.f32 %v6311_v23, %v6141_v54 }
 0x3c8   :  { %2959 = vrot.lane.b32.xlu1 %v2890_v24, %s3559_s5  ;;  %2961 = vrot.lane.b32.xlu0 %v2891_v6, %s3559_s5 }
 0x3ca   :  { %v6317_v55 = vpop.permute.xlu1 %2580  ;;  %v6319_v34 = vpop.permute.xlu0 %2582 }
 0x3cb   :  { %7566 = vst [vmem:[#allocation68_spill] sm:$0xff] %v6317_v55  ;;  %7567 = vst [vmem:[#allocation69_spill] sm:$0xff] %v6319_v34 }
 0x3cc   :  { %2963 = vrot.lane.b32.xlu1 %v2892_v60, %s3559_s5  ;;  %3062 = vrot.lane.b32.xlu0 %v3014_v15, %s3560_s7  ;;  %v3017_v15 = vmul.f32 %v6311_v23, %v6169_v10  ;;  %v3018_v60 = vmul.f32 %v6311_v23, %v6171_v20 }
 0x3ce   :  { %v6327_v24 = vpop.permute.xlu1 %2584  ;;  %v6329_v6 = vpop.permute.xlu0 %2586 }
 0x3cf   :  { %7568 = vst [vmem:[#allocation66_spill] sm:$0xff] %v6329_v6  ;;  %v3019_v6 = vmul.f32 %v6311_v23, %v6175_v37 }
 0x3d0   :  { %3064 = vrot.lane.b32.xlu1 %v3015_v14, %s3560_s7  ;;  %3066 = vrot.lane.b32.xlu0 %v3016_v13, %s3560_s7 }
 0x3d2   :  { %v6335_v34 = vpop.permute.xlu1 %2588  ;;  %v6337_v55 = vpop.permute.xlu0 %2590 }
 0x3d3   :  { %7569 = vst [vmem:[#allocation63_spill] sm:$0xff] %v6335_v34  ;;  %7570 = vst [vmem:[#allocation46_spill] sm:$0xff] %v6337_v55  ;;  %v3020_v34 = vmul.f32 %v6311_v23, %v6185_v26 }
 0x3d4   :  { %3068 = vrot.lane.b32.xlu1 %v3017_v15, %s3560_s7  ;;  %3070 = vrot.lane.b32.xlu0 %v3018_v60, %s3560_s7  ;;  %v3022_v15 = vmul.f32 %v6311_v23, %v6191_v4  ;;  %v2336_v60 = vadd.f32 %v5949_v33, %v5708_v43 }
 0x3d6   :  { %v6347_v14 = vpop.permute.xlu1 %2592  ;;  %v6349_v13 = vpop.permute.xlu0 %2594 }
 0x3d7   :  { %7571 = vst [vmem:[#allocation64_spill] sm:$0xff] %v6347_v14  ;;  %7572 = vst [vmem:[#allocation38_spill] sm:$0xff] %v6349_v13  ;;  %v3021_v13 = vmul.f32 %v6311_v23, %v6199_v49  ;;  %v2481_v14 = vadd.f32 %v6075_v11, %v2336_v60  ;;  %v3024_v11 = vmul.f32 %v6311_v23, %v6213_v21 }
 0x3d8   :  { %3072 = vrot.lane.b32.xlu1 %v3019_v6, %s3560_s7  ;;  %3074 = vrot.lane.b32.xlu0 %v3020_v34, %s3560_s7  ;;  %v6368_v34 = vstv %s3499_s29  ;;  %v2337_v6 = vadd.f32 %v5961_v3, %v5728_v39  ;;  %v3025_v39 = vmul.f32 %v6311_v23, %v6217_v16  ;;  %v2340_v3 = vadd.f32 %v5973_v30, %v5752_v41 }
 0x3d9   :  { %v2626_v43 = vadd.f32 %v6221_v40, %v2481_v14  ;;  %v2339_v40 = vadd.f32 %v5971_v48, %v5750_v17  ;;  %v2821_v17 = vmul.f32 %v6368_v34, %v6157_v42  ;;  %v3028_v41 = vmul.f32 %v6311_v23, %v6233_v22 }
 0x3da   :  { %v6359_v55 = vpop.permute.xlu1 %2596  ;;  %v6361_v37 = vpop.permute.xlu0 %2598  ;;  %v2342_v48 = vadd.f32 %v5983_v2, %v5776_v12  ;;  %v2824_v12 = vmul.f32 %v6368_v34, %v6171_v20 }
 0x3db   :  { %7573 = vst [vmem:[#allocation75_spill] sm:$0xff] %v6359_v55  ;;  %7574 = vst [vmem:[#allocation76_spill] sm:$0xff] %v6361_v37  ;;  %v3023_v37 = vmul.f32 %v6311_v23, %v6211_v9 }
 0x3dc   :  { %3076 = vrot.lane.b32.xlu1 %v3021_v13, %s3560_s7  ;;  %3078 = vrot.lane.b32.xlu0 %v3022_v15, %s3560_s7  ;;  %v2482_v13 = vadd.f32 %v6083_v18, %v2337_v6  ;;  %v2820_v15 = vmul.f32 %v6368_v34, %v6141_v54 }
 0x3de   :  { %v6373_v33 = vpop.permute.xlu1 %2600  ;;  %v2700_v55 = vpop.permute.xlu0 %2699  ;;  %v2627_v14 = vadd.f32 %v6235_v56, %v2482_v13 }
 0x3df   :  { %v2771_v60 = vadd.f32 %v2700_v55, %v2626_v43  ;;  %v2484_v43 = vadd.f32 %v6093_v0, %v2339_v40 }
 0x3e0   :  { %3080 = vrot.lane.b32.xlu1 %v3023_v37, %s3560_s7  ;;  %3082 = vrot.lane.b32.xlu0 %v3024_v11, %s3560_s7  ;;  %v3026_v37 = vmul.f32 %v6311_v23, %v6227_v50  ;;  %v2485_v11 = vadd.f32 %v6095_v28, %v2340_v3 }
 0x3e1   :  { %v6391_v18 = vadd.f32 %v2820_v15, %v2771_v60  ;;  %v2629_v30 = vadd.f32 %v6247_v63, %v2484_v43  ;;  %v3027_v60 = vmul.f32 %v6311_v23, %v6241_v31  ;;  %v2823_v15 = vmul.f32 %v6368_v34, %v6169_v10 }
 0x3e2   :  { %v2702_v55 = vpop.permute.xlu1 %2701  ;;  %v6393_v6 = vpop.permute.xlu0 %2703  ;;  %v2630_v0 = vadd.f32 %v6249_v7, %v2485_v11  ;;  %v2343_v7 = vadd.f32 %v5991_v5, %v5796_v8  ;;  %v2826_v8 = vmul.f32 %v6368_v34, %v6185_v26  ;;  %v2345_v5 = vadd.f32 %v6001_v27, %v5821_v47 }
 0x3e3   :  { %v2772_v16 = vadd.f32 %v2702_v55, %v2627_v14  ;;  %v3029_v55 = vmul.f32 %v6311_v23, %v6253_v51  ;;  %v2827_v47 = vmul.f32 %v6368_v34, %v6199_v49  ;;  %v2348_v27 = vadd.f32 %v6013_v62, %v5845_v25  ;;  %v7578_v62 = vld [vmem:[#allocation17_spill] sm:$0xff] }
 0x3e4   :  { %3084 = vrot.lane.b32.xlu1 %v3025_v39, %s3560_s7  ;;  %3086 = vrot.lane.b32.xlu0 %v3026_v37, %s3560_s7  ;;  %v2487_v39 = vadd.f32 %v6105_v59, %v2342_v48  ;;  %v3030_v37 = vmul.f32 %v6311_v23, %v6255_v29  ;;  %v2488_v43 = vadd.f32 %v6113_v36, %v2343_v7  ;;  %v7577_v7 = vld [vmem:[#allocation58_spill] sm:$0xff] }
 0x3e5   :  { %v6409_v56 = vadd.f32 %v2821_v17, %v2772_v16  ;;  %v2346_v17 = vadd.f32 %v6003_v32, %v5823_v46  ;;  %v3034_v46 = vmul.f32 %v6311_v23, %v6275_v38  ;;  %v2830_v25 = vmul.f32 %v6368_v34, %v6213_v21 }
 0x3e6   :  { %v2706_v28 = vpop.permute.xlu1 %2705  ;;  %v2708_v13 = vpop.permute.xlu0 %2707  ;;  %v2632_v2 = vadd.f32 %v6263_v45, %v2487_v39  ;;  %v3031_v45 = vmul.f32 %v6311_v23, %v6259_v52 }
 0x3e7   :  { %v2774_v40 = vadd.f32 %v2706_v28, %v2629_v30  ;;  %v2775_v3 = vadd.f32 %v2708_v13, %v2630_v0  ;;  %v3032_v0 = vmul.f32 %v6311_v23, %v6269_v53  ;;  %v2490_v28 = vadd.f32 %v6123_v58, %v2345_v5  ;;  %v7575_v58 = vld [vmem:[#allocation26_spill] sm:$0xff] }
 0x3e8   :  { %3088 = vrot.lane.b32.xlu1 %v3027_v60, %s3560_s7  ;;  %3090 = vrot.lane.b32.xlu0 %v3028_v41, %s3560_s7  ;;  %v2633_v41 = vadd.f32 %v6277_v61, %v2488_v43  ;;  %v2491_v13 = vadd.f32 %v6125_v44, %v2346_v17  ;;  %v7580_v43 = vld [vmem:[#allocation71_spill] sm:$0xff] }
 0x3e9   :  { %v6423_v16 = vadd.f32 %v2823_v15, %v2774_v40  ;;  %v6425_v63 = vadd.f32 %v2824_v12, %v2775_v3  ;;  %v2635_v32 = vadd.f32 %v6289_v35, %v2490_v28  ;;  %v7576_v40 = vld [vmem:[#allocation42_spill] sm:$0xff]  ;;  %v2829_v12 = vmul.f32 %v6368_v34, %v6211_v9  ;;  %v7579_v35 = vld [vmem:[#allocation31_spill] sm:$0xff]  ;;  %v7582_v28 = vld [vmem:[#allocation13_spill] sm:$0xff] }
 0x3ea   :  { %v6427_v14 = vpop.permute.xlu1 %2709  ;;  %v2712_v59 = vpop.permute.xlu0 %2711  ;;  %v2636_v61 = vadd.f32 %v7575_v58, %v2491_v13  ;;  %v3033_v3 = vmul.f32 %v6311_v23, %v7576_v40  ;;  %v7584_v58 = vld [vmem:[#allocation65_spill] sm:$0xff] }
 0x3eb   :  { %v2777_v11 = vadd.f32 %v2712_v59, %v2632_v2  ;;  %v2493_v2 = vadd.f32 %v7577_v7, %v2348_v27  ;;  %v3037_v27 = vmul.f32 %v6311_v23, %v6301_v57 }
 0x3ec   :  { %3092 = vrot.lane.b32.xlu1 %v3029_v55, %s3560_s7  ;;  %3094 = vrot.lane.b32.xlu0 %v3030_v37, %s3560_s7  ;;  %v2349_v37 = vadd.f32 %v7579_v35, %v7578_v62  ;;  %v7588_v62 = vld [vmem:[#allocation21_spill] sm:$0xff] }
 0x3ed   :  { %v6445_v36 = vadd.f32 %v2826_v8, %v2777_v11  ;;  %v2638_v11 = vadd.f32 %v7580_v43, %v2493_v2 }
 0x3ee   :  { %v2714_v48 = vpop.permute.xlu1 %2713  ;;  %v6447_v30 = vpop.permute.xlu0 %2715  ;;  %v2494_v13 = vadd.f32 %v7582_v28, %v2349_v37  ;;  %v7589_v37 = vld [vmem:[#allocation34_spill] sm:$0xff] }
 0x3ef   :  { %v2778_v60 = vadd.f32 %v2714_v48, %v2633_v41  ;;  %v3035_v41 = vmul.f32 %v6311_v23, %v6295_v1  ;;  %v7581_v48 = vld [vmem:[#allocation62_spill] sm:$0xff] }
 0x3f0   :  { %3096 = vrot.lane.b32.xlu1 %v3031_v45, %s3560_s7  ;;  %3098 = vrot.lane.b32.xlu0 %v3032_v0, %s3560_s7  ;;  %v3036_v0 = vmul.f32 %v6311_v23, %v7581_v48 }
 0x3f1   :  { %v6463_v44 = vadd.f32 %v2827_v47, %v2778_v60  ;;  %v6488_v47 = vstv %s3502_s30 }
 0x3f2   :  { %v2718_v15 = vpop.permute.xlu1 %2717  ;;  %v2720_v39 = vpop.permute.xlu0 %2719 }
 0x3f3   :  { %v2780_v59 = vadd.f32 %v2718_v15, %v2635_v32  ;;  %v2781_v55 = vadd.f32 %v2720_v39, %v2636_v61  ;;  %v7583_v32 = vld [vmem:[#allocation33_spill] sm:$0xff]  ;;  %v7585_v15 = vld [vmem:[#allocation52_spill] sm:$0xff] }
 0x3f4   :  { %3100 = vrot.lane.b32.xlu1 %v3033_v3, %s3560_s7  ;;  %3102 = vrot.lane.b32.xlu0 %v3034_v46, %s3560_s7  ;;  %v2832_v46 = vmul.f32 %v6368_v34, %v6227_v50  ;;  %v2351_v61 = vadd.f32 %v7584_v58, %v7583_v32  ;;  %v7586_v39 = vld [vmem:[#allocation9_spill] sm:$0xff] }
 0x3f5   :  { %v6477_v8 = vadd.f32 %v2829_v12, %v2780_v59  ;;  %v6479_v45 = vadd.f32 %v2830_v25, %v2781_v55  ;;  %v2352_v3 = vadd.f32 %v7586_v39, %v7585_v15  ;;  %v7587_v12 = vld [vmem:[#allocation68_spill] sm:$0xff]  ;;  %v3159_v25 = vmul.f32 %v6488_v47, %v6141_v54  ;;  %v7593_v39 = vld [vmem:[#allocation50_spill] sm:$0xff] }
 0x3f6   :  { %v6481_v5 = vpop.permute.xlu1 %2721  ;;  %v2724_v17 = vpop.permute.xlu0 %2723  ;;  %v2639_v7 = vadd.f32 %v7587_v12, %v2494_v13  ;;  %v2496_v35 = vadd.f32 %v7588_v62, %v2351_v61  ;;  %v3160_v15 = vmul.f32 %v6488_v47, %v6157_v42 }
 0x3f7   :  { %v2783_v60 = vadd.f32 %v2724_v17, %v2638_v11  ;;  %v2497_v23 = vadd.f32 %v7589_v37, %v2352_v3  ;;  %v2833_v11 = vmul.f32 %v6368_v34, %v6241_v31  ;;  %v3161_v17 = vmul.f32 %v6488_v47, %v6147_v19 }
 0x3f8   :  { %3104 = vrot.lane.b32.xlu1 %v3035_v41, %s3560_s7  ;;  %3106 = vrot.lane.b32.xlu0 %v3036_v0, %s3560_s7  ;;  %v7590_v41 = vld [vmem:[#allocation48_spill] sm:$0xff]  ;;  %v7591_v0 = vld [vmem:[#allocation10_spill] sm:$0xff]  ;;  %v2641_v13 = vadd.f32 %v6327_v24, %v2496_v35  ;;  %v7594_v24 = vld [vmem:[#allocation25_spill] sm:$0xff] }
 0x3f9   :  { %v6501_v2 = vadd.f32 %v2832_v46, %v2783_v60  ;;  %v2354_v28 = vadd.f32 %v7591_v0, %v7590_v41  ;;  %v7592_v60 = vld [vmem:[#allocation66_spill] sm:$0xff]  ;;  %v3162_v0 = vmul.f32 %v6488_v47, %v6169_v10  ;;  %v7613_v10 = vld [vmem:[#allocation75_spill] sm:$0xff] }
 0x3fa   :  { %v2726_v59 = vpop.permute.xlu1 %2725  ;;  %v6503_v55 = vpop.permute.xlu0 %2727  ;;  %v2642_v46 = vadd.f32 %v7592_v60, %v2497_v23  ;;  %v7596_v35 = vld [vmem:[#allocation46_spill] sm:$0xff] }
 0x3fb   :  { %v2784_v43 = vadd.f32 %v2726_v59, %v2639_v7  ;;  %v2499_v3 = vadd.f32 %v7593_v39, %v2354_v28  ;;  %v2836_v59 = vmul.f32 %v6368_v34, %v6255_v29  ;;  %v3163_v28 = vmul.f32 %v6488_v47, %v6171_v20  ;;  %v7609_v20 = vld [vmem:[#allocation67_spill] sm:$0xff] }
 0x3fc   :  { %3108 = vrot.lane.b32.xlu1 %v3037_v27, %s3560_s7  ;;  %3207 = vrot.lane.b32.xlu0 %v3159_v25, %s3561_s9  ;;  %v2835_v27 = vmul.f32 %v6368_v34, %v6253_v51  ;;  %v7595_v25 = vld [vmem:[#allocation24_spill] sm:$0xff] }
 0x3fd   :  { %v6519_v32 = vadd.f32 %v2833_v11, %v2784_v43  ;;  %v2355_v62 = vadd.f32 %v7595_v25, %v7594_v24  ;;  %v2644_v37 = vadd.f32 %v7596_v35, %v2499_v3  ;;  %v7601_v3 = vld [vmem:[#allocation45_spill] sm:$0xff] }
 0x3fe   :  { %v2730_v58 = vpop.permute.xlu1 %2729  ;;  %v2732_v61 = vpop.permute.xlu0 %2731 }
 0x3ff   :  { %v2786_v12 = vadd.f32 %v2730_v58, %v2641_v13  ;;  %v2787_v7 = vadd.f32 %v2732_v61, %v2642_v46  ;;  %v7597_v13 = vld [vmem:[#allocation56_spill] sm:$0xff]  ;;  %v2838_v46 = vmul.f32 %v6368_v34, %v6269_v53  ;;  %v7598_v58 = vld [vmem:[#allocation70_spill] sm:$0xff] }
 0x400   :  { %3209 = vrot.lane.b32.xlu1 %v3160_v15, %s3561_s9  ;;  %3211 = vrot.lane.b32.xlu0 %v3161_v17, %s3561_s9  ;;  %v2500_v17 = vadd.f32 %v7597_v13, %v2355_v62  ;;  %v3164_v61 = vmul.f32 %v6488_v47, %v7598_v58  ;;  %v7599_v15 = vld [vmem:[#allocation22_spill] sm:$0xff] }
 0x401   :  { %v6533_v23 = vadd.f32 %v2835_v27, %v2786_v12  ;;  %v6535_v43 = vadd.f32 %v2836_v59, %v2787_v7  ;;  %v7600_v27 = vld [vmem:[#allocation73_spill] sm:$0xff]  ;;  %v7602_v12 = vld [vmem:[#allocation28_spill] sm:$0xff] }
 0x402   :  { %v6537_v11 = vpop.permute.xlu1 %2733  ;;  %v2736_v41 = vpop.permute.xlu0 %2735  ;;  %v2357_v39 = vadd.f32 %v7600_v27, %v7599_v15  ;;  %v2358_v7 = vadd.f32 %v7602_v12, %v7601_v3  ;;  %v7603_v59 = vld [vmem:[#allocation64_spill] sm:$0xff] }
 0x403   :  { %v2789_v60 = vadd.f32 %v2736_v41, %v2644_v37  ;;  %v2645_v24 = vadd.f32 %v7603_v59, %v2500_v17  ;;  %v3165_v37 = vmul.f32 %v6488_v47, %v6185_v26  ;;  %v2839_v41 = vmul.f32 %v6368_v34, %v7576_v40  ;;  %v7608_v15 = vld [vmem:[#allocation16_spill] sm:$0xff]  ;;  %v7610_v17 = vld [vmem:[#allocation23_spill] sm:$0xff]  ;;  %v7612_v26 = vld [vmem:[#allocation54_spill] sm:$0xff] }
 0x404   :  { %3213 = vrot.lane.b32.xlu1 %v3162_v0, %s3561_s9  ;;  %3215 = vrot.lane.b32.xlu0 %v3163_v28, %s3561_s9  ;;  %v7606_v0 = vld [vmem:[#allocation74_spill] sm:$0xff]  ;;  %v7607_v28 = vld [vmem:[#allocation60_spill] sm:$0xff]  ;;  %v2502_v27 = vadd.f32 %v7608_v15, %v2357_v39  ;;  %v2503_v3 = vadd.f32 %v7609_v20, %v2358_v7  ;;  %v3167_v59 = vmul.f32 %v6488_v47, %v6191_v4 }
 0x405   :  { %v6555_v25 = vadd.f32 %v2838_v46, %v2789_v60  ;;  %v2338_v13 = vadd.f32 %v7607_v28, %v7606_v0  ;;  %v7611_v60 = vld [vmem:[#allocation40_spill] sm:$0xff] }
 0x406   :  { %v2738_v62 = vpop.permute.xlu1 %2737  ;;  %v6557_v35 = vpop.permute.xlu0 %2739  ;;  %v2359_v46 = vadd.f32 %v7611_v60, %v7610_v17  ;;  %v7614_v0 = vld [vmem:[#allocation76_spill] sm:$0xff] }
 0x407   :  { %7604 = vst [vmem:[#allocation26_spill] sm:$0xff] %v6555_v25  ;;  %7605 = vst [vmem:[#allocation42_spill] sm:$0xff] %v6557_v35  ;;  %v2790_v12 = vadd.f32 %v2738_v62, %v2645_v24  ;;  %v2483_v25 = vadd.f32 %v7612_v26, %v2338_v13  ;;  %v2647_v35 = vadd.f32 %v7613_v10, %v2502_v27  ;;  %v7616_v26 = vld [vmem:[#allocation32_spill] sm:$0xff] }
 0x408   :  { %3217 = vrot.lane.b32.xlu1 %v3164_v61, %s3561_s9  ;;  %3219 = vrot.lane.b32.xlu0 %v3165_v37, %s3561_s9  ;;  %v2648_v28 = vadd.f32 %v7614_v0, %v2503_v3  ;;  %v3166_v24 = vmul.f32 %v6488_v47, %v6199_v49  ;;  %v2841_v61 = vmul.f32 %v6368_v34, %v6295_v1  ;;  %v7615_v37 = vld [vmem:[#allocation55_spill] sm:$0xff] }
 0x409   :  { %v6576_v39 = vadd.f32 %v2839_v41, %v2790_v12  ;;  %v2842_v62 = vmul.f32 %v6368_v34, %v7581_v48  ;;  %v2504_v15 = vadd.f32 %v7615_v37, %v2359_v46  ;;  %v2628_v13 = vadd.f32 %v7616_v26, %v2483_v25 }
 0x40a   :  { %v2742_v20 = vpop.permute.xlu1 %2741  ;;  %v2744_v7 = vpop.permute.xlu0 %2743  ;;  %v2822_v41 = vmul.f32 %v6368_v34, %v6147_v19  ;;  %v3168_v25 = vmul.f32 %v6488_v47, %v6211_v9 }
 0x40b   :  { %v2792_v10 = vadd.f32 %v2742_v20, %v2647_v35  ;;  %v2793_v27 = vadd.f32 %v2744_v7, %v2648_v28  ;;  %v2649_v3 = vadd.f32 %v6373_v33, %v2504_v15  ;;  %v2773_v12 = vadd.f32 %v6393_v6, %v2628_v13  ;;  %v7618_v28 = vld [vmem:[#allocation44_spill] sm:$0xff] }
 0x40c   :  { %3221 = vrot.lane.b32.xlu1 %v3166_v24, %s3561_s9  ;;  %3223 = vrot.lane.b32.xlu0 %v3167_v59, %s3561_s9  ;;  %v3169_v35 = vmul.f32 %v6488_v47, %v6213_v21  ;;  %v7617_v59 = vld [vmem:[#allocation47_spill] sm:$0xff]  ;;  %v7619_v6 = vld [vmem:[#allocation72_spill] sm:$0xff]  ;;  %v3171_v13 = vmul.f32 %v6488_v47, %v6227_v50 }
 0x40d   :  { %v6592_v17 = vadd.f32 %v2841_v61, %v2792_v10  ;;  %v6594_v60 = vadd.f32 %v2842_v62, %v2793_v27  ;;  %v2341_v20 = vadd.f32 %v7618_v28, %v7617_v59  ;;  %v3170_v24 = vmul.f32 %v6488_v47, %v7619_v6  ;;  %v7620_v61 = vld [vmem:[#allocation37_spill] sm:$0xff] }
 0x40e   :  { %v2746_v46 = vpop.permute.xlu1 %2745  ;;  %v2918_v0 = vpop.permute.xlu0 %2917  ;;  %v2846_v37 = vadd.f32 %v2822_v41, %v2773_v12  ;;  %v7621_v10 = vld [vmem:[#allocation41_spill] sm:$0xff]  ;;  %v3173_v41 = vmul.f32 %v6488_v47, %v6233_v22  ;;  %v7624_v12 = vld [vmem:[#allocation51_spill] sm:$0xff]  ;;  %v2825_v28 = vmul.f32 %v6368_v34, %v7598_v58 }
 0x40f   :  { %v6602_v7 = vadd.f32 %v2746_v46, %v2649_v3  ;;  %v6605_v33 = vadd.f32 %v2918_v0, %v6391_v18  ;;  %v2486_v62 = vadd.f32 %v7620_v61, %v2341_v20  ;;  %v7622_v27 = vld [vmem:[#allocation49_spill] sm:$0xff]  ;;  %v7623_v18 = vld [vmem:[#allocation11_spill] sm:$0xff] }
 0x410   :  { %3225 = vrot.lane.b32.xlu1 %v3168_v25, %s3561_s9  ;;  %3227 = vrot.lane.b32.xlu0 %v3169_v35, %s3561_s9  ;;  %v2344_v3 = vadd.f32 %v7622_v27, %v7621_v10 }
 0x411   :  { %v2631_v46 = vadd.f32 %v7623_v18, %v2486_v62  ;;  %v7625_v62 = vld [vmem:[#allocation53_spill] sm:$0xff]  ;;  %v7627_v18 = vld [vmem:[#allocation19_spill] sm:$0xff] }
 0x412   :  { %v2920_v15 = vpop.permute.xlu1 %2919  ;;  %v2922_v26 = vpop.permute.xlu0 %2921  ;;  %v2489_v35 = vadd.f32 %v7624_v12, %v2344_v3  ;;  %v3174_v3 = vmul.f32 %v6488_v47, %v6253_v51 }
 0x413   :  { %v6618_v0 = vadd.f32 %v2920_v15, %v6409_v56  ;;  %v6620_v25 = vadd.f32 %v2922_v26, %v2846_v37  ;;  %v2776_v59 = vadd.f32 %v6427_v14, %v2631_v46  ;;  %v3172_v56 = vmul.f32 %v6488_v47, %v6241_v31 }
 0x414   :  { %3229 = vrot.lane.b32.xlu1 %v3170_v24, %s3561_s9  ;;  %3231 = vrot.lane.b32.xlu0 %v3171_v13, %s3561_s9  ;;  %v2634_v37 = vadd.f32 %v7625_v62, %v2489_v35  ;;  %v2828_v13 = vmul.f32 %v6368_v34, %v6191_v4  ;;  %v7628_v35 = vld [vmem:[#allocation29_spill] sm:$0xff]  ;;  %v7629_v62 = vld [vmem:[#allocation39_spill] sm:$0xff] }
 0x415   :  { %v2849_v26 = vadd.f32 %v2825_v28, %v2776_v59 }
 0x416   :  { %v2924_v20 = vpop.permute.xlu1 %2923  ;;  %v2926_v61 = vpop.permute.xlu0 %2925  ;;  %v2779_v14 = vadd.f32 %v6447_v30, %v2634_v37  ;;  %v3176_v30 = vmul.f32 %v6488_v47, %v6259_v52  ;;  %v7630_v37 = vld [vmem:[#allocation12_spill] sm:$0xff] }
 0x417   :  { %v6634_v24 = vadd.f32 %v2924_v20, %v6423_v16  ;;  %v6637_v15 = vadd.f32 %v2926_v61, %v6425_v63  ;;  %v3175_v16 = vmul.f32 %v6488_v47, %v6255_v29  ;;  %v7626_v63 = vld [vmem:[#allocation59_spill] sm:$0xff] }
 0x418   :  { %3233 = vrot.lane.b32.xlu1 %v3172_v56, %s3561_s9  ;;  %3235 = vrot.lane.b32.xlu0 %v3173_v41, %s3561_s9  ;;  %v2347_v46 = vadd.f32 %v7627_v18, %v7626_v63  ;;  %v2852_v28 = vadd.f32 %v2828_v13, %v2779_v14  ;;  %v3177_v56 = vmul.f32 %v6488_v47, %v6269_v53  ;;  %v7632_v13 = vld [vmem:[#allocation61_spill] sm:$0xff] }
 0x419   :  { %v3179_v14 = vmul.f32 %v6488_v47, %v6275_v38  ;;  %v2831_v18 = vmul.f32 %v6368_v34, %v7619_v6 }
 0x41a   :  { %v2928_v10 = vpop.permute.xlu1 %2927  ;;  %v2930_v27 = vpop.permute.xlu0 %2929  ;;  %v2492_v59 = vadd.f32 %v7628_v35, %v2347_v46  ;;  %v3178_v35 = vmul.f32 %v6488_v47, %v7576_v40 }
 0x41b   :  { %v6650_v12 = vadd.f32 %v2928_v10, %v2849_v26  ;;  %v6653_v41 = vadd.f32 %v2930_v27, %v6445_v36  ;;  %v2350_v26 = vadd.f32 %v7630_v37, %v7629_v62  ;;  %v7631_v36 = vld [vmem:[#allocation36_spill] sm:$0xff] }
 0x41c   :  { %3237 = vrot.lane.b32.xlu1 %v3174_v3, %s3561_s9  ;;  %3239 = vrot.lane.b32.xlu0 %v3175_v16, %s3561_s9  ;;  %v2637_v10 = vadd.f32 %v7631_v36, %v2492_v59  ;;  %v7633_v59 = vld [vmem:[#allocation69_spill] sm:$0xff] }
 0x41d   :  { %v2495_v16 = vadd.f32 %v7632_v13, %v2350_v26  ;;  %v3180_v26 = vmul.f32 %v6488_v47, %v6295_v1  ;;  %v7635_v36 = vld [vmem:[#allocation57_spill] sm:$0xff] }
 0x41e   :  { %v2932_v20 = vpop.permute.xlu1 %2931  ;;  %v2934_v61 = vpop.permute.xlu0 %2933  ;;  %v2782_v63 = vadd.f32 %v6481_v5, %v2637_v10 }
 0x41f   :  { %v6666_v27 = vadd.f32 %v2932_v20, %v6463_v44  ;;  %v6668_v3 = vadd.f32 %v2934_v61, %v2852_v28  ;;  %v2640_v28 = vadd.f32 %v7633_v59, %v2495_v16  ;;  %v3182_v16 = vmul.f32 %v6488_v47, %v6301_v57 }
 0x420   :  { %3241 = vrot.lane.b32.xlu1 %v3176_v30, %s3561_s9  ;;  %3243 = vrot.lane.b32.xlu0 %v3177_v56, %s3561_s9  ;;  %v2855_v61 = vadd.f32 %v2831_v18, %v2782_v63  ;;  %v2834_v56 = vmul.f32 %v6368_v34, %v6233_v22  ;;  %v7636_v63 = vld [vmem:[#allocation14_spill] sm:$0xff] }
 0x421   :  { %v2785_v5 = vadd.f32 %v6503_v55, %v2640_v28  ;;  %v6703_v55 = vstv %s3503_s3  ;;  %v7637_v28 = vld [vmem:[#allocation30_spill] sm:$0xff] }
 0x422   :  { %v2936_v46 = vpop.permute.xlu1 %2935  ;;  %v2938_v44 = vpop.permute.xlu0 %2937  ;;  %v3304_v59 = vmul.f32 %v6703_v55, %v6141_v54 }
 0x423   :  { %v6682_v30 = vadd.f32 %v2936_v46, %v6477_v8  ;;  %v6685_v20 = vadd.f32 %v2938_v44, %v6479_v45  ;;  %v3181_v8 = vmul.f32 %v6488_v47, %v7581_v48  ;;  %v7634_v45 = vld [vmem:[#allocation35_spill] sm:$0xff]  ;;  %v2858_v46 = vadd.f32 %v2834_v56, %v2785_v5 }
 0x424   :  { %3245 = vrot.lane.b32.xlu1 %v3178_v35, %s3561_s9  ;;  %3247 = vrot.lane.b32.xlu0 %v3179_v14, %s3561_s9  ;;  %v2353_v10 = vadd.f32 %v7635_v36, %v7634_v45  ;;  %v3306_v47 = vmul.f32 %v6703_v55, %v6147_v19  ;;  %v7640_v5 = vld [vmem:[#allocation27_spill] sm:$0xff]  ;;  %v2837_v45 = vmul.f32 %v6368_v34, %v6259_v52  ;;  %v7642_v19 = vld [vmem:[#allocation42_spill] sm:$0xff] }
 0x426   :  { %v2940_v62 = vpop.permute.xlu1 %2939  ;;  %v2942_v37 = vpop.permute.xlu0 %2941  ;;  %v2498_v18 = vadd.f32 %v7636_v63, %v2353_v10  ;;  %v7641_v63 = vld [vmem:[#allocation38_spill] sm:$0xff] }
 0x427   :  { %v6698_v13 = vadd.f32 %v2940_v62, %v2855_v61  ;;  %v6701_v14 = vadd.f32 %v2942_v37, %v6501_v2  ;;  %v7638_v2 = vld [vmem:[#allocation18_spill] sm:$0xff]  ;;  %v7639_v62 = vld [vmem:[#allocation63_spill] sm:$0xff] }
 0x428   :  { %3249 = vrot.lane.b32.xlu1 %v3180_v26, %s3561_s9  ;;  %3251 = vrot.lane.b32.xlu0 %v3181_v8, %s3561_s9  ;;  %v2356_v61 = vadd.f32 %v7638_v2, %v7637_v28  ;;  %v2643_v37 = vadd.f32 %v7639_v62, %v2498_v18  ;;  %v7643_v28 = vld [vmem:[#allocation15_spill] sm:$0xff]  ;;  %v7645_v62 = vld [vmem:[#allocation26_spill] sm:$0xff] }
 0x429   :  { %v3307_v2 = vmul.f32 %v6703_v55, %v7643_v28 }
 0x42a   :  { %v2944_v44 = vpop.permute.xlu1 %2943  ;;  %v2946_v35 = vpop.permute.xlu0 %2945  ;;  %v2501_v56 = vadd.f32 %v7640_v5, %v2356_v61  ;;  %v2788_v54 = vadd.f32 %v6537_v11, %v2643_v37 }
 0x42b   :  { %v6716_v26 = vadd.f32 %v2944_v44, %v6519_v32  ;;  %v6718_v8 = vadd.f32 %v2946_v35, %v2858_v46  ;;  %v3305_v32 = vmul.f32 %v6703_v55, %v6157_v42  ;;  %v2840_v35 = vmul.f32 %v6368_v34, %v6275_v38 }
 0x42c   :  { %3253 = vrot.lane.b32.xlu1 %v3182_v16, %s3561_s9  ;;  %3352 = vrot.lane.b32.xlu0 %v3304_v59, %s3562_s11  ;;  %v2646_v18 = vadd.f32 %v7641_v63, %v2501_v56  ;;  %v2861_v44 = vadd.f32 %v2837_v45, %v2788_v54  ;;  %v7646_v45 = vld [vmem:[#allocation20_spill] sm:$0xff]  ;;  %v3312_v63 = vmul.f32 %v6703_v55, %v6191_v4 }
 0x42e   :  { %v2948_v36 = vpop.permute.xlu1 %2947  ;;  %v2950_v10 = vpop.permute.xlu0 %2949  ;;  %v2791_v11 = vadd.f32 %v7642_v19, %v2646_v18 }
 0x42f   :  { %v6732_v16 = vadd.f32 %v2948_v36, %v6533_v23  ;;  %v6735_v46 = vadd.f32 %v2950_v10, %v6535_v43  ;;  %v7644_v23 = vld [vmem:[#allocation43_spill] sm:$0xff]  ;;  %v3310_v36 = vmul.f32 %v6703_v55, %v7646_v45  ;;  %v3323_v45 = vmul.f32 %v6703_v55, %v7576_v40 }
 0x430   :  { %3354 = vrot.lane.b32.xlu1 %v3305_v32, %s3562_s11  ;;  %3356 = vrot.lane.b32.xlu0 %v3306_v47, %s3562_s11  ;;  %v3308_v61 = vmul.f32 %v6703_v55, %v7644_v23  ;;  %v3309_v47 = vmul.f32 %v6703_v55, %v7598_v58  ;;  %v2864_v5 = vadd.f32 %v2840_v35, %v2791_v11 }
 0x431   :  { %v2843_v58 = vmul.f32 %v6368_v34, %v6301_v57  ;;  %v3311_v11 = vmul.f32 %v6703_v55, %v6199_v49  ;;  %v3313_v34 = vmul.f32 %v6703_v55, %v6211_v9  ;;  %v3314_v49 = vmul.f32 %v6703_v55, %v6213_v21 }
 0x432   :  { %v2952_v59 = vpop.permute.xlu1 %2951  ;;  %v2954_v42 = vpop.permute.xlu0 %2953  ;;  %v3316_v9 = vmul.f32 %v6703_v55, %v6227_v50 }
 0x433   :  { %v6746_v43 = vadd.f32 %v2952_v59, %v2861_v44  ;;  %v6749_v37 = vadd.f32 %v2954_v42, %v7645_v62  ;;  %v2867_v4 = vadd.f32 %v2843_v58, %v6602_v7 }
 0x434   :  { %3358 = vrot.lane.b32.xlu1 %v3307_v2, %s3562_s11  ;;  %3360 = vrot.lane.b32.xlu0 %v3308_v61, %s3562_s11  ;;  %v3317_v61 = vmul.f32 %v6703_v55, %v6241_v31 }
 0x436   :  { %v2956_v56 = vpop.permute.xlu1 %2955  ;;  %v2958_v54 = vpop.permute.xlu0 %2957 }
 0x437   :  { %v6758_v10 = vadd.f32 %v2956_v56, %v6576_v39  ;;  %v6760_v32 = vadd.f32 %v2958_v54, %v2864_v5 }
 0x438   :  { %3362 = vrot.lane.b32.xlu1 %v3309_v47, %s3562_s11  ;;  %3364 = vrot.lane.b32.xlu0 %v3310_v36, %s3562_s11  ;;  %v3320_v47 = vmul.f32 %v6703_v55, %v6255_v29 }
 0x43a   :  { %v2960_v18 = vpop.permute.xlu1 %2959  ;;  %v2962_v19 = vpop.permute.xlu0 %2961 }
 0x43b   :  { %v6771_v39 = vadd.f32 %v2960_v18, %v6592_v17  ;;  %v6774_v44 = vadd.f32 %v2962_v19, %v6594_v60  ;;  %v3315_v60 = vmul.f32 %v6703_v55, %v7619_v6 }
 0x43c   :  { %3366 = vrot.lane.b32.xlu1 %v3311_v11, %s3562_s11  ;;  %3368 = vrot.lane.b32.xlu0 %v3312_v63, %s3562_s11  ;;  %v3326_v63 = vmul.f32 %v6703_v55, %v7581_v48 }
 0x43e   :  { %v2964_v35 = vpop.permute.xlu1 %2963  ;;  %v3063_v59 = vpop.permute.xlu0 %3062 }
 0x43f   :  { %v6783_v42 = vadd.f32 %v2964_v35, %v2867_v4  ;;  %v6786_v17 = vadd.f32 %v3063_v59, %v6605_v33  ;;  %v3318_v33 = vmul.f32 %v6703_v55, %v6233_v22  ;;  %v3319_v22 = vmul.f32 %v6703_v55, %v6253_v51 }
 0x440   :  { %3370 = vrot.lane.b32.xlu1 %v3313_v34, %s3562_s11  ;;  %3372 = vrot.lane.b32.xlu0 %v3314_v49, %s3562_s11  ;;  %v3322_v51 = vmul.f32 %v6703_v55, %v6269_v53 }
 0x442   :  { %v3065_v7 = vpop.permute.xlu1 %3064  ;;  %v3067_v28 = vpop.permute.xlu0 %3066 }
 0x443   :  { %v6795_v2 = vadd.f32 %v3065_v7, %v6618_v0  ;;  %v6798_v21 = vadd.f32 %v3067_v28, %v6620_v25 }
 0x444   :  { %3374 = vrot.lane.b32.xlu1 %v3315_v60, %s3562_s11  ;;  %3376 = vrot.lane.b32.xlu0 %v3316_v9, %s3562_s11 }
 0x446   :  { %v3069_v23 = vpop.permute.xlu1 %3068  ;;  %v3071_v6 = vpop.permute.xlu0 %3070 }
 0x447   :  { %v6807_v50 = vadd.f32 %v3069_v23, %v6634_v24  ;;  %v6810_v0 = vadd.f32 %v3071_v6, %v6637_v15  ;;  %v3321_v15 = vmul.f32 %v6703_v55, %v6259_v52 }
 0x448   :  { %3378 = vrot.lane.b32.xlu1 %v3317_v61, %s3562_s11  ;;  %3380 = vrot.lane.b32.xlu0 %v3318_v33, %s3562_s11 }
 0x44a   :  { %v3073_v25 = vpop.permute.xlu1 %3072  ;;  %v3075_v62 = vpop.permute.xlu0 %3074 }
 0x44b   :  { %v6819_v31 = vadd.f32 %v3073_v25, %v6650_v12  ;;  %v6822_v24 = vadd.f32 %v3075_v62, %v6653_v41  ;;  %v3324_v41 = vmul.f32 %v6703_v55, %v6275_v38  ;;  %v3325_v38 = vmul.f32 %v6703_v55, %v6295_v1 }
 0x44c   :  { %3382 = vrot.lane.b32.xlu1 %v3319_v22, %s3562_s11  ;;  %3384 = vrot.lane.b32.xlu0 %v3320_v47, %s3562_s11 }
 0x44e   :  { %v3077_v5 = vpop.permute.xlu1 %3076  ;;  %v3079_v56 = vpop.permute.xlu0 %3078 }
 0x44f   :  { %v6831_v29 = vadd.f32 %v3077_v5, %v6666_v27  ;;  %v6834_v12 = vadd.f32 %v3079_v56, %v6668_v3 }
 0x450   :  { %3386 = vrot.lane.b32.xlu1 %v3321_v15, %s3562_s11  ;;  %3388 = vrot.lane.b32.xlu0 %v3322_v51, %s3562_s11 }
 0x452   :  { %v3081_v54 = vpop.permute.xlu1 %3080  ;;  %v3083_v52 = vpop.permute.xlu0 %3082 }
 0x453   :  { %v6843_v53 = vadd.f32 %v3081_v54, %v6682_v30  ;;  %v6846_v27 = vadd.f32 %v3083_v52, %v6685_v20  ;;  %v3327_v20 = vmul.f32 %v6703_v55, %v6301_v57 }
 0x454   :  { %3390 = vrot.lane.b32.xlu1 %v3323_v45, %s3562_s11  ;;  %3392 = vrot.lane.b32.xlu0 %v3324_v41, %s3562_s11 }
 0x456   :  { %v3085_v3 = vpop.permute.xlu1 %3084  ;;  %v3087_v36 = vpop.permute.xlu0 %3086 }
 0x457   :  { %v6855_v40 = vadd.f32 %v3085_v3, %v6698_v13  ;;  %v6858_v30 = vadd.f32 %v3087_v36, %v6701_v14 }
 0x458   :  { %3394 = vrot.lane.b32.xlu1 %v3325_v38, %s3562_s11  ;;  %3396 = vrot.lane.b32.xlu0 %v3326_v63, %s3562_s11 }
 0x45a   :  { %v3089_v58 = vpop.permute.xlu1 %3088  ;;  %v3091_v18 = vpop.permute.xlu0 %3090 }
 0x45b   :  { %v6865_v1 = vadd.f32 %v3089_v58, %v6716_v26  ;;  %v6868_v48 = vadd.f32 %v3091_v18, %v6718_v8 }
 0x45c   :  { %3398 = vrot.lane.b32.xlu1 %v3327_v20, %s3562_s11 }
 0x45e   :  { %v3093_v13 = vpop.permute.xlu1 %3092  ;;  %v3095_v14 = vpop.permute.xlu0 %3094 }
 0x45f   :  { %v6872_v19 = vadd.f32 %v3093_v13, %v6732_v16  ;;  %v6875_v11 = vadd.f32 %v3095_v14, %v6735_v46 }
 0x462   :  { %v3097_v4 = vpop.permute.xlu1 %3096  ;;  %v3099_v57 = vpop.permute.xlu0 %3098 }
 0x463   :  { %v6878_v55 = vadd.f32 %v3097_v4, %v6746_v43  ;;  %v6881_v26 = vadd.f32 %v3099_v57, %v6749_v37 }
 0x466   :  { %v3101_v8 = vpop.permute.xlu1 %3100  ;;  %v3103_v35 = vpop.permute.xlu0 %3102 }
 0x467   :  { %v6884_v59 = vadd.f32 %v3101_v8, %v6758_v10  ;;  %v6887_v34 = vadd.f32 %v3103_v35, %v6760_v32 }
 0x46a   :  { %v3105_v16 = vpop.permute.xlu1 %3104  ;;  %v3107_v49 = vpop.permute.xlu0 %3106 }
 0x46b   :  { %v6890_v46 = vadd.f32 %v3105_v16, %v6771_v39  ;;  %v6893_v60 = vadd.f32 %v3107_v49, %v6774_v44 }
 0x46e   :  { %v3109_v43 = vpop.permute.xlu1 %3108  ;;  %v3208_v7 = vpop.permute.xlu0 %3207 }
 0x46f   :  { %v6896_v37 = vadd.f32 %v3109_v43, %v6783_v42  ;;  %v3279_v45 = vadd.f32 %v3208_v7, %v6786_v17 }
 0x472   :  { %v3210_v28 = vpop.permute.xlu1 %3209  ;;  %v3212_v9 = vpop.permute.xlu0 %3211 }
 0x473   :  { %v3280_v63 = vadd.f32 %v3210_v28, %v6795_v2  ;;  %v3281_v20 = vadd.f32 %v3212_v9, %v6798_v21 }
 0x476   :  { %v3214_v10 = vpop.permute.xlu1 %3213  ;;  %v3216_v33 = vpop.permute.xlu0 %3215 }
 0x477   :  { %v3282_v17 = vadd.f32 %v3214_v10, %v6807_v50  ;;  %v3283_v4 = vadd.f32 %v3216_v33, %v6810_v0 }
 0x47a   :  { %v3218_v23 = vpop.permute.xlu1 %3217  ;;  %v3220_v32 = vpop.permute.xlu0 %3219 }
 0x47b   :  { %v3284_v35 = vadd.f32 %v3218_v23, %v6819_v31  ;;  %v3285_v50 = vadd.f32 %v3220_v32, %v6822_v24 }
 0x47e   :  { %v3222_v6 = vpop.permute.xlu1 %3221  ;;  %v3224_v61 = vpop.permute.xlu0 %3223 }
 0x47f   :  { %v3286_v7 = vadd.f32 %v3222_v6, %v6831_v29  ;;  %v3287_v31 = vadd.f32 %v3224_v61, %v6834_v12 }
 0x482   :  { %v3226_v25 = vpop.permute.xlu1 %3225  ;;  %v3228_v62 = vpop.permute.xlu0 %3227 }
 0x483   :  { %v3288_v33 = vadd.f32 %v3226_v25, %v6843_v53  ;;  %v3289_v29 = vadd.f32 %v3228_v62, %v6846_v27 }
 0x486   :  { %v3230_v39 = vpop.permute.xlu1 %3229  ;;  %v3232_v22 = vpop.permute.xlu0 %3231 }
 0x487   :  { %v3290_v61 = vadd.f32 %v3230_v39, %v6855_v40  ;;  %v3291_v53 = vadd.f32 %v3232_v22, %v6858_v30 }
 0x48a   :  { %v6898_v47 = vpop.permute.xlu1 %3233  ;;  %v6900_v44 = vpop.permute.xlu0 %3235 }
 0x48b   :  { %v3293_v40 = vadd.f32 %v6900_v44, %v6868_v48 }
 0x48e   :  { %v6902_v15 = vpop.permute.xlu1 %3237  ;;  %v6904_v42 = vpop.permute.xlu0 %3239 }
 0x48f   :  { %v3295_v48 = vadd.f32 %v6904_v42, %v6875_v11 }
 0x492   :  { %v6906_v5 = vpop.permute.xlu1 %3241  ;;  %v6908_v56 = vpop.permute.xlu0 %3243 }
 0x493   :  { %v3297_v11 = vadd.f32 %v6908_v56, %v6881_v26 }
 0x496   :  { %v6910_v51 = vpop.permute.xlu1 %3245  ;;  %v6912_v41 = vpop.permute.xlu0 %3247 }
 0x497   :  { %v3299_v26 = vadd.f32 %v6912_v41, %v6887_v34 }
 0x49a   :  { %v6914_v54 = vpop.permute.xlu1 %3249  ;;  %v6916_v52 = vpop.permute.xlu0 %3251 }
 0x49b   :  { %v3301_v34 = vadd.f32 %v6916_v52, %v6893_v60 }
 0x49e   :  { %v6919_v3 = vpop.permute.xlu1 %3253  ;;  %v3353_v36 = vpop.permute.xlu0 %3352 }
 0x49f   :  { %v3424_v38 = vadd.f32 %v3353_v36, %v3279_v45  ;;  %v3292_v36 = vadd.f32 %v6898_v47, %v6865_v1  ;;  %v3294_v1 = vadd.f32 %v6902_v15, %v6872_v19  ;;  %v3296_v19 = vadd.f32 %v6906_v5, %v6878_v55 }
 0x4a0   :  { %v3298_v55 = vadd.f32 %v6910_v51, %v6884_v59  ;;  %v3300_v59 = vadd.f32 %v6914_v54, %v6890_v46  ;;  %v3302_v46 = vadd.f32 %v6919_v3, %v6896_v37 }
 0x4a1   :  { %3449 = vst.msk [vmem:[%s7053_s2] sm:$0xff] %vm3448_vm2, %v3424_v38 }
 0x4a2   :  { %v3355_v58 = vpop.permute.xlu1 %3354  ;;  %v3357_v18 = vpop.permute.xlu0 %3356 }
 0x4a3   :  { %v3425_v13 = vadd.f32 %v3355_v58, %v3280_v63  ;;  %v3426_v14 = vadd.f32 %v3357_v18, %v3281_v20 }
 0x4a5   :  { %3450 = vst.msk [vmem:[%s7053_s2 + $0x8] sm:$0xff] %vm3448_vm2, %v3425_v13 }
 0x4a6   :  { %3452 = vst.msk [vmem:[%s7053_s2 + $0x10] sm:$0xf] %vm3451_vm3, %v3426_v14  ;;  %v3359_v2 = vpop.permute.xlu1 %3358  ;;  %v3361_v21 = vpop.permute.xlu0 %3360 }
 0x4a7   :  { %v3427_v57 = vadd.f32 %v3359_v2, %v3282_v17  ;;  %v3428_v8 = vadd.f32 %v3361_v21, %v3283_v4 }
 0x4a9   :  { %3453 = vst.msk [vmem:[%s7053_s2 + $0x18] sm:$0xff] %vm3448_vm2, %v3427_v57  ;;  %3454 = vst.msk [vmem:[%s7053_s2 + $0x20] sm:$0xff] %vm3448_vm2, %v3428_v8 }
 0x4aa   :  { %v3363_v0 = vpop.permute.xlu1 %3362  ;;  %v3365_v16 = vpop.permute.xlu0 %3364 }
 0x4ab   :  { %v3429_v49 = vadd.f32 %v3363_v0, %v3284_v35  ;;  %v3430_v43 = vadd.f32 %v3365_v16, %v3285_v50 }
 0x4ad   :  { %3455 = vst.msk [vmem:[%s7053_s2 + $0x28] sm:$0xf] %vm3451_vm3, %v3429_v49 }
 0x4ae   :  { %3456 = vst.msk [vmem:[%s7053_s2 + $0x30] sm:$0xff] %vm3448_vm2, %v3430_v43  ;;  %v3367_v24 = vpop.permute.xlu1 %3366  ;;  %v3369_v28 = vpop.permute.xlu0 %3368 }
 0x4af   :  { %v3431_v9 = vadd.f32 %v3367_v24, %v3286_v7  ;;  %v3432_v10 = vadd.f32 %v3369_v28, %v3287_v31 }
 0x4b1   :  { %3457 = vst.msk [vmem:[%s7053_s2 + $0x38] sm:$0xff] %vm3448_vm2, %v3431_v9 }
 0x4b2   :  { %3458 = vst.msk [vmem:[%s7053_s2 + $0x40] sm:$0xf] %vm3451_vm3, %v3432_v10  ;;  %v3371_v12 = vpop.permute.xlu1 %3370  ;;  %v3373_v23 = vpop.permute.xlu0 %3372 }
 0x4b3   :  { %v3433_v32 = vadd.f32 %v3371_v12, %v3288_v33  ;;  %v3434_v6 = vadd.f32 %v3373_v23, %v3289_v29 }
 0x4b5   :  { %3459 = vst.msk [vmem:[%s7053_s2 + $0x48] sm:$0xff] %vm3448_vm2, %v3433_v32  ;;  %3460 = vst.msk [vmem:[%s7053_s2 + $0x50] sm:$0xff] %vm3448_vm2, %v3434_v6 }
 0x4b6   :  { %v3375_v27 = vpop.permute.xlu1 %3374  ;;  %v3377_v25 = vpop.permute.xlu0 %3376 }
 0x4b7   :  { %v3435_v62 = vadd.f32 %v3375_v27, %v3290_v61  ;;  %v3436_v45 = vadd.f32 %v3377_v25, %v3291_v53 }
 0x4b9   :  { %3461 = vst.msk [vmem:[%s7053_s2 + $0x58] sm:$0xf] %vm3451_vm3, %v3435_v62 }
 0x4ba   :  { %3462 = vst.msk [vmem:[%s7053_s2 + $0x60] sm:$0xff] %vm3448_vm2, %v3436_v45  ;;  %v3379_v30 = vpop.permute.xlu1 %3378  ;;  %v3381_v39 = vpop.permute.xlu0 %3380 }
 0x4bb   :  { %v3437_v22 = vadd.f32 %v3379_v30, %v3292_v36  ;;  %v3438_v38 = vadd.f32 %v3381_v39, %v3293_v40 }
 0x4bd   :  { %3463 = vst.msk [vmem:[%s7053_s2 + $0x68] sm:$0xff] %vm3448_vm2, %v3437_v22 }
 0x4be   :  { %3464 = vst.msk [vmem:[%s7053_s2 + $0x70] sm:$0xf] %vm3451_vm3, %v3438_v38  ;;  %v3383_v47 = vpop.permute.xlu1 %3382  ;;  %v3385_v44 = vpop.permute.xlu0 %3384 }
 0x4bf   :  { %v3439_v63 = vadd.f32 %v3383_v47, %v3294_v1  ;;  %v3440_v20 = vadd.f32 %v3385_v44, %v3295_v48 }
 0x4c1   :  { %3465 = vst.msk [vmem:[%s7053_s2 + $0x78] sm:$0xff] %vm3448_vm2, %v3439_v63  ;;  %3466 = vst.msk [vmem:[%s7053_s2 + $0x80] sm:$0xff] %vm3448_vm2, %v3440_v20 }
 0x4c2   :  { %v3387_v15 = vpop.permute.xlu1 %3386  ;;  %v3389_v42 = vpop.permute.xlu0 %3388 }
 0x4c3   :  { %v3441_v58 = vadd.f32 %v3387_v15, %v3296_v19  ;;  %v3442_v18 = vadd.f32 %v3389_v42, %v3297_v11 }
 0x4c5   :  { %3467 = vst.msk [vmem:[%s7053_s2 + $0x88] sm:$0xf] %vm3451_vm3, %v3441_v58 }
 0x4c6   :  { %3468 = vst.msk [vmem:[%s7053_s2 + $0x90] sm:$0xff] %vm3448_vm2, %v3442_v18  ;;  %v3391_v5 = vpop.permute.xlu1 %3390  ;;  %v3393_v56 = vpop.permute.xlu0 %3392 }
 0x4c7   :  { %v3443_v13 = vadd.f32 %v3391_v5, %v3298_v55  ;;  %v3444_v14 = vadd.f32 %v3393_v56, %v3299_v26 }
 0x4c9   :  { %3469 = vst.msk [vmem:[%s7053_s2 + $0x98] sm:$0xff] %vm3448_vm2, %v3443_v13 }
 0x4ca   :  { %3470 = vst.msk [vmem:[%s7053_s2 + $0xa0] sm:$0xf] %vm3451_vm3, %v3444_v14  ;;  %v3395_v51 = vpop.permute.xlu1 %3394  ;;  %v3397_v41 = vpop.permute.xlu0 %3396 }
 0x4cb   :  { %v3445_v17 = vadd.f32 %v3395_v51, %v3300_v59  ;;  %v3446_v4 = vadd.f32 %v3397_v41, %v3301_v34 }
 0x4cd   :  { %3471 = vst.msk [vmem:[%s7053_s2 + $0xa8] sm:$0xff] %vm3448_vm2, %v3445_v17  ;;  %3472 = vst.msk [vmem:[%s7053_s2 + $0xb0] sm:$0xff] %vm3448_vm2, %v3446_v4 }
 0x4ce   :  { %v3399_v60 = vpop.permute.xlu1 %3398 }
 0x4cf   :  { %v3447_v54 = vadd.f32 %v3399_v60, %v3302_v46 }
 0x4d1   :  { %3473 = vst.msk [vmem:[%s7053_s2 + $0xb8] sm:$0xf] %vm3451_vm3, %v3447_v54 }
 0x4d2   :  { %3478 = vsyncpa [#allocation4], 1 }
 0x4d3   :  { %3479 = vsyncpa [#allocation5], 1 }

</bundles_post_ra>
